<compile_context>
chip_gen: v7x
topology: tpu7x:2x2x1
jax: 0.10.0
libtpu: 0.0.40
codegen_flags: <defaults>
</compile_context>

<pallas_src>
import math
from functools import partial

import jax
import jax.numpy as jnp
from jax import lax
from jax.experimental import pallas as pl
from jax.experimental.pallas import tpu as pltpu


def _block_kernel(x_ref, wqkv_ref, wo_ref, w13_ref, w2_ref,
                  g1_ref, g2_ref, cosw_ref, sina_ref, sinb_ref,
                  o_ref,
                  qrot_ref, krot_ref, vsc_ref, ysc_ref,
                  *, num_heads: int, eps: float):
    """Fused transformer block for one batch element.

    x_ref    : f32[1, S, D]     (this batch element)
    wqkv_ref : bf16[D, 3D]      pre-transposed; Q/K rows permuted to the
                                per-head [even | odd] layout; Q rows pre-scaled
                                by 1/sqrt(dk)
    wo_ref   : bf16[D, D]       pre-transposed
    w13_ref  : bf16[D, 2*d_ff]  [W1 | W3] pre-transposed and concatenated
    w2_ref   : bf16[d_ff, D]    pre-transposed
    g1/g2    : f32[1, D]        RMSNorm gains
    cosw/sina/sinb : f32[S, D]  pre-tiled full-width RoPE tables
    o_ref    : f32[1, S, D]
    scratch  : qrot/krot/vsc/ysc bf16[S, D] VMEM
    """
    x = x_ref[0].astype(jnp.float32)              # [S, D]
    S, D = x.shape
    dk = D // num_heads
    half = dk // 2
    d_ff = w2_ref.shape[0]

    g1 = g1_ref[...]
    g2 = g2_ref[...]

    def rmsnorm(t, g):
        ms = jnp.mean(t * t, axis=-1, keepdims=True)
        return t * g * lax.rsqrt(ms + eps)

    # ---------------- attention branch ----------------
    h1 = rmsnorm(x, g1)
    qkv = jnp.dot(h1.astype(jnp.bfloat16), wqkv_ref[...],
                  preferred_element_type=jnp.float32)        # [S, 3D] f32
    q = qkv[:, :D]
    k = qkv[:, D:2 * D]
    v = qkv[:, 2 * D:]

    cosw = cosw_ref[...]
    sina = sina_ref[...]
    sinb = sinb_ref[...]

    def rope(t):
        # Full-width RoPE in the per-head [even | odd] feature layout.
        # The two rolls are XLU lane rotations; their cross-head wraparound
        # lanes are zero-masked inside sina / sinb.
        return (t * cosw
                + pltpu.roll(t, D - half, axis=1) * sina
                + pltpu.roll(t, half, axis=1) * sinb)

    # Stage through VMEM scratch so no big f32 value stays live across the
    # static head loop (vreg pressure / spills).
    qrot_ref[...] = rope(q).astype(jnp.bfloat16)
    krot_ref[...] = rope(k).astype(jnp.bfloat16)
    vsc_ref[...] = v.astype(jnp.bfloat16)

    # Additive causal bias, computed once (a vadd per head instead of a vsel).
    # -1e30 (not -inf) is safe: the causal diagonal guarantees at least one
    # unmasked score per row.
    row = lax.broadcasted_iota(jnp.int32, (S, S), 0)
    col = lax.broadcasted_iota(jnp.int32, (S, S), 1)
    bias = jnp.where(col <= row, 0.0, -1e30).astype(jnp.float32)

    for h in range(num_heads):                    # short static loop
        lo = h * dk
        qh = qrot_ref[:, lo:lo + dk]              # bf16 [S, dk]
        kh = krot_ref[:, lo:lo + dk]
        # Single K=dk score matmul (scale already folded into W_Q).
        s = lax.dot_general(qh, kh, (((1,), (1,)), ((), ())),
                            preferred_element_type=jnp.float32)   # [S, S]
        s = s + bias

        m = jnp.max(s, axis=-1, keepdims=True)
        p = jnp.exp(s - m)                                        # f32 [S, S]
        r = pl.reciprocal(jnp.sum(p, axis=-1, keepdims=True), approx=True)
        yh = jnp.dot(p.astype(jnp.bfloat16), vsc_ref[:, lo:lo + dk],
                     preferred_element_type=jnp.float32)          # [S, dk]
        # Deferred softmax normalization on the narrow [S, dk] result.
        ysc_ref[:, lo:lo + dk] = (yh * r).astype(jnp.bfloat16)

    # One full-K W_O projection instead of per-head K=dk matmuls.
    attn = jnp.dot(ysc_ref[...], wo_ref[...],
                   preferred_element_type=jnp.float32)            # [S, D]
    x1 = x + attn

    # ---------------- FFN branch (SwiGLU) ----------------
    h2 = rmsnorm(x1, g2)
    ab = jnp.dot(h2.astype(jnp.bfloat16), w13_ref[...],
                 preferred_element_type=jnp.float32)              # [S, 2*d_ff]
    a = ab[:, :d_ff]
    b = ab[:, d_ff:]
    gated = a * jax.nn.sigmoid(a) * b
    f = jnp.dot(gated.astype(jnp.bfloat16), w2_ref[...],
                preferred_element_type=jnp.float32)               # [S, D]

    o_ref[0] = (x1 + f).astype(o_ref.dtype)


def prepare_block_params(wqkv, wo, w1, w2, w3, g1, g2, cos_tab, sin_tab,
                         *, num_heads: int, seq_len: int, token_positions=None):
    """One-time weight / RoPE-table massaging (call at init, NOT per forward).

    PyTorch layouts in: wqkv [3D, D], wo [D, D], w1 [d_ff, D], w2 [D, d_ff],
    w3 [d_ff, D], g1/g2 [D], cos/sin tables [max_seq_len, dk//2].
    """
    D = wo.shape[0]
    dk = D // num_heads
    half = dk // 2

    # Fold RoPE's even/odd interleave into a row permutation of the Q and K
    # blocks of W_QKV (scores are invariant to a shared per-head q/k feature
    # permutation; V and W_O stay unpermuted).  NOTE: this relies on Q and K
    # receiving the identical per-head permutation — revisit for GQA/MQA.
    head_perm = jnp.concatenate([jnp.arange(0, dk, 2), jnp.arange(1, dk, 2)])
    full_perm = (jnp.arange(num_heads)[:, None] * dk
                 + head_perm[None, :]).reshape(D)
    wq = wqkv[0:D][full_perm] * (1.0 / math.sqrt(dk))   # fold score scale
    wk = wqkv[D:2 * D][full_perm]
    wv = wqkv[2 * D:]

    # Pre-transpose so every kernel matmul is a plain `x @ W`; cast to bf16.
    wqkv_t = jnp.concatenate([wq, wk, wv], axis=0).T.astype(jnp.bfloat16)  # [D,3D]
    wo_t = wo.T.astype(jnp.bfloat16)                                       # [D,D]
    w13_t = jnp.concatenate([w1, w3], axis=0).T.astype(jnp.bfloat16)       # [D,2*d_ff]
    w2_t = w2.T.astype(jnp.bfloat16)                                       # [d_ff,D]

    g1_2d = g1.reshape(1, D).astype(jnp.float32)
    g2_2d = g2.reshape(1, D).astype(jnp.float32)

    # Full-width RoPE tables in the per-head [even | odd] layout.
    if token_positions is None:
        token_positions = jnp.arange(seq_len, dtype=jnp.int32)
    cos = cos_tab[token_positions].astype(jnp.float32)   # [S, half]
    sin = sin_tab[token_positions].astype(jnp.float32)
    zeros = jnp.zeros_like(sin)
    cosw = jnp.tile(jnp.concatenate([cos, cos], axis=-1), (1, num_heads))   # [S, D]
    sina = jnp.tile(jnp.concatenate([-sin, zeros], axis=-1), (1, num_heads))
    sinb = jnp.tile(jnp.concatenate([zeros, sin], axis=-1), (1, num_heads))

    return (wqkv_t, wo_t, w13_t, w2_t, g1_2d, g2_2d, cosw, sina, sinb)


def block_forward(x, params, *, num_heads: int, eps: float = 1e-5):
    """Pallas forward of Block. `params` comes from prepare_block_params."""
    B, S, D = x.shape
    wqkv_t, wo_t, w13_t, w2_t, g1_2d, g2_2d, cosw, sina, sinb = params

    # Weights / gains / RoPE tables are whole-array VMEM residents
    # (not double-buffered by the pipeline).
    vmem = pl.BlockSpec(memory_space=pltpu.MemorySpace.VMEM)
    kernel = partial(_block_kernel, num_heads=num_heads, eps=eps)

    return pl.pallas_call(
        kernel,
        out_shape=jax.ShapeDtypeStruct((B, S, D), x.dtype),
        grid=(B,),
        in_specs=[
            pl.BlockSpec((1, S, D), lambda b: (b, 0, 0)),   # x: one batch per step
            vmem, vmem, vmem, vmem,                         # wqkv_t, wo_t, w13_t, w2_t
            vmem, vmem,                                     # g1, g2
            vmem, vmem, vmem,                               # cosw, sina, sinb
        ],
        out_specs=pl.BlockSpec((1, S, D), lambda b: (b, 0, 0)),
        scratch_shapes=[pltpu.VMEM((S, D), jnp.bfloat16)] * 4,   # qrot, krot, v, y
        compiler_params=pltpu.CompilerParams(
            dimension_semantics=("parallel",),
            vmem_limit_bytes=32 * 1024 * 1024,
        ),
    )(x, wqkv_t, wo_t, w13_t, w2_t, g1_2d, g2_2d, cosw, sina, sinb)


# ---------------- pure-JAX reference (mirrors the PyTorch module) ----------------
def _rope_ref(t, cos, sin):
    t_even = t[..., 0::2]
    t_odd = t[..., 1::2]
    r_even = t_even * cos - t_odd * sin
    r_odd = t_even * sin + t_odd * cos
    return jnp.stack([r_even, r_odd], axis=-1).reshape(t.shape)


def _block_ref(x, wqkv, wo, w1, w2, w3, g1, g2, cos, sin, *, num_heads, eps=1e-5):
    B, S, D = x.shape
    dk = D // num_heads

    def rmsnorm(t, g):
        rms = jnp.sqrt(jnp.mean(t * t, axis=-1, keepdims=True) + eps)
        return t * g / rms

    h = rmsnorm(x, g1)
    qkv = jnp.einsum('bsd,ed->bse', h, wqkv)
    q, k, v = jnp.split(qkv, 3, axis=-1)

    def to_heads(t):
        return t.reshape(B, S, num_heads, dk).transpose(0, 2, 1, 3)

    q, k, v = map(to_heads, (q, k, v))
    q = _rope_ref(q, cos, sin)
    k = _rope_ref(k, cos, sin)

    scores = jnp.einsum('bhqd,bhkd->bhqk', q, k) / math.sqrt(dk)
    mask = jnp.tril(jnp.ones((S, S), dtype=bool))
    scores = jnp.where(mask, scores, -jnp.inf)
    w = jax.nn.softmax(scores, axis=-1)
    y = jnp.einsum('bhqk,bhkd->bhqd', w, v)
    y = y.transpose(0, 2, 1, 3).reshape(B, S, D)
    x1 = x + jnp.einsum('bsd,ed->bse', y, wo)

    h2 = rmsnorm(x1, g2)
    a = jnp.einsum('bsd,fd->bsf', h2, w1)
    b = jnp.einsum('bsd,fd->bsf', h2, w3)
    f = jnp.einsum('bsf,df->bsd', a * jax.nn.sigmoid(a) * b, w2)
    return x1 + f


if __name__ == "__main__":
    d_model = 128
    num_heads = 4
    d_ff = 256
    batch, seq = 2, 128
    dk = d_model // num_heads
    theta = 10000.0

    key = jax.random.PRNGKey(0)
    kx, kq, ko, k1, k2, k3, kg1, kg2 = jax.random.split(key, 8)

    def trunc_init(k, shape, fan_in, fan_out):
        std = math.sqrt(2.0 / (fan_in + fan_out))
        return (std * jax.random.truncated_normal(k, -3.0, 3.0, shape)
                ).astype(jnp.float32)

    x = jax.random.normal(kx, (batch, seq, d_model), dtype=jnp.float32)
    wqkv = trunc_init(kq, (3 * d_model, d_model), d_model, 3 * d_model)
    wo = trunc_init(ko, (d_model, d_model), d_model, d_model)
    w1 = trunc_init(k1, (d_ff, d_model), d_model, d_ff)
    w2 = trunc_init(k2, (d_model, d_ff), d_ff, d_model)
    w3 = trunc_init(k3, (d_ff, d_model), d_model, d_ff)
    # RMSNorm gains are ones at init; perturb slightly so the path is exercised.
    g1 = 1.0 + 0.1 * jax.random.normal(kg1, (d_model,), dtype=jnp.float32)
    g2 = 1.0 + 0.1 * jax.random.normal(kg2, (d_model,), dtype=jnp.float32)

    # RoPE tables (same construction as RotaryPositionalEmbedding.__init__).
    positions = jnp.arange(seq, dtype=jnp.float32)[:, None]
    freqs = jnp.arange(0, dk, 2, dtype=jnp.float32) / dk
    inv_freqs = 1.0 / (theta ** freqs)
    angles = positions * inv_freqs[None, :]
    cos_tab = jnp.cos(angles).astype(jnp.float32)   # [seq, dk//2]
    sin_tab = jnp.sin(angles).astype(jnp.float32)

    # One-time weight / table prep (hoisted out of the per-call path).
    params = prepare_block_params(wqkv, wo, w1, w2, w3, g1, g2,
                                  cos_tab, sin_tab,
                                  num_heads=num_heads, seq_len=seq)
    params = jax.block_until_ready(params)

    out = block_forward(x, params, num_heads=num_heads)
    out = jax.block_until_ready(out)

    ref = _block_ref(x, wqkv, wo, w1, w2, w3, g1, g2, cos_tab, sin_tab,
                     num_heads=num_heads)

    assert out.shape == (batch, seq, d_model)
    assert out.dtype == x.dtype
    # The kernel uses bf16 MXU operands (f32 accumulation / residuals / softmax
    # stats), so the tolerance is looser than a pure-f32 kernel would need.
    err = jnp.abs(out - ref)
    max_err = float(jnp.max(err))
    mean_err = float(jnp.mean(err))
    assert max_err < 1.5e-1 and mean_err < 2.5e-2, (max_err, mean_err)

    print("KERNEL_OK")
</pallas_src>

<mosaic_0001>
module attributes {stable_mosaic.version = 11 : i64} {
  func.func @_block_kernel(%arg0: i32, %arg1: memref<1x128x128xf32, #tpu.memory_space<vmem>>, %arg2: memref<128x384xbf16, #tpu.memory_space<vmem>>, %arg3: memref<128x128xbf16, #tpu.memory_space<vmem>>, %arg4: memref<128x512xbf16, #tpu.memory_space<vmem>>, %arg5: memref<256x128xbf16, #tpu.memory_space<vmem>>, %arg6: memref<1x128xf32, #tpu.memory_space<vmem>>, %arg7: memref<1x128xf32, #tpu.memory_space<vmem>>, %arg8: memref<128x128xf32, #tpu.memory_space<vmem>>, %arg9: memref<128x128xf32, #tpu.memory_space<vmem>>, %arg10: memref<128x128xf32, #tpu.memory_space<vmem>>, %arg11: memref<1x128x128xf32, #tpu.memory_space<vmem>>, %arg12: memref<128x128xbf16, #tpu.memory_space<vmem>>, %arg13: memref<128x128xbf16, #tpu.memory_space<vmem>>, %arg14: memref<128x128xbf16, #tpu.memory_space<vmem>>, %arg15: memref<128x128xbf16, #tpu.memory_space<vmem>>) attributes {dimension_semantics = [#tpu.dimension_semantics<parallel>], iteration_bounds = array<i64: 2>, scalar_prefetch = 0 : i64, scratch_operands = 4 : i64, tpu.core_type = #tpu.core_type<tc>, window_params = [{transform_indices = @transform_0, window_bounds = array<i64: 1, 128, 128>}, {pipeline_mode = #tpu.pipeline_mode<synchronous>, transform_indices = @transform_1, window_bounds = array<i64: 128, 384>}, {pipeline_mode = #tpu.pipeline_mode<synchronous>, transform_indices = @transform_2, window_bounds = array<i64: 128, 128>}, {pipeline_mode = #tpu.pipeline_mode<synchronous>, transform_indices = @transform_3, window_bounds = array<i64: 128, 512>}, {pipeline_mode = #tpu.pipeline_mode<synchronous>, transform_indices = @transform_4, window_bounds = array<i64: 256, 128>}, {pipeline_mode = #tpu.pipeline_mode<synchronous>, transform_indices = @transform_5, window_bounds = array<i64: 1, 128>}, {pipeline_mode = #tpu.pipeline_mode<synchronous>, transform_indices = @transform_6, window_bounds = array<i64: 1, 128>}, {pipeline_mode = #tpu.pipeline_mode<synchronous>, transform_indices = @transform_7, window_bounds = array<i64: 128, 128>}, {pipeline_mode = #tpu.pipeline_mode<synchronous>, transform_indices = @transform_8, window_bounds = array<i64: 128, 128>}, {pipeline_mode = #tpu.pipeline_mode<synchronous>, transform_indices = @transform_9, window_bounds = array<i64: 128, 128>}, {transform_indices = @transform_10, window_bounds = array<i64: 1, 128, 128>}]} {
    %c0 = arith.constant 0 : index
    %c0_0 = arith.constant 0 : index
    %c0_1 = arith.constant 0 : index
    %0 = vector.load %arg1[%c0, %c0_0, %c0_1] : memref<1x128x128xf32, #tpu.memory_space<vmem>>, vector<1x128x128xf32>
    %1 = vector.shape_cast %0 : vector<1x128x128xf32> to vector<128x128xf32>
    %c0_2 = arith.constant 0 : index
    %c0_3 = arith.constant 0 : index
    %2 = vector.load %arg6[%c0_2, %c0_3] : memref<1x128xf32, #tpu.memory_space<vmem>>, vector<1x128xf32>
    %c0_4 = arith.constant 0 : index
    %c0_5 = arith.constant 0 : index
    %3 = vector.load %arg7[%c0_4, %c0_5] : memref<1x128xf32, #tpu.memory_space<vmem>>, vector<1x128xf32>
    %4 = arith.mulf %1, %1 : vector<128x128xf32>
    %cst = arith.constant dense<0.000000e+00> : vector<128xf32>
    %5 = vector.multi_reduction <add>, %4, %cst [1] : vector<128x128xf32> to vector<128xf32>
    %6 = vector.shape_cast %5 : vector<128xf32> to vector<128x1xf32>
    %cst_6 = arith.constant 1.280000e+02 : f32
    %7 = vector.broadcast %cst_6 : f32 to vector<128x1xf32>
    %8 = arith.divf %6, %7 : vector<128x1xf32>
    %9 = vector.broadcast %2 : vector<1x128xf32> to vector<128x128xf32>
    %10 = arith.mulf %1, %9 : vector<128x128xf32>
    %cst_7 = arith.constant 9.99999974E-6 : f32
    %11 = vector.broadcast %cst_7 : f32 to vector<128x1xf32>
    %12 = arith.addf %8, %11 : vector<128x1xf32>
    %13 = math.rsqrt %12 : vector<128x1xf32>
    %14 = vector.broadcast %13 : vector<128x1xf32> to vector<128x128xf32>
    %15 = arith.mulf %10, %14 : vector<128x128xf32>
    %16 = arith.truncf %15 : vector<128x128xf32> to vector<128x128xbf16>
    %c0_8 = arith.constant 0 : index
    %c0_9 = arith.constant 0 : index
    %17 = vector.load %arg2[%c0_8, %c0_9] : memref<128x384xbf16, #tpu.memory_space<vmem>>, vector<128x384xbf16>
    %cst_10 = arith.constant dense<0.000000e+00> : vector<128x384xf32>
    %18 = tpu.matmul %16, %17, %cst_10 {dimension_numbers = #tpu.dot_dimension_numbers<[1], [0], [0], [1], [0, 0, 1, 1], [], []>} : vector<128x128xbf16>, vector<128x384xbf16>, vector<128x384xf32> -> vector<128x384xf32>
    %19 = vector.extract_strided_slice %18 {offsets = [0, 0], sizes = [128, 128], strides = [1, 1]} : vector<128x384xf32> to vector<128x128xf32>
    %20 = vector.extract_strided_slice %18 {offsets = [0, 128], sizes = [128, 128], strides = [1, 1]} : vector<128x384xf32> to vector<128x128xf32>
    %21 = vector.extract_strided_slice %18 {offsets = [0, 256], sizes = [128, 128], strides = [1, 1]} : vector<128x384xf32> to vector<128x128xf32>
    %c0_11 = arith.constant 0 : index
    %c0_12 = arith.constant 0 : index
    %22 = vector.load %arg8[%c0_11, %c0_12] : memref<128x128xf32, #tpu.memory_space<vmem>>, vector<128x128xf32>
    %c0_13 = arith.constant 0 : index
    %c0_14 = arith.constant 0 : index
    %23 = vector.load %arg9[%c0_13, %c0_14] : memref<128x128xf32, #tpu.memory_space<vmem>>, vector<128x128xf32>
    %c0_15 = arith.constant 0 : index
    %c0_16 = arith.constant 0 : index
    %24 = vector.load %arg10[%c0_15, %c0_16] : memref<128x128xf32, #tpu.memory_space<vmem>>, vector<128x128xf32>
    %25 = arith.mulf %19, %22 : vector<128x128xf32>
    %c112_i32 = arith.constant 112 : i32
    %26 = tpu.dynamic_rotate %19 by %c112_i32 dim 1 : vector<128x128xf32>, i32 -> vector<128x128xf32>
    %27 = arith.mulf %26, %23 : vector<128x128xf32>
    %28 = arith.addf %25, %27 : vector<128x128xf32>
    %c16_i32 = arith.constant 16 : i32
    %29 = tpu.dynamic_rotate %19 by %c16_i32 dim 1 : vector<128x128xf32>, i32 -> vector<128x128xf32>
    %30 = arith.mulf %29, %24 : vector<128x128xf32>
    %31 = arith.addf %28, %30 : vector<128x128xf32>
    %32 = arith.truncf %31 : vector<128x128xf32> to vector<128x128xbf16>
    %c0_17 = arith.constant 0 : index
    %c0_18 = arith.constant 0 : index
    %33 = vector.load %arg12[%c0_17, %c0_18] : memref<128x128xbf16, #tpu.memory_space<vmem>>, vector<128x128xbf16>
    tpu.vector_store %arg12[%c0_17, %c0_18], %32 {strides = array<i32>} : memref<128x128xbf16, #tpu.memory_space<vmem>>, vector<128x128xbf16>,
    %34 = arith.mulf %20, %22 : vector<128x128xf32>
    %c112_i32_19 = arith.constant 112 : i32
    %35 = tpu.dynamic_rotate %20 by %c112_i32_19 dim 1 : vector<128x128xf32>, i32 -> vector<128x128xf32>
    %36 = arith.mulf %35, %23 : vector<128x128xf32>
    %37 = arith.addf %34, %36 : vector<128x128xf32>
    %c16_i32_20 = arith.constant 16 : i32
    %38 = tpu.dynamic_rotate %20 by %c16_i32_20 dim 1 : vector<128x128xf32>, i32 -> vector<128x128xf32>
    %39 = arith.mulf %38, %24 : vector<128x128xf32>
    %40 = arith.addf %37, %39 : vector<128x128xf32>
    %41 = arith.truncf %40 : vector<128x128xf32> to vector<128x128xbf16>
    %c0_21 = arith.constant 0 : index
    %c0_22 = arith.constant 0 : index
    %42 = vector.load %arg13[%c0_21, %c0_22] : memref<128x128xbf16, #tpu.memory_space<vmem>>, vector<128x128xbf16>
    tpu.vector_store %arg13[%c0_21, %c0_22], %41 {strides = array<i32>} : memref<128x128xbf16, #tpu.memory_space<vmem>>, vector<128x128xbf16>,
    %43 = arith.truncf %21 : vector<128x128xf32> to vector<128x128xbf16>
    %c0_23 = arith.constant 0 : index
    %c0_24 = arith.constant 0 : index
    %44 = vector.load %arg14[%c0_23, %c0_24] : memref<128x128xbf16, #tpu.memory_space<vmem>>, vector<128x128xbf16>
    tpu.vector_store %arg14[%c0_23, %c0_24], %43 {strides = array<i32>} : memref<128x128xbf16, #tpu.memory_space<vmem>>, vector<128x128xbf16>,
    %45 = tpu.iota {dimensions = array<i32: 0>} : vector<128x128xi32>
    %46 = tpu.iota {dimensions = array<i32: 1>} : vector<128x128xi32>
    %47 = arith.cmpi sle, %46, %45 : vector<128x128xi32>
    %cst_25 = arith.constant 0.000000e+00 : f32
    %cst_26 = arith.constant -1.000000e+30 : f32
    %48 = vector.broadcast %cst_25 : f32 to vector<128x128xf32>
    %49 = vector.broadcast %cst_26 : f32 to vector<128x128xf32>
    %50 = arith.select %47, %48, %49 : vector<128x128xi1>, vector<128x128xf32>
    %c0_27 = arith.constant 0 : index
    %c0_28 = arith.constant 0 : index
    %51 = vector.load %arg12[%c0_27, %c0_28] : memref<128x128xbf16, #tpu.memory_space<vmem>>, vector<128x32xbf16>
    %c0_29 = arith.constant 0 : index
    %c0_30 = arith.constant 0 : index
    %52 = vector.load %arg13[%c0_29, %c0_30] : memref<128x128xbf16, #tpu.memory_space<vmem>>, vector<128x32xbf16>
    %cst_31 = arith.constant dense<0.000000e+00> : vector<128x128xf32>
    %53 = tpu.matmul %51, %52, %cst_31 {dimension_numbers = #tpu.dot_dimension_numbers<[1], [1], [0], [0], [0, 0, 1, 0], [], []>} : vector<128x32xbf16>, vector<128x32xbf16>, vector<128x128xf32> -> vector<128x128xf32>
    %54 = arith.addf %53, %50 : vector<128x128xf32>
    %cst_32 = arith.constant dense<0xFF800000> : vector<128xf32>
    %55 = vector.multi_reduction <maximumf>, %54, %cst_32 [1] : vector<128x128xf32> to vector<128xf32>
    %56 = vector.shape_cast %55 : vector<128xf32> to vector<128x1xf32>
    %57 = vector.broadcast %56 : vector<128x1xf32> to vector<128x128xf32>
    %58 = arith.subf %54, %57 : vector<128x128xf32>
    %59 = math.exp %58 : vector<128x128xf32>
    %cst_33 = arith.constant dense<0.000000e+00> : vector<128xf32>
    %60 = vector.multi_reduction <add>, %59, %cst_33 [1] : vector<128x128xf32> to vector<128xf32>
    %61 = vector.shape_cast %60 : vector<128xf32> to vector<128x1xf32>
    %62 = tpu.reciprocal %61 {approx = true} : vector<128x1xf32> -> vector<128x1xf32>
    %63 = arith.truncf %59 : vector<128x128xf32> to vector<128x128xbf16>
    %c0_34 = arith.constant 0 : index
    %c0_35 = arith.constant 0 : index
    %64 = vector.load %arg14[%c0_34, %c0_35] : memref<128x128xbf16, #tpu.memory_space<vmem>>, vector<128x32xbf16>
    %cst_36 = arith.constant dense<0.000000e+00> : vector<128x32xf32>
    %65 = tpu.matmul %63, %64, %cst_36 {dimension_numbers = #tpu.dot_dimension_numbers<[1], [0], [0], [1], [0, 0, 1, 1], [], []>} : vector<128x128xbf16>, vector<128x32xbf16>, vector<128x32xf32> -> vector<128x32xf32>
    %66 = vector.broadcast %62 : vector<128x1xf32> to vector<128x32xf32>
    %67 = arith.mulf %65, %66 : vector<128x32xf32>
    %68 = arith.truncf %67 : vector<128x32xf32> to vector<128x32xbf16>
    %c0_37 = arith.constant 0 : index
    %c0_38 = arith.constant 0 : index
    %69 = vector.load %arg15[%c0_37, %c0_38] : memref<128x128xbf16, #tpu.memory_space<vmem>>, vector<128x32xbf16>
    tpu.vector_store %arg15[%c0_37, %c0_38], %68 {strides = array<i32>} : memref<128x128xbf16, #tpu.memory_space<vmem>>, vector<128x32xbf16>,
    %c0_39 = arith.constant 0 : index
    %c32 = arith.constant 32 : index
    %70 = vector.load %arg12[%c0_39, %c32] : memref<128x128xbf16, #tpu.memory_space<vmem>>, vector<128x32xbf16>
    %c0_40 = arith.constant 0 : index
    %c32_41 = arith.constant 32 : index
    %71 = vector.load %arg13[%c0_40, %c32_41] : memref<128x128xbf16, #tpu.memory_space<vmem>>, vector<128x32xbf16>
    %cst_42 = arith.constant dense<0.000000e+00> : vector<128x128xf32>
    %72 = tpu.matmul %70, %71, %cst_42 {dimension_numbers = #tpu.dot_dimension_numbers<[1], [1], [0], [0], [0, 0, 1, 0], [], []>} : vector<128x32xbf16>, vector<128x32xbf16>, vector<128x128xf32> -> vector<128x128xf32>
    %73 = arith.addf %72, %50 : vector<128x128xf32>
    %cst_43 = arith.constant dense<0xFF800000> : vector<128xf32>
    %74 = vector.multi_reduction <maximumf>, %73, %cst_43 [1] : vector<128x128xf32> to vector<128xf32>
    %75 = vector.shape_cast %74 : vector<128xf32> to vector<128x1xf32>
    %76 = vector.broadcast %75 : vector<128x1xf32> to vector<128x128xf32>
    %77 = arith.subf %73, %76 : vector<128x128xf32>
    %78 = math.exp %77 : vector<128x128xf32>
    %cst_44 = arith.constant dense<0.000000e+00> : vector<128xf32>
    %79 = vector.multi_reduction <add>, %78, %cst_44 [1] : vector<128x128xf32> to vector<128xf32>
    %80 = vector.shape_cast %79 : vector<128xf32> to vector<128x1xf32>
    %81 = tpu.reciprocal %80 {approx = true} : vector<128x1xf32> -> vector<128x1xf32>
    %82 = arith.truncf %78 : vector<128x128xf32> to vector<128x128xbf16>
    %c0_45 = arith.constant 0 : index
    %c32_46 = arith.constant 32 : index
    %83 = vector.load %arg14[%c0_45, %c32_46] : memref<128x128xbf16, #tpu.memory_space<vmem>>, vector<128x32xbf16>
    %cst_47 = arith.constant dense<0.000000e+00> : vector<128x32xf32>
    %84 = tpu.matmul %82, %83, %cst_47 {dimension_numbers = #tpu.dot_dimension_numbers<[1], [0], [0], [1], [0, 0, 1, 1], [], []>} : vector<128x128xbf16>, vector<128x32xbf16>, vector<128x32xf32> -> vector<128x32xf32>
    %85 = vector.broadcast %81 : vector<128x1xf32> to vector<128x32xf32>
    %86 = arith.mulf %84, %85 : vector<128x32xf32>
    %87 = arith.truncf %86 : vector<128x32xf32> to vector<128x32xbf16>
    %c0_48 = arith.constant 0 : index
    %c32_49 = arith.constant 32 : index
    %88 = vector.load %arg15[%c0_48, %c32_49] : memref<128x128xbf16, #tpu.memory_space<vmem>>, vector<128x32xbf16>
    tpu.vector_store %arg15[%c0_48, %c32_49], %87 {strides = array<i32>} : memref<128x128xbf16, #tpu.memory_space<vmem>>, vector<128x32xbf16>,
    %c0_50 = arith.constant 0 : index
    %c64 = arith.constant 64 : index
    %89 = vector.load %arg12[%c0_50, %c64] : memref<128x128xbf16, #tpu.memory_space<vmem>>, vector<128x32xbf16>
    %c0_51 = arith.constant 0 : index
    %c64_52 = arith.constant 64 : index
    %90 = vector.load %arg13[%c0_51, %c64_52] : memref<128x128xbf16, #tpu.memory_space<vmem>>, vector<128x32xbf16>
    %cst_53 = arith.constant dense<0.000000e+00> : vector<128x128xf32>
    %91 = tpu.matmul %89, %90, %cst_53 {dimension_numbers = #tpu.dot_dimension_numbers<[1], [1], [0], [0], [0, 0, 1, 0], [], []>} : vector<128x32xbf16>, vector<128x32xbf16>, vector<128x128xf32> -> vector<128x128xf32>
    %92 = arith.addf %91, %50 : vector<128x128xf32>
    %cst_54 = arith.constant dense<0xFF800000> : vector<128xf32>
    %93 = vector.multi_reduction <maximumf>, %92, %cst_54 [1] : vector<128x128xf32> to vector<128xf32>
    %94 = vector.shape_cast %93 : vector<128xf32> to vector<128x1xf32>
    %95 = vector.broadcast %94 : vector<128x1xf32> to vector<128x128xf32>
    %96 = arith.subf %92, %95 : vector<128x128xf32>
    %97 = math.exp %96 : vector<128x128xf32>
    %cst_55 = arith.constant dense<0.000000e+00> : vector<128xf32>
    %98 = vector.multi_reduction <add>, %97, %cst_55 [1] : vector<128x128xf32> to vector<128xf32>
    %99 = vector.shape_cast %98 : vector<128xf32> to vector<128x1xf32>
    %100 = tpu.reciprocal %99 {approx = true} : vector<128x1xf32> -> vector<128x1xf32>
    %101 = arith.truncf %97 : vector<128x128xf32> to vector<128x128xbf16>
    %c0_56 = arith.constant 0 : index
    %c64_57 = arith.constant 64 : index
    %102 = vector.load %arg14[%c0_56, %c64_57] : memref<128x128xbf16, #tpu.memory_space<vmem>>, vector<128x32xbf16>
    %cst_58 = arith.constant dense<0.000000e+00> : vector<128x32xf32>
    %103 = tpu.matmul %101, %102, %cst_58 {dimension_numbers = #tpu.dot_dimension_numbers<[1], [0], [0], [1], [0, 0, 1, 1], [], []>} : vector<128x128xbf16>, vector<128x32xbf16>, vector<128x32xf32> -> vector<128x32xf32>
    %104 = vector.broadcast %100 : vector<128x1xf32> to vector<128x32xf32>
    %105 = arith.mulf %103, %104 : vector<128x32xf32>
    %106 = arith.truncf %105 : vector<128x32xf32> to vector<128x32xbf16>
    %c0_59 = arith.constant 0 : index
    %c64_60 = arith.constant 64 : index
    %107 = vector.load %arg15[%c0_59, %c64_60] : memref<128x128xbf16, #tpu.memory_space<vmem>>, vector<128x32xbf16>
    tpu.vector_store %arg15[%c0_59, %c64_60], %106 {strides = array<i32>} : memref<128x128xbf16, #tpu.memory_space<vmem>>, vector<128x32xbf16>,
    %c0_61 = arith.constant 0 : index
    %c96 = arith.constant 96 : index
    %108 = vector.load %arg12[%c0_61, %c96] : memref<128x128xbf16, #tpu.memory_space<vmem>>, vector<128x32xbf16>
    %c0_62 = arith.constant 0 : index
    %c96_63 = arith.constant 96 : index
    %109 = vector.load %arg13[%c0_62, %c96_63] : memref<128x128xbf16, #tpu.memory_space<vmem>>, vector<128x32xbf16>
    %cst_64 = arith.constant dense<0.000000e+00> : vector<128x128xf32>
    %110 = tpu.matmul %108, %109, %cst_64 {dimension_numbers = #tpu.dot_dimension_numbers<[1], [1], [0], [0], [0, 0, 1, 0], [], []>} : vector<128x32xbf16>, vector<128x32xbf16>, vector<128x128xf32> -> vector<128x128xf32>
    %111 = arith.addf %110, %50 : vector<128x128xf32>
    %cst_65 = arith.constant dense<0xFF800000> : vector<128xf32>
    %112 = vector.multi_reduction <maximumf>, %111, %cst_65 [1] : vector<128x128xf32> to vector<128xf32>
    %113 = vector.shape_cast %112 : vector<128xf32> to vector<128x1xf32>
    %114 = vector.broadcast %113 : vector<128x1xf32> to vector<128x128xf32>
    %115 = arith.subf %111, %114 : vector<128x128xf32>
    %116 = math.exp %115 : vector<128x128xf32>
    %cst_66 = arith.constant dense<0.000000e+00> : vector<128xf32>
    %117 = vector.multi_reduction <add>, %116, %cst_66 [1] : vector<128x128xf32> to vector<128xf32>
    %118 = vector.shape_cast %117 : vector<128xf32> to vector<128x1xf32>
    %119 = tpu.reciprocal %118 {approx = true} : vector<128x1xf32> -> vector<128x1xf32>
    %120 = arith.truncf %116 : vector<128x128xf32> to vector<128x128xbf16>
    %c0_67 = arith.constant 0 : index
    %c96_68 = arith.constant 96 : index
    %121 = vector.load %arg14[%c0_67, %c96_68] : memref<128x128xbf16, #tpu.memory_space<vmem>>, vector<128x32xbf16>
    %cst_69 = arith.constant dense<0.000000e+00> : vector<128x32xf32>
    %122 = tpu.matmul %120, %121, %cst_69 {dimension_numbers = #tpu.dot_dimension_numbers<[1], [0], [0], [1], [0, 0, 1, 1], [], []>} : vector<128x128xbf16>, vector<128x32xbf16>, vector<128x32xf32> -> vector<128x32xf32>
    %123 = vector.broadcast %119 : vector<128x1xf32> to vector<128x32xf32>
    %124 = arith.mulf %122, %123 : vector<128x32xf32>
    %125 = arith.truncf %124 : vector<128x32xf32> to vector<128x32xbf16>
    %c0_70 = arith.constant 0 : index
    %c96_71 = arith.constant 96 : index
    %126 = vector.load %arg15[%c0_70, %c96_71] : memref<128x128xbf16, #tpu.memory_space<vmem>>, vector<128x32xbf16>
    tpu.vector_store %arg15[%c0_70, %c96_71], %125 {strides = array<i32>} : memref<128x128xbf16, #tpu.memory_space<vmem>>, vector<128x32xbf16>,
    %c0_72 = arith.constant 0 : index
    %c0_73 = arith.constant 0 : index
    %127 = vector.load %arg15[%c0_72, %c0_73] : memref<128x128xbf16, #tpu.memory_space<vmem>>, vector<128x128xbf16>
    %c0_74 = arith.constant 0 : index
    %c0_75 = arith.constant 0 : index
    %128 = vector.load %arg3[%c0_74, %c0_75] : memref<128x128xbf16, #tpu.memory_space<vmem>>, vector<128x128xbf16>
    %cst_76 = arith.constant dense<0.000000e+00> : vector<128x128xf32>
    %129 = tpu.matmul %127, %128, %cst_76 {dimension_numbers = #tpu.dot_dimension_numbers<[1], [0], [0], [1], [0, 0, 1, 1], [], []>} : vector<128x128xbf16>, vector<128x128xbf16>, vector<128x128xf32> -> vector<128x128xf32>
    %130 = arith.addf %1, %129 : vector<128x128xf32>
    %131 = arith.mulf %130, %130 : vector<128x128xf32>
    %cst_77 = arith.constant dense<0.000000e+00> : vector<128xf32>
    %132 = vector.multi_reduction <add>, %131, %cst_77 [1] : vector<128x128xf32> to vector<128xf32>
    %133 = vector.shape_cast %132 : vector<128xf32> to vector<128x1xf32>
    %cst_78 = arith.constant 1.280000e+02 : f32
    %134 = vector.broadcast %cst_78 : f32 to vector<128x1xf32>
    %135 = arith.divf %133, %134 : vector<128x1xf32>
    %136 = vector.broadcast %3 : vector<1x128xf32> to vector<128x128xf32>
    %137 = arith.mulf %130, %136 : vector<128x128xf32>
    %cst_79 = arith.constant 9.99999974E-6 : f32
    %138 = vector.broadcast %cst_79 : f32 to vector<128x1xf32>
    %139 = arith.addf %135, %138 : vector<128x1xf32>
    %140 = math.rsqrt %139 : vector<128x1xf32>
    %141 = vector.broadcast %140 : vector<128x1xf32> to vector<128x128xf32>
    %142 = arith.mulf %137, %141 : vector<128x128xf32>
    %143 = arith.truncf %142 : vector<128x128xf32> to vector<128x128xbf16>
    %c0_80 = arith.constant 0 : index
    %c0_81 = arith.constant 0 : index
    %144 = vector.load %arg4[%c0_80, %c0_81] : memref<128x512xbf16, #tpu.memory_space<vmem>>, vector<128x512xbf16>
    %cst_82 = arith.constant dense<0.000000e+00> : vector<128x512xf32>
    %145 = tpu.matmul %143, %144, %cst_82 {dimension_numbers = #tpu.dot_dimension_numbers<[1], [0], [0], [1], [0, 0, 1, 1], [], []>} : vector<128x128xbf16>, vector<128x512xbf16>, vector<128x512xf32> -> vector<128x512xf32>
    %146 = vector.extract_strided_slice %145 {offsets = [0, 0], sizes = [128, 256], strides = [1, 1]} : vector<128x512xf32> to vector<128x256xf32>
    %147 = vector.extract_strided_slice %145 {offsets = [0, 256], sizes = [128, 256], strides = [1, 1]} : vector<128x512xf32> to vector<128x256xf32>
    %148 = arith.negf %146 : vector<128x256xf32>
    %149 = math.exp %148 : vector<128x256xf32>
    %cst_83 = arith.constant 1.000000e+00 : f32
    %150 = vector.broadcast %cst_83 : f32 to vector<128x256xf32>
    %151 = arith.addf %150, %149 : vector<128x256xf32>
    %152 = arith.divf %150, %151 : vector<128x256xf32>
    %153 = arith.mulf %146, %152 : vector<128x256xf32>
    %154 = arith.mulf %153, %147 : vector<128x256xf32>
    %155 = arith.truncf %154 : vector<128x256xf32> to vector<128x256xbf16>
    %c0_84 = arith.constant 0 : index
    %c0_85 = arith.constant 0 : index
    %156 = vector.load %arg5[%c0_84, %c0_85] : memref<256x128xbf16, #tpu.memory_space<vmem>>, vector<256x128xbf16>
    %cst_86 = arith.constant dense<0.000000e+00> : vector<128x128xf32>
    %157 = tpu.matmul %155, %156, %cst_86 {dimension_numbers = #tpu.dot_dimension_numbers<[1], [0], [0], [1], [0, 0, 1, 1], [], []>} : vector<128x256xbf16>, vector<256x128xbf16>, vector<128x128xf32> -> vector<128x128xf32>
    %158 = arith.addf %130, %157 : vector<128x128xf32>
    %c0_87 = arith.constant 0 : index
    %c0_88 = arith.constant 0 : index
    %c0_89 = arith.constant 0 : index
    %159 = vector.load %arg11[%c0_87, %c0_88, %c0_89] : memref<1x128x128xf32, #tpu.memory_space<vmem>>, vector<1x128x128xf32>
    %160 = vector.shape_cast %159 : vector<1x128x128xf32> to vector<128x128xf32>
    %161 = vector.shape_cast %158 : vector<128x128xf32> to vector<1x128x128xf32>
    tpu.vector_store %arg11[%c0_87, %c0_88, %c0_89], %161 {strides = array<i32>} : memref<1x128x128xf32, #tpu.memory_space<vmem>>, vector<1x128x128xf32>,
    return
  }
  func.func @transform_0(%arg0: i32) -> (i32, i32, i32) {
    %c0_i32 = arith.constant 0 : i32
    %c0_i32_0 = arith.constant 0 : i32
    %c0_i32_1 = arith.constant 0 : i32
    return %arg0, %c0_i32, %c0_i32_0 : i32, i32, i32
  }
  func.func @transform_1(%arg0: i32) -> (i32, i32) {
    %c0_i32 = arith.constant 0 : i32
    %c0_i32_0 = arith.constant 0 : i32
    %c0_i32_1 = arith.constant 0 : i32
    return %c0_i32, %c0_i32_0 : i32, i32
  }
  func.func @transform_2(%arg0: i32) -> (i32, i32) {
    %c0_i32 = arith.constant 0 : i32
    %c0_i32_0 = arith.constant 0 : i32
    %c0_i32_1 = arith.constant 0 : i32
    return %c0_i32, %c0_i32_0 : i32, i32
  }
  func.func @transform_3(%arg0: i32) -> (i32, i32) {
    %c0_i32 = arith.constant 0 : i32
    %c0_i32_0 = arith.constant 0 : i32
    %c0_i32_1 = arith.constant 0 : i32
    return %c0_i32, %c0_i32_0 : i32, i32
  }
  func.func @transform_4(%arg0: i32) -> (i32, i32) {
    %c0_i32 = arith.constant 0 : i32
    %c0_i32_0 = arith.constant 0 : i32
    %c0_i32_1 = arith.constant 0 : i32
    return %c0_i32, %c0_i32_0 : i32, i32
  }
  func.func @transform_5(%arg0: i32) -> (i32, i32) {
    %c0_i32 = arith.constant 0 : i32
    %c0_i32_0 = arith.constant 0 : i32
    %c0_i32_1 = arith.constant 0 : i32
    return %c0_i32, %c0_i32_0 : i32, i32
  }
  func.func @transform_6(%arg0: i32) -> (i32, i32) {
    %c0_i32 = arith.constant 0 : i32
    %c0_i32_0 = arith.constant 0 : i32
    %c0_i32_1 = arith.constant 0 : i32
    return %c0_i32, %c0_i32_0 : i32, i32
  }
  func.func @transform_7(%arg0: i32) -> (i32, i32) {
    %c0_i32 = arith.constant 0 : i32
    %c0_i32_0 = arith.constant 0 : i32
    %c0_i32_1 = arith.constant 0 : i32
    return %c0_i32, %c0_i32_0 : i32, i32
  }
  func.func @transform_8(%arg0: i32) -> (i32, i32) {
    %c0_i32 = arith.constant 0 : i32
    %c0_i32_0 = arith.constant 0 : i32
    %c0_i32_1 = arith.constant 0 : i32
    return %c0_i32, %c0_i32_0 : i32, i32
  }
  func.func @transform_9(%arg0: i32) -> (i32, i32) {
    %c0_i32 = arith.constant 0 : i32
    %c0_i32_0 = arith.constant 0 : i32
    %c0_i32_1 = arith.constant 0 : i32
    return %c0_i32, %c0_i32_0 : i32, i32
  }
  func.func @transform_10(%arg0: i32) -> (i32, i32, i32) {
    %c0_i32 = arith.constant 0 : i32
    %c0_i32_0 = arith.constant 0 : i32
    %c0_i32_1 = arith.constant 0 : i32
    return %arg0, %c0_i32, %c0_i32_0 : i32, i32, i32
  }
}

</mosaic_0001>

<bundles_post_ra>
// kernel: tpu_custom_call.1
= control target key start
LH: loop header
LB: loop body
LE: loop exit
PB: predicated region body
PF: predicated region fallthrough
CT: control target
= control target key end

     0   :  { %s9412_s0 = inlined_call_operand.hbm [shape: f32[2,128,128], index: 0, kind: input, shape index: {}]   ;;  %s9413_s1 = inlined_call_operand.hbm [shape: bf16[128,384], index: 1, kind: input, shape index: {}]   ;;  %s9414_s2 = inlined_call_operand.hbm [shape: bf16[128,128], index: 2, kind: input, shape index: {}]   ;;  %s9415_s3 = inlined_call_operand.hbm [shape: bf16[128,512], index: 3, kind: input, shape index: {}]   ;;  %s9416_s4 = inlined_call_operand.hbm [shape: bf16[256,128], index: 4, kind: input, shape index: {}]   ;;  %s9417_s5 = inlined_call_operand.vmem [shape: f32[1,128], index: 5, kind: input, shape index: {}]   ;;  %s9418_s6 = inlined_call_operand.vmem [shape: f32[1,128], index: 6, kind: input, shape index: {}]   ;;  %s9419_s7 = inlined_call_operand.hbm [shape: f32[128,128], index: 7, kind: input, shape index: {}]   ;;  %s9420_s8 = inlined_call_operand.hbm [shape: f32[128,128], index: 8, kind: input, shape index: {}]   ;;  %s9421_s9 = inlined_call_operand.hbm [shape: f32[128,128], index: 9, kind: input, shape index: {}]   ;;  %s9422_s10 = inlined_call_operand.hbm [shape: f32[2,128,128], index: 10, kind: output, shape index: {}]  }
   0x1   :  { %9512 = sst [smem:[#allocation85_spill]] %s9413_s1 }
   0x2   :  { %9513 = sst [smem:[#allocation86_spill]] %s9414_s2 }
   0x3   :  { %9514 = sst [smem:[#allocation87_spill]] %s9418_s6 }
   0x4   :  { %9515 = sst [smem:[#allocation88_spill]] %s9422_s10 }
   0x5   :  { %15 = vsyncpa [#allocation7], 0 }
   0x6   :  { %17 = vsyncpa [#allocation7 + $0x1], 0 }
   0x7   :  { %18 = vsyncpa [#allocation10], 0 }
   0x8   :  { %19 = vsyncpa [#allocation13], 0 }
   0x9   :  { %20 = vsyncpa [#allocation16], 0 }
   0xa   :  { %21 = vsyncpa [#allocation19], 0 }
   0xb   :  { %22 = vsyncpa [#allocation8], 0 }
   0xc   :  { %24 = vsyncpa [#allocation8 + $0x1], 0  ;;  %s6812_s13 = smov 0   ;;  %s6814_s14 = smov 0  }
   0xd   :  { %s6816_s15 = smov 0   ;;  %s6818_s16 = smov 0  }
   0xe LB: > { %s6731_s17 = smov [#allocation9]   ;;  %s6833_s19 = sadd.s32 4294967295, %s6729_s16   ;;  %s6729_s16 = sphi %s6818_s16, %s9735_s16   ;;  %s6725_s15 = sphi %s6816_s15, %s9734_s15   ;;  %s6721_s14 = sphi %s6814_s14, %s9733_s14   ;;  %s6717_s13 = sphi %s6812_s13, %s9732_s13  }
   0xf   : > { %s288_s18 = sshll.u32 %s6731_s17, 4  ;;  %p4952_p0 = scmp.ge.s32.totalorder %s6729_s16, 1  ;;  %s6838_s18 = int_to_ptr.vmem [resolvable:$true] %s288_s18 }
  0x10   : > { %p9424_p1 = scmp.eq.s32.totalorder %s6833_s19, 0  ;;  %p276_p2 = scmp.lt.s32.totalorder %s6729_s16, 3 }
  0x11   : > { %s6732_s21 = smov [#allocation12]   ;;  %s6733_s24 = smov [#allocation15]  }
  0x12   : > { %p6840_p3 = pnand %p4952_p0, %p276_p2  ;;  %s314_s22 = sshll.u32 %s6732_s21, 4  ;;  %s6853_s22 = int_to_ptr.vmem [resolvable:$true] %s314_s22 }
  0x13   : > { %s6855_s25 = sshll.u32 %s6733_s24, 4  ;;  %s9518_s1 = sld [smem:[#allocation85_spill]]  ;;  %s347_s25 = int_to_ptr.vmem [resolvable:$true] %s6855_s25 }
  0x14   : > { %s9516_s20 = scalar_select %p6840_p3, 1, 0 }
  0x15   : > { %p5751_p5 = pneg %p6840_p3 }
  0x17   : > { %p6849_p6 = pnand %p5751_p5, %p9424_p1 }
  0x19   : > { %s6421_s28 = scalar_lea.hbm %s9518_s1, 3072  ;;  %p6865_p8 = pneg %p6849_p6 }
  0x1a   : > { %p6422_p7 = scmp.ne.s32.totalorder %s9518_s1, %s6421_s28  ;;  %p6428_p11 = scmp.lt.u32.totalorder %s6421_s28, %s9518_s1 }
  0x1c   : > { %p6424_p9 = pnand %p6865_p8, %p6422_p7 }
  0x1e   : > { %p6425_p10 = pneg %p6424_p9 }
  0x20   : > { %p6430_p12 = pnand %p6428_p11, %p6425_p10 }
  0x22   : > { %6433 = shalt.err (!%p6430_p12)
}
  0x23   : > { %s6434_s21 = scalar_lea.vmem %s6838_s18, 3072  ;;  %p6442_p5 = scmp.lt.s32.totalorder %s6838_s18, %s6838_s18 }
  0x24   : > { %p6435_p13 = scmp.ne.s32.totalorder %s6838_s18, %s6434_s21  ;;  %p6443_p4 = scmp.lt.s32.totalorder %s6434_s21, %s6434_s21 }
  0x26   : > { %p6437_p0 = pnand %p6435_p13, %p6865_p8  ;;  %p6444_p7 = por %p6443_p4, %p6442_p5 }
  0x28   : > { %p6438_p2 = pneg %p6437_p0 }
  0x2a   : > { %p6445_p9 = pnand %p6444_p7, %p6438_p2 }
  0x2c   : > { %6448 = shalt.err (!%p6445_p9)
}
  0x2d   : > { %s6734_s24 = smov 192   ;;  %s6735_s26 = smov 12  }
  0x2e   : > { %5754 = dma.hbm_to_vmem [thread:$0]  (!%p6849_p6), %s9518_s1, 3072, %s6838_s18, [#allocation10], %s6734_s24, %s6734_s24, %s6735_s26  }
  0x2f   : > { %s6449_s12 = scalar_lea.hbm %s9415_s3, 4096 }
  0x30   : > { %p6450_p4 = scmp.ne.s32.totalorder %s9415_s3, %s6449_s12  ;;  %p6456_p12 = scmp.lt.u32.totalorder %s6449_s12, %s9415_s3 }
  0x32   : > { %p6452_p10 = pnand %p6450_p4, %p6865_p8 }
  0x34   : > { %p6453_p11 = pneg %p6452_p10 }
  0x36   : > { %p6458_p13 = pnand %p6456_p12, %p6453_p11 }
  0x38   : > { %6461 = shalt.err (!%p6458_p13)
}
  0x39   : > { %s6462_s18 = scalar_lea.vmem %s6853_s22, 4096  ;;  %p6470_p7 = scmp.lt.s32.totalorder %s6853_s22, %s6853_s22 }
  0x3a   : > { %p6463_p0 = scmp.ne.s32.totalorder %s6853_s22, %s6462_s18  ;;  %p6471_p9 = scmp.lt.s32.totalorder %s6462_s18, %s6462_s18 }
  0x3c   : > { %p6465_p2 = pnand %p6463_p0, %p6865_p8  ;;  %p6472_p4 = por %p6471_p9, %p6470_p7 }
  0x3e   : > { %p6466_p5 = pneg %p6465_p2 }
  0x40   : > { %p6473_p10 = pnand %p6472_p4, %p6466_p5 }
  0x42   : > { %6476 = shalt.err (!%p6473_p10)
}
  0x43   : > { %s6736_s10 = smov 256   ;;  %s6737_s6 = smov 16  }
  0x44   : > { %5760 = dma.hbm_to_vmem [thread:$0]  (!%p6849_p6), %s9415_s3, 4096, %s6853_s22, [#allocation13], %s6736_s10, %s6736_s10, %s6737_s6  }
  0x45   : > { %s6477_s29 = scalar_lea.hbm %s9419_s7, 2048 }
  0x46   : > { %p6478_p11 = scmp.ne.s32.totalorder %s9419_s7, %s6477_s29  ;;  %p6484_p0 = scmp.lt.u32.totalorder %s6477_s29, %s9419_s7 }
  0x48   : > { %p6480_p12 = pnand %p6478_p11, %p6865_p8 }
  0x4a   : > { %p6481_p13 = pneg %p6480_p12 }
  0x4c   : > { %p6486_p2 = pnand %p6484_p0, %p6481_p13 }
  0x4e   : > { %6489 = shalt.err (!%p6486_p2)
}
  0x4f   : > { %s6490_s18 = scalar_lea.vmem %s347_s25, 2048  ;;  %p6498_p4 = scmp.lt.s32.totalorder %s347_s25, %s347_s25 }
  0x50   : > { %p6491_p5 = scmp.ne.s32.totalorder %s347_s25, %s6490_s18  ;;  %p6499_p10 = scmp.lt.s32.totalorder %s6490_s18, %s6490_s18 }
  0x52   : > { %p6493_p7 = pnand %p6491_p5, %p6865_p8  ;;  %p6500_p1 = por %p6499_p10, %p6498_p4 }
  0x54   : > { %p6494_p9 = pneg %p6493_p7 }
  0x56   : > { %p6501_p3 = pnand %p6500_p1, %p6494_p9 }
  0x58   : > { %6504 = shalt.err (!%p6501_p3)
}
  0x59   : > { %s9426_s22 = smov 128   ;;  %s9428_s10 = smov 8  }
  0x5a   : > { %5766 = dma.hbm_to_vmem [thread:$0]  (!%p6849_p6), %s9419_s7, 2048, %s347_s25, [#allocation16], %s9426_s22, %s9426_s22, %s9428_s10  }
  0x5b   : > { %s6740_s26 = smov [#allocation11]   ;;  %s9520_s2 = sld [smem:[#allocation86_spill]] }
  0x5c   : > { %s301_s27 = sshll.u32 %s6740_s26, 4  ;;  %s302_s27 = int_to_ptr.vmem [resolvable:$true] %s301_s27 }
  0x61   : > { %s6505_s30 = scalar_lea.hbm %s9520_s2, 1024 }
  0x62   : > { %p6506_p1 = scmp.ne.s32.totalorder %s9520_s2, %s6505_s30  ;;  %p6512_p12 = scmp.lt.u32.totalorder %s6505_s30, %s9520_s2 }
  0x64   : > { %p6508_p3 = pnand %p6506_p1, %p6865_p8 }
  0x66   : > { %p6509_p11 = pneg %p6508_p3 }
  0x68   : > { %p6514_p13 = pnand %p6512_p12, %p6509_p11 }
  0x6a   : > { %6517 = shalt.err (!%p6514_p13)
}
  0x6b   : > { %s6518_s25 = scalar_lea.vmem %s302_s27, 1024  ;;  %p6526_p7 = scmp.lt.s32.totalorder %s302_s27, %s302_s27 }
  0x6c   : > { %p6519_p0 = scmp.ne.s32.totalorder %s302_s27, %s6518_s25  ;;  %p6527_p9 = scmp.lt.s32.totalorder %s6518_s25, %s6518_s25 }
  0x6e   : > { %p6521_p2 = pnand %p6519_p0, %p6865_p8  ;;  %p6528_p4 = por %p6527_p9, %p6526_p7 }
  0x70   : > { %p6522_p5 = pneg %p6521_p2 }
  0x72   : > { %p6529_p10 = pnand %p6528_p4, %p6522_p5 }
  0x74   : > { %6532 = shalt.err (!%p6529_p10)
}
  0x75   : > { %s6741_s6 = smov 64   ;;  %s6742_s24 = smov 4  }
  0x76   : > { %5757 = dma.hbm_to_vmem [thread:$0]  (!%p6849_p6), %s9520_s2, 1024, %s302_s27, [#allocation10], %s6741_s6, %s6741_s6, %s6742_s24  }
  0x77   : > { %s6743_s29 = smov [#allocation14]   ;;  %s6744_s12 = smov [#allocation17]  }
  0x78   : > { %s327_s30 = sshll.u32 %s6743_s29, 4  ;;  %s359_s17 = sshll.u32 %s6744_s12, 4  ;;  %s328_s30 = int_to_ptr.vmem [resolvable:$true] %s327_s30  ;;  %s6949_s17 = int_to_ptr.vmem [resolvable:$true] %s359_s17 }
  0x79   : > { %s6533_s25 = scalar_lea.hbm %s9416_s4, 2048 }
  0x7a   : > { %p6534_p1 = scmp.ne.s32.totalorder %s9416_s4, %s6533_s25  ;;  %p6540_p12 = scmp.lt.u32.totalorder %s6533_s25, %s9416_s4 }
  0x7c   : > { %p6536_p3 = pnand %p6534_p1, %p6865_p8 }
  0x7e   : > { %p6537_p11 = pneg %p6536_p3 }
  0x80   : > { %p6542_p13 = pnand %p6540_p12, %p6537_p11 }
  0x82   : > { %6545 = shalt.err (!%p6542_p13)
}
  0x83   : > { %s6546_s28 = scalar_lea.vmem %s328_s30, 2048  ;;  %p6554_p7 = scmp.lt.s32.totalorder %s328_s30, %s328_s30 }
  0x84   : > { %p6547_p0 = scmp.ne.s32.totalorder %s328_s30, %s6546_s28  ;;  %p6555_p9 = scmp.lt.s32.totalorder %s6546_s28, %s6546_s28 }
  0x86   : > { %p6549_p2 = pnand %p6547_p0, %p6865_p8  ;;  %p6556_p4 = por %p6555_p9, %p6554_p7 }
  0x88   : > { %p6550_p5 = pneg %p6549_p2 }
  0x8a   : > { %p6557_p10 = pnand %p6556_p4, %p6550_p5 }
  0x8c   : > { %6560 = shalt.err (!%p6557_p10)
}
  0x8d   : > { %5763 = dma.hbm_to_vmem [thread:$0]  (!%p6849_p6), %s9416_s4, 2048, %s328_s30, [#allocation13], %s6741_s6, %s6741_s6, %s6742_s24  }
  0x8e   : > { %s6561_s21 = scalar_lea.hbm %s9420_s8, 2048 }
  0x8f   : > { %p6562_p1 = scmp.ne.s32.totalorder %s9420_s8, %s6561_s21  ;;  %p6568_p12 = scmp.lt.u32.totalorder %s6561_s21, %s9420_s8 }
  0x91   : > { %p6564_p3 = pnand %p6562_p1, %p6865_p8 }
  0x93   : > { %p6565_p11 = pneg %p6564_p3 }
  0x95   : > { %p6570_p13 = pnand %p6568_p12, %p6565_p11 }
  0x97   : > { %6573 = shalt.err (!%p6570_p13)
}
  0x98   : > { %s6574_s6 = scalar_lea.vmem %s6949_s17, 2048  ;;  %p6582_p7 = scmp.lt.s32.totalorder %s6949_s17, %s6949_s17 }
  0x99   : > { %p6575_p0 = scmp.ne.s32.totalorder %s6949_s17, %s6574_s6  ;;  %p6583_p9 = scmp.lt.s32.totalorder %s6574_s6, %s6574_s6 }
  0x9b   : > { %p6577_p2 = pnand %p6575_p0, %p6865_p8  ;;  %p6584_p4 = por %p6583_p9, %p6582_p7 }
  0x9d   : > { %p6578_p5 = pneg %p6577_p2 }
  0x9f   : > { %p6585_p10 = pnand %p6584_p4, %p6578_p5 }
  0xa1   : > { %6588 = shalt.err (!%p6585_p10)
}
  0xa2   : > { %s9521_s24 = smov 8   ;;  %s9522_s30 = smov 128  }
  0xa3   : > { %5769 = dma.hbm_to_vmem [thread:$0]  (!%p6849_p6), %s9420_s8, 2048, %s6949_s17, [#allocation16], %s9522_s30, %s9522_s30, %s9521_s24  }
  0xa4   : > { %s6745_s10 = smov [#allocation18]   ;;  %s6589_s18 = scalar_lea.hbm %s9421_s9, 2048 }
  0xa5   : > { %s372_s29 = sshll.u32 %s6745_s10, 4  ;;  %p6590_p1 = scmp.ne.s32.totalorder %s9421_s9, %s6589_s18  ;;  %s373_s29 = int_to_ptr.vmem [resolvable:$true] %s372_s29 }
  0xa6   : > { %p6596_p12 = scmp.lt.u32.totalorder %s6589_s18, %s9421_s9 }
  0xa7   : > { %p6592_p3 = pnand %p6590_p1, %p6865_p8 }
  0xa9   : > { %p6593_p11 = pneg %p6592_p3 }
  0xab   : > { %p6598_p13 = pnand %p6596_p12, %p6593_p11 }
  0xad   : > { %6601 = shalt.err (!%p6598_p13)
}
  0xae   : > { %s6602_s17 = scalar_lea.vmem %s373_s29, 2048  ;;  %p6610_p7 = scmp.lt.s32.totalorder %s373_s29, %s373_s29 }
  0xaf   : > { %p6603_p0 = scmp.ne.s32.totalorder %s373_s29, %s6602_s17  ;;  %p6611_p9 = scmp.lt.s32.totalorder %s6602_s17, %s6602_s17 }
  0xb1   : > { %p6605_p2 = pnand %p6603_p0, %p6865_p8  ;;  %p6612_p4 = por %p6611_p9, %p6610_p7 }
  0xb3   : > { %p6606_p5 = pneg %p6605_p2 }
  0xb5   : > { %p6613_p10 = pnand %p6612_p4, %p6606_p5 }
  0xb7   : > { %6616 = shalt.err (!%p6613_p10)
}
  0xb8   : > { %5772 = dma.hbm_to_vmem [thread:$0]  (!%p6849_p6), %s9421_s9, 2048, %s373_s29, [#allocation19], %s9522_s30, %s9522_s30, %s9521_s24  }
  0xb9   : > { %s4951_s23 = sadd.s32 4294967294, %s6729_s16   ;;  %s7018_s11 = sadd.s32 1, %s6729_s16  }
  0xba   : > { %s37_s10 = sadd.s32 1, %s6725_s15  ;;  %s34_s12 = ssub.s32 %s6729_s16, %s7018_s11 }
  0xbb   : > { %p44_p8 = scmp.ne.s32.totalorder %s6725_s15, %s6721_s14  ;;  %p35_p1 = scmp.eq.s32.totalorder %s34_s12, 0 }
  0xbc   : > { %p45_p3 = scmp.eq.s32.totalorder %s6729_s16, 0  ;;  %p50_p11 = scmp.ne.s32.totalorder %s6721_s14, %s6717_s13 }
  0xbd   : > { %p263_p12 = scmp.eq.s32.totalorder %s6833_s19, 1  ;;  %p9523_p0 = scmp.eq.s32.totalorder %s6833_s19, 0 }
  0xbe   : > { %s7030_s21 = scalar_select %p35_p1, %s6725_s15, %s37_s10  }
  0xbf   : > { %p46_p13 = por %p45_p3, %p44_p8  ;;  %p7034_p2 = por %p9523_p0, %p50_p11 }
  0xc0   : > { %p7038_p6 = por %p263_p12, %p44_p8  ;;  %p269_p5 = scmp.eq.s32.totalorder %s4951_s23, 1 }
  0xc1   : > { %p5788_p7 = scmp.lt.s32.totalorder %s6729_s16, 2  ;;  %s386_s25 = sand.u32 1, %s6725_s15  }
  0xc2   : > { %s9525_s29 = scalar_select %p7038_p6, 1, 0 }
  0xc3   : > { %p7044_p9 = por %p269_p5, %p50_p11  ;;  %s4961_s27 = sshll.u32 %s386_s25, 7 }
  0xc4   : > { %s5125_s6 = sshll.u32 %s6729_s16, 11  ;;  %s390_s10 = scalar_lea.vmem [#allocation6], %s4961_s27 }
  0xc5   : > { %s9526_s26 = scalar_select %p7044_p9, 1, 0 }
  0xc6   : > { %s7052_s22 = scalar_lea.hbm %s9412_s0, %s5125_s6  ;;  %s397_s12 = sshll.u32 %s390_s10, 4  ;;  %s7058_s12 = int_to_ptr.vmem [resolvable:$true] %s397_s12 }
  0xc7   : > { %p7054_p4 = pnand %p5788_p7, %p46_p13  ;;  %s7060_s1 = scalar_lea.sflag [#allocation7], %s386_s25 }
  0xc8   : > { %s6617_s2 = scalar_lea.hbm %s7052_s22, 2048  ;;  %s6622_s17 = scalar_lea.hbm %s9412_s0, 4096 }
  0xc9   : > { %p6618_p10 = scmp.ne.s32.totalorder %s7052_s22, %s6617_s2  ;;  %p6619_p8 = pneg %p7054_p4 }
  0xca   : > { %p6623_p11 = scmp.lt.u32.totalorder %s7052_s22, %s9412_s0  ;;  %p6624_p12 = scmp.lt.u32.totalorder %s6622_s17, %s6617_s2 }
  0xcb   : > { %p6620_p1 = pnand %p6619_p8, %p6618_p10  ;;  %p6626_p0 = scmp.lt.u32.totalorder %s6617_s2, %s7052_s22 }
  0xcc   : > { %p6625_p13 = por %p6624_p12, %p6623_p11 }
  0xcd   : > { %p6621_p3 = pneg %p6620_p1 }
  0xce   : > { %p6627_p5 = por %p6626_p0, %p6625_p13 }
  0xd0   : > { %p6628_p7 = pnand %p6627_p5, %p6621_p3 }
  0xd2   : > { %6631 = shalt.err (!%p6628_p7)
}
  0xd3   : > { %s6632_s25 = scalar_lea.vmem %s7058_s12, 2048  ;;  %s6746_s27 = smov [#allocation6]  }
  0xd4   : > { %p6633_p10 = scmp.ne.s32.totalorder %s7058_s12, %s6632_s25  ;;  %s6637_s6 = sshll.u32 %s6746_s27, 4  ;;  %s6638_s6 = int_to_ptr.vmem [resolvable:$false] %s6637_s6 }
  0xd5   : > { %s6639_s28 = scalar_lea.vmem %s6638_s6, 4096  ;;  %p6640_p6 = scmp.lt.s32.totalorder %s7058_s12, %s6638_s6 }
  0xd6   : > { %p6635_p1 = pnand %p6633_p10, %p6619_p8  ;;  %p6641_p11 = scmp.lt.s32.totalorder %s6639_s28, %s6632_s25 }
  0xd8   : > { %p6636_p9 = pneg %p6635_p1  ;;  %p6642_p12 = por %p6641_p11, %p6640_p6 }
  0xda   : > { %p6643_p13 = pnand %p6642_p12, %p6636_p9 }
  0xdc   : > { %6646 = shalt.err (!%p6643_p13)
}
  0xdd   : > { %5776 = dma.hbm_to_vmem [thread:$0]  (!%p7054_p4), %s7052_s22, 2048, %s7058_s12, %s7060_s1, %s9522_s30, %s9522_s30, %s9521_s24  }
  0xde   : > { %p9528_p8 = scmp.ne.s32.totalorder %s9516_s20, 0 }
  0xe0   : > { %409 = sbr.rel (%p9528_p8) target bundleno = 3988 (0xf94), region = 60 }
  0xe7   : > { %s7094_s2 = sand.u32 1, %s6721_s14  }
  0xe8   : > { %s4965_s17 = sshll.u32 %s7094_s2, 7  ;;  %s412_s10 = scalar_lea.sflag [#allocation7], %s7094_s2 }
  0xe9   : > { %s7100_s23 = scalar_lea.vmem [#allocation6], %s4965_s17 }
  0xea   : > { %6692 = dma.done.wait (%p7034_p2), %s412_s10, 2048  }
  0xeb   : > { %6694 = vsyncadd (%p7034_p2), %s412_s10, 4294965248  ;;  %p9529_p6 = scmp.eq.s32.totalorder %s6833_s19, 0 }
  0xed   : > { %6696 = dma.done.wait (%p9529_p6), [#allocation10], 4096   ;;  %p9530_p9 = pmov %p9529_p6 }
  0xee   : > { %p9531_p4 = pmov %p9529_p6 }
  0xef   : > { %6698 = vsyncadd (%p9530_p9), [#allocation10], 4294963200 }
  0xf0   : > { %6700 = dma.done.wait (%p9531_p4), [#allocation13], 6144   ;;  %p9532_p3 = pmov %p9531_p4 }
  0xf2   : > { %6702 = vsyncadd (%p9532_p3), [#allocation13], 4294961152  ;;  %p9533_p0 = pmov %p9532_p3 }
  0xf4   : > { %6704 = dma.done.wait (%p9533_p0), [#allocation16], 4096   ;;  %p9534_p5 = pmov %p9533_p0 }
  0xf5   : > { %p9535_p2 = pmov %p9533_p0 }
  0xf6   : > { %6706 = vsyncadd (%p9534_p5), [#allocation16], 4294963200 }
  0xf7   : > { %6708 = dma.done.wait (%p9535_p2), [#allocation19], 2048   ;;  %p9536_p7 = pmov %p9533_p0 }
  0xf8   : > { %v7123_v0 = vld [vmem:[%s7100_s23] sm:$0xff]  ;;  %v7126_v1 = vld [vmem:[%s7100_s23 + $0x10] sm:$0xff]  ;;  %v7133_v4 = vld [vmem:[%s7100_s23 + $0x8] sm:$0xff]  ;;  %v9431_v55 = vmov 0   ;;  %s6748_s24 = smov 112   ;;  %s6749_s30 = smov 16  }
  0xf9   : > { %6710 = vsyncadd (%p9536_p7), [#allocation19], 4294965248  ;;  %v499_v2 = vmul.f32 %v7123_v0, %v7123_v0  ;;  %v501_v3 = vmul.f32 %v7126_v1, %v7126_v1  ;;  %v7136_v5 = vld [vmem:[%s7100_s23 + $0x18] sm:$0xff]  ;;  %v500_v6 = vmul.f32 %v7133_v4, %v7133_v4  ;;  %v7143_v8 = vld [vmem:[%s7100_s23 + $0x28] sm:$0xff]  ;;  %834 = vmatprep.mubr.bf16.mxu0 %v9431_v55  ;;  %vm1463_vm0 = vcmask 261120   ;;  %s6750_s18 = smov 96  }
  0xfa   : > { %v502_v7 = vmul.f32 %v7136_v5, %v7136_v5  ;;  %v7146_v9 = vld [vmem:[%s7100_s23 + $0x20] sm:$0xff]  ;;  %v7149_v10 = vld [vmem:[%s7100_s23 + $0x38] sm:$0xff]  ;;  %v7152_v11 = vld [vmem:[%s7100_s23 + $0x30] sm:$0xff]  ;;  %v504_v14 = vmul.f32 %v7143_v8, %v7143_v8  ;;  %s6752_s22 = smov 64   ;;  %s6753_s12 = smov 32  }
  0xfb   : > { %515 = vadd.xlane.f32.xlu0 %v499_v2  ;;  %519 = vadd.xlane.f32.xlu1 %v501_v3  ;;  %v5853_v12 = vld [vmem:[#allocation9 + $0x4] ss:$12 sps:$4 sm:$0xff]   ;;  %v5855_v13 = vld [vmem:[#allocation9] ss:$12 sps:$4 sm:$0xff]   ;;  %v503_v15 = vmul.f32 %v7146_v9, %v7146_v9  ;;  %v5856_v16 = vld [vmem:[#allocation9 + $0x8] ss:$12 sps:$4 sm:$0xff]   ;;  %v506_v22 = vmul.f32 %v7149_v10, %v7149_v10  ;;  %v505_v23 = vmul.f32 %v7152_v11, %v7152_v11 }
  0xfc   : > { %802 = vmatprep.subr.bf16.mxu0 %v5853_v12  ;;  %v5857_v17 = vld [vmem:[#allocation9 + $0x1c] ss:$12 sps:$4 sm:$0xff]   ;;  %5351 = vmatprep.subr.bf16.mxu1 %v5856_v16  ;;  %v5859_v18 = vld [vmem:[#allocation9 + $0x18] ss:$12 sps:$4 sm:$0xff]   ;;  %v5860_v21 = vld [vmem:[#allocation9 + $0x20] ss:$12 sps:$4 sm:$0xff]  }
  0xfd   : > { %803 = vmatpush1.bf16.msra.mxu0 %v5855_v13  ;;  %v7159_v19 = vld [vmem:[%s7100_s23 + $0x48] sm:$0xff]  ;;  %v7162_v20 = vld [vmem:[%s7100_s23 + $0x40] sm:$0xff]  ;;  %5352 = vmatpush3.bf16.msra.mxu1 %v5856_v16  ;;  %v7169_v25 = vld [vmem:[%s7100_s23 + $0x58] sm:$0xff]  ;;  %s9726_s6 = sld [smem:[#allocation87_spill]]  ;;  %s9328_s28 = scalar_lea.vmem [#allocation20], %s4965_s17 }
  0xfe   : > { %804 = vmatprep.subr.bf16.mxu0 %v5857_v17  ;;  %v5861_v24 = vld [vmem:[#allocation9 + $0x34] ss:$12 sps:$4 sm:$0xff]   ;;  %5353 = vmatprep.subr.bf16.mxu1 %v5860_v21  ;;  %v508_v27 = vmul.f32 %v7159_v19, %v7159_v19  ;;  %v507_v28 = vmul.f32 %v7162_v20, %v7162_v20  ;;  %v5863_v29 = vld [vmem:[#allocation9 + $0x30] ss:$12 sps:$4 sm:$0xff]   ;;  %v5864_v30 = vld [vmem:[#allocation9 + $0x38] ss:$12 sps:$4 sm:$0xff]   ;;  %v510_v34 = vmul.f32 %v7169_v25, %v7169_v25 }
  0xff   : > { %517 = vadd.xlane.f32.xlu0 %v500_v6  ;;  %521 = vadd.xlane.f32.xlu1 %v502_v7  ;;  %v7172_v26 = vld [vmem:[%s7100_s23 + $0x50] sm:$0xff]  ;;  %v7179_v31 = vld [vmem:[%s7100_s23 + $0x68] sm:$0xff]  ;;  %v7182_v32 = vld [vmem:[%s7100_s23 + $0x60] sm:$0xff]  ;;  %s5126_s17 = sshll.u32 %s6833_s19, 11  ;;  %s4811_s10 = sshll.u32 %s9328_s28, 4  ;;  %s9365_s10 = int_to_ptr.vmem [resolvable:$true] %s4811_s10 }
 0x100   : > { %v5865_v33 = vld [vmem:[#allocation9 + $0x4c] ss:$12 sps:$4 sm:$0xff]   ;;  %v509_v35 = vmul.f32 %v7172_v26, %v7172_v26  ;;  %v5867_v36 = vld [vmem:[#allocation9 + $0x48] ss:$12 sps:$4 sm:$0xff]   ;;  %v5868_v37 = vld [vmem:[#allocation9 + $0x50] ss:$12 sps:$4 sm:$0xff]   ;;  %v512_v41 = vmul.f32 %v7179_v31, %v7179_v31  ;;  %v511_v42 = vmul.f32 %v7182_v32, %v7182_v32 }
 0x101   : > { %805 = vmatpush1.bf16.msra.mxu0 %v5859_v18  ;;  %5354 = vmatpush3.bf16.msra.mxu1 %v5860_v21  ;;  %v7189_v38 = vld [vmem:[%s7100_s23 + $0x78] sm:$0xff]  ;;  %v7192_v39 = vld [vmem:[%s7100_s23 + $0x70] sm:$0xff]  ;;  %v5871_v43 = vld [vmem:[#allocation9 + $0x60] ss:$12 sps:$4 sm:$0xff]   ;;  %s9727_s20 = sld [smem:[#allocation88_spill]]  ;;  %s4798_s19 = scalar_lea.sflag [#allocation8], %s7094_s2 }
 0x102   : > { %806 = vmatprep.subr.bf16.mxu0 %v5861_v24  ;;  %5355 = vmatprep.subr.bf16.mxu1 %v5864_v30  ;;  %v5869_v40 = vld [vmem:[#allocation9 + $0x64] ss:$12 sps:$4 sm:$0xff]   ;;  %v5872_v44 = vld [vmem:[#allocation9 + $0x68] ss:$12 sps:$4 sm:$0xff]   ;;  %v5876_v47 = vld [vmem:[#allocation9 + $0x80] ss:$12 sps:$4 sm:$0xff]   ;;  %v514_v48 = vmul.f32 %v7189_v38, %v7189_v38  ;;  %v513_v49 = vmul.f32 %v7192_v39, %v7192_v39 }
 0x103   : > { %525 = vadd.xlane.f32.xlu1 %v504_v14  ;;  %523 = vadd.xlane.f32.xlu0 %v503_v15  ;;  %v5873_v45 = vld [vmem:[#allocation9 + $0x7c] ss:$12 sps:$4 sm:$0xff]   ;;  %v5875_v46 = vld [vmem:[#allocation9 + $0x78] ss:$12 sps:$4 sm:$0xff]   ;;  %v5877_v50 = vld [vmem:[#allocation9 + $0x94] ss:$12 sps:$4 sm:$0xff]  }
 0x104   : > { %v5879_v51 = vld [vmem:[#allocation9 + $0x90] ss:$12 sps:$4 sm:$0xff]   ;;  %v5880_v52 = vld [vmem:[#allocation9 + $0x98] ss:$12 sps:$4 sm:$0xff]   ;;  %v5883_v54 = vld [vmem:[#allocation9 + $0xa8] ss:$12 sps:$4 sm:$0xff]  }
 0x105   : > { %807 = vmatpush1.bf16.msra.mxu0 %v5863_v29  ;;  %5356 = vmatpush3.bf16.msra.mxu1 %v5864_v30  ;;  %v5881_v53 = vld [vmem:[#allocation9 + $0xac] ss:$12 sps:$4 sm:$0xff]   ;;  %v5884_v56 = vld [vmem:[#allocation9 + $0xb0] ss:$12 sps:$4 sm:$0xff]   ;;  %p9729_p1 = scmp.ne.s32.totalorder %s9525_s29, 0 }
 0x106   : > { %808 = vmatprep.subr.bf16.mxu0 %v5865_v33  ;;  %5357 = vmatprep.subr.bf16.mxu1 %v5868_v37 }
 0x107   : > { %529 = vadd.xlane.f32.xlu1 %v506_v22  ;;  %527 = vadd.xlane.f32.xlu0 %v505_v23  ;;  %v7206_v23 = vld [vmem:[%s9417_s5] ss:$0 sm:$0xff] }
 0x109   : > { %809 = vmatpush1.bf16.msra.mxu0 %v5867_v36  ;;  %5358 = vmatpush3.bf16.msra.mxu1 %v5868_v37 }
 0x10a   : > { %810 = vmatprep.subr.bf16.mxu0 %v5869_v40  ;;  %5359 = vmatprep.subr.bf16.mxu1 %v5872_v44 }
 0x10b   : > { %533 = vadd.xlane.f32.xlu1 %v508_v27  ;;  %531 = vadd.xlane.f32.xlu0 %v507_v28  ;;  %v572_v28 = vmul.f32 %v7206_v23, %v7126_v1 }
 0x10d   : > { %811 = vmatpush1.bf16.msra.mxu0 %v5871_v43  ;;  %5360 = vmatpush3.bf16.msra.mxu1 %v5872_v44 }
 0x10e   : > { %812 = vmatprep.subr.bf16.mxu0 %v5873_v45  ;;  %5361 = vmatprep.subr.bf16.mxu1 %v5876_v47 }
 0x10f   : > { %537 = vadd.xlane.f32.xlu1 %v510_v34  ;;  %535 = vadd.xlane.f32.xlu0 %v509_v35  ;;  %v570_v34 = vmul.f32 %v7206_v23, %v7123_v0  ;;  %v571_v35 = vmul.f32 %v7206_v23, %v7133_v4  ;;  %v575_v0 = vmul.f32 %v7206_v23, %v7143_v8 }
 0x110   : > { %v574_v4 = vmul.f32 %v7206_v23, %v7146_v9  ;;  %v577_v8 = vmul.f32 %v7206_v23, %v7149_v10  ;;  %v576_v9 = vmul.f32 %v7206_v23, %v7152_v11  ;;  %v579_v11 = vmul.f32 %v7206_v23, %v7159_v19 }
 0x111   : > { %813 = vmatpush1.bf16.msra.mxu0 %v5875_v46  ;;  %5362 = vmatpush3.bf16.msra.mxu1 %v5876_v47  ;;  %v581_v19 = vmul.f32 %v7206_v23, %v7169_v25  ;;  %v582_v25 = vmul.f32 %v7206_v23, %v7182_v32 }
 0x112   : > { %814 = vmatprep.subr.bf16.mxu0 %v5877_v50  ;;  %5363 = vmatprep.subr.bf16.mxu1 %v5880_v52 }
 0x113   : > { %541 = vadd.xlane.f32.xlu1 %v512_v41  ;;  %539 = vadd.xlane.f32.xlu0 %v511_v42  ;;  %v573_v41 = vmul.f32 %v7206_v23, %v7136_v5 }
 0x115   : > { %815 = vmatpush1.bf16.msra.mxu0 %v5879_v51  ;;  %5364 = vmatpush3.bf16.msra.mxu1 %v5880_v52 }
 0x116   : > { %816 = vmatprep.subr.bf16.mxu0 %v5881_v53  ;;  %5365 = vmatprep.subr.bf16.mxu1 %v5884_v56 }
 0x117   : > { %545 = vadd.xlane.f32.xlu1 %v514_v48  ;;  %543 = vadd.xlane.f32.xlu0 %v513_v49 }
 0x119   : > { %817 = vmatpush1.bf16.msra.mxu0 %v5883_v54  ;;  %5366 = vmatpush3.bf16.msra.mxu1 %v5884_v56 }
 0x188   : > { %v516_v57 = vpop.xlane.xlu0 %515  ;;  %v520_v58 = vpop.xlane.xlu1 %519 }
 0x189   : > { %v548_v59 = vmul.f32 0.0078125, %v516_v57  ;;  %v550_v60 = vmul.f32 0.0078125, %v520_v58 }
 0x18b   : > { %v586_v61 = vadd.f32 1e-05, %v548_v59  ;;  %v588_v62 = vadd.f32 1e-05, %v550_v60 }
 0x18c   : > { %v518_v63 = vpop.xlane.xlu0 %517  ;;  %v522_v2 = vpop.xlane.xlu1 %521 }
 0x18d   : > { %v549_v3 = vmul.f32 0.0078125, %v518_v63  ;;  %v551_v6 = vmul.f32 0.0078125, %v522_v2  ;;  %5957 = vrsqrt.f32 %v588_v62 }
 0x18e   : > { %5959 = vrsqrt.f32 %v586_v61 }
 0x18f   : > { %v587_v7 = vadd.f32 1e-05, %v549_v3  ;;  %v589_v12 = vadd.f32 1e-05, %v551_v6 }
 0x190   : > { %v526_v13 = vpop.xlane.xlu1 %525  ;;  %v524_v14 = vpop.xlane.xlu0 %523 }
 0x191   : > { %5961 = vrsqrt.f32 %v587_v7  ;;  %v553_v15 = vmul.f32 0.0078125, %v526_v13  ;;  %v552_v16 = vmul.f32 0.0078125, %v524_v14 }
 0x192   : > { %5963 = vrsqrt.f32 %v589_v12 }
 0x193   : > { %v591_v17 = vadd.f32 1e-05, %v553_v15  ;;  %v590_v18 = vadd.f32 1e-05, %v552_v16  ;;  %v578_v15 = vmul.f32 %v7206_v23, %v7162_v20  ;;  %v580_v20 = vmul.f32 %v7206_v23, %v7172_v26 }
 0x194   : > { %v530_v21 = vpop.xlane.xlu1 %529  ;;  %v528_v22 = vpop.xlane.xlu0 %527 }
 0x195   : > { %5965 = vrsqrt.f32 %v591_v17  ;;  %v555_v24 = vmul.f32 0.0078125, %v530_v21  ;;  %v554_v27 = vmul.f32 0.0078125, %v528_v22 }
 0x196   : > { %5967 = vrsqrt.f32 %v590_v18 }
 0x197   : > { %v593_v29 = vadd.f32 1e-05, %v555_v24  ;;  %v592_v30 = vadd.f32 1e-05, %v554_v27  ;;  %v5958_v33 = vpop.eup %5957 }
 0x198   : > { %v534_v36 = vpop.xlane.xlu1 %533  ;;  %v532_v37 = vpop.xlane.xlu0 %531  ;;  %v620_v44 = vmul.f32 %v5958_v33, %v572_v28 }
 0x199   : > { %v5960_v40 = vpop.eup %5959  ;;  %5969 = vrsqrt.f32 %v593_v29  ;;  %v557_v42 = vmul.f32 0.0078125, %v534_v36  ;;  %v556_v43 = vmul.f32 0.0078125, %v532_v37 }
 0x19a   : > { %5971 = vrsqrt.f32 %v592_v30  ;;  %v618_v48 = vmul.f32 %v5960_v40, %v570_v34 }
 0x19b   : > { %v5962_v1 = vpop.eup %5961  ;;  %v595_v45 = vadd.f32 1e-05, %v557_v42  ;;  %v594_v46 = vadd.f32 1e-05, %v556_v43 }
 0x19c   : > { %v5964_v47 = vpop.eup %5963  ;;  %v619_v49 = vmul.f32 %v5962_v1, %v571_v35  ;;  %v538_v50 = vpop.xlane.xlu1 %537 }
 0x19d   : > { %v536_v51 = vpop.xlane.xlu0 %535  ;;  %v621_v5 = vmul.f32 %v5964_v47, %v573_v41  ;;  %5973 = vrsqrt.f32 %v595_v45  ;;  %v559_v52 = vmul.f32 0.0078125, %v538_v50  ;;  %v583_v41 = vmul.f32 %v7206_v23, %v7179_v31 }
 0x19e   : > { %v558_v53 = vmul.f32 0.0078125, %v536_v51  ;;  %v634_v54 = vpack.c.bf16 %v619_v49, %v618_v48  ;;  %5975 = vrsqrt.f32 %v594_v46  ;;  %v585_v45 = vmul.f32 %v7206_v23, %v7189_v38  ;;  %v7247_v38 = vld [vmem:[#allocation15] sm:$0xff] }
 0x19f   : > { %v5966_v56 = vpop.eup %5965  ;;  %v635_v57 = vpack.c.bf16 %v621_v5, %v620_v44  ;;  %v597_v58 = vadd.f32 1e-05, %v559_v52  ;;  %v584_v47 = vmul.f32 %v7206_v23, %v7192_v39  ;;  %v7251_v23 = vld [vmem:[#allocation15 + $0x8] sm:$0xff] }
 0x1a0   : > { %v596_v59 = vadd.f32 1e-05, %v558_v53  ;;  %v5968_v60 = vpop.eup %5967  ;;  %835 = vmatmul.mubr.bf16.vlgmr.msra.gmra.mrb[0].mxu0 %v634_v54  ;;  %5367 = vmatprep.mubr.bf16.mxu1 %v634_v54  ;;  %v623_v61 = vmul.f32 %v5966_v56, %v575_v0  ;;  %v542_v62 = vpop.xlane.xlu1 %541 }
 0x1a1   : > { %v540_v63 = vpop.xlane.xlu0 %539  ;;  %5368 = vmatmul.mubr.bf16.vlgmr.msra.gmra.mrb[0].mxu1 %v635_v57  ;;  %844 = vmatprep.mubr.bf16.mxu0 %v9431_v55  ;;  %v622_v2 = vmul.f32 %v5968_v60, %v574_v4  ;;  %5977 = vrsqrt.f32 %v597_v58  ;;  %v561_v3 = vmul.f32 0.0078125, %v542_v62 }
 0x1a2   : > { %v560_v6 = vmul.f32 0.0078125, %v540_v63  ;;  %5979 = vrsqrt.f32 %v596_v59 }
 0x1a3   : > { %v5970_v7 = vpop.eup %5969  ;;  %v636_v12 = vpack.c.bf16 %v623_v61, %v622_v2  ;;  %v599_v13 = vadd.f32 1e-05, %v561_v3 }
 0x1a4   : > { %v598_v10 = vadd.f32 1e-05, %v560_v6  ;;  %v5972_v14 = vpop.eup %5971  ;;  %v625_v16 = vmul.f32 %v5970_v7, %v577_v8  ;;  %v546_v17 = vpop.xlane.xlu1 %545 }
 0x1a5   : > { %v544_v18 = vpop.xlane.xlu0 %543  ;;  %5371 = vmatprep.mubr.bf16.mxu1 %v636_v12  ;;  %v624_v21 = vmul.f32 %v5972_v14, %v576_v9  ;;  %5981 = vrsqrt.f32 %v599_v13  ;;  %v563_v22 = vmul.f32 0.0078125, %v546_v17 }
 0x1a6   : > { %v562_v24 = vmul.f32 0.0078125, %v544_v18  ;;  %5983 = vrsqrt.f32 %v598_v10 }
 0x1a7   : > { %v5974_v27 = vpop.eup %5973  ;;  %v637_v28 = vpack.c.bf16 %v625_v16, %v624_v21  ;;  %v601_v29 = vadd.f32 1e-05, %v563_v22 }
 0x1a8   : > { %v600_v30 = vadd.f32 1e-05, %v562_v24  ;;  %v5976_v33 = vpop.eup %5975  ;;  %845 = vmatmul.mubr.bf16.gmra.mrb[4].mxu0 %v635_v57  ;;  %v627_v34 = vmul.f32 %v5974_v27, %v579_v11 }
 0x1a9   : > { %854 = vmatprep.mubr.bf16.mxu0 %v9431_v55  ;;  %5372 = vmatmul.mubr.bf16.gmra.mrb[4].mxu1 %v637_v28  ;;  %v626_v35 = vmul.f32 %v5976_v33, %v578_v15  ;;  %5985 = vrsqrt.f32 %v601_v29 }
 0x1aa   : > { %5987 = vrsqrt.f32 %v600_v30 }
 0x1ab   : > { %v5978_v36 = vpop.eup %5977  ;;  %v638_v37 = vpack.c.bf16 %v627_v34, %v626_v35 }
 0x1ac   : > { %v5980_v40 = vpop.eup %5979  ;;  %v629_v42 = vmul.f32 %v5978_v36, %v581_v19 }
 0x1ad   : > { %5375 = vmatprep.mubr.bf16.mxu1 %v638_v37  ;;  %v628_v43 = vmul.f32 %v5980_v40, %v580_v20 }
 0x1af   : > { %v5982_v1 = vpop.eup %5981  ;;  %v639_v26 = vpack.c.bf16 %v629_v42, %v628_v43 }
 0x1b0   : > { %v5984_v44 = vpop.eup %5983  ;;  %855 = vmatmul.mubr.bf16.gmra.mrb[8].mxu0 %v636_v12  ;;  %v631_v46 = vmul.f32 %v5982_v1, %v583_v41 }
 0x1b1   : > { %864 = vmatprep.mubr.bf16.mxu0 %v9431_v55  ;;  %5376 = vmatmul.mubr.bf16.gmra.mrb[8].mxu1 %v639_v26  ;;  %v630_v31 = vmul.f32 %v5984_v44, %v582_v25 }
 0x1b3   : > { %v5986_v0 = vpop.eup %5985  ;;  %v640_v4 = vpack.c.bf16 %v631_v46, %v630_v31 }
 0x1b4   : > { %v5988_v32 = vpop.eup %5987  ;;  %v633_v48 = vmul.f32 %v5986_v0, %v585_v45 }
 0x1b5   : > { %5379 = vmatprep.mubr.bf16.mxu1 %v640_v4  ;;  %v632_v49 = vmul.f32 %v5988_v32, %v584_v47 }
 0x1b7   : > { %v641_v50 = vpack.c.bf16 %v633_v48, %v632_v49  ;;  %v1028_v48 = vld [vmem:[#allocation17] sm:$0xff] }
 0x1b8   : > { %865 = vmatmul.mubr.bf16.gmra.mrb[12].mxu0 %v637_v28 }
 0x1b9   : > { %874 = vmatprep.mubr.bf16.mxu0 %v9431_v55  ;;  %5380 = vmatmul.mubr.bf16.gmra.mrb[12].mxu1 %v641_v50 }
 0x1c0   : > { %875 = vmatmul.mubr.bf16.gmra.mrb[16].mxu0 %v638_v37 }
 0x1c1   : > { %884 = vmatprep.mubr.bf16.mxu0 %v9431_v55 }
 0x1c8   : > { %885 = vmatmul.mubr.bf16.gmra.mrb[20].mxu0 %v639_v26 }
 0x1c9   : > { %894 = vmatprep.mubr.bf16.mxu0 %v9431_v55 }
 0x1d0   : > { %895 = vmatmul.mubr.bf16.gmra.mrb[24].mxu0 %v640_v4 }
 0x1d1   : > { %904 = vmatprep.mubr.bf16.mxu0 %v9431_v55  ;;  %v7531_v55 = vld [vmem:[#allocation17 + $0x20] sm:$0xff] }
 0x1d8   : > { %905 = vmatmul.mubr.bf16.gmra.mrb[28].mxu0 %v641_v50 }
 0x273   : > { %v7249_v39 = vpop.f32.mrb[0].mxu0 }
 0x274   : > { %v7255_v51 = vmul.f32 %v7247_v38, %v7249_v39  ;;  %1076 = vrot.lane.b32.xlu0 %v7249_v39, %s6748_s24  ;;  %v7259_v5 = vpop.f32.mrb[1].mxu0  ;;  %v5369_v52 = vpop.f32.mrb[0].mxu1 }
 0x275   : > { %1300 = vrot.lane.b32.xlu1 %v7259_v5, %s6749_s30  ;;  %v7263_v53 = vpop.f32.mrb[2].mxu0  ;;  %v949_v54 = vpop.f32.mrb[1].mxu1 }
 0x276   : > { %v7267_v56 = vmul.f32 %v7251_v23, %v7263_v53  ;;  %v7269_v57 = vpop.f32.mrb[3].mxu0  ;;  %v5370_v58 = vpop.f32.mrb[2].mxu1 }
 0x277   : > { %v7271_v59 = vpack.c.bf16 %v5370_v58, %v5369_v52  ;;  %v952_v60 = vpop.f32.mrb[3].mxu1 }
 0x278   : > { %1236 = vrot.lane.b32.xlu0 %v7259_v5, %s6748_s24  ;;  %v7275_v8 = vpack.c.bf16 %v952_v60, %v949_v54 }
 0x279   : > { %9537 = vst [vmem:[#allocation27_spill] sm:$0xff] %v7271_v59  ;;  %1078 = vrot.lane.b32.xlu1 %v7263_v53, %s6748_s24 }
 0x27a   : > { %9538 = vst [vmem:[#allocation28_spill] sm:$0xff] %v7275_v8  ;;  %5415 = vmatprep.subr.bf16.mxu1 %v7275_v8 }
 0x27b   : > { %v7280_v9 = vpop.f32.mrb[4].mxu0  ;;  %5416 = vmatpush3.bf16.msra.mxu1 %v7275_v8 }
 0x27c   : > { %1080 = vrot.lane.b32.xlu0 %v7280_v9, %s6748_s24  ;;  %v7285_v61 = vpop.f32.mrb[5].mxu0  ;;  %5417 = vmatprep.subr.bf16.mxu1 %v7271_v59  ;;  %v5373_v62 = vpop.f32.mrb[4].mxu1 }
 0x27d   : > { %1238 = vrot.lane.b32.xlu1 %v7269_v57, %s6748_s24  ;;  %v7290_v63 = vpop.f32.mrb[6].mxu0  ;;  %v965_v2 = vpop.f32.mrb[5].mxu1 }
 0x27e   : > { %v7292_v3 = vpop.f32.mrb[7].mxu0  ;;  %v5374_v6 = vpop.f32.mrb[6].mxu1 }
 0x27f   : > { %5418 = vmatpush3.bf16.msra.mxu1 %v7271_v59  ;;  %v7295_v7 = vpack.c.bf16 %v5374_v6, %v5373_v62  ;;  %v968_v12 = vpop.f32.mrb[7].mxu1  ;;  %v7567_v59 = vld [vmem:[#allocation18 + $0x30] sm:$0xff] }
 0x280   : > { %1240 = vrot.lane.b32.xlu0 %v7285_v61, %s6748_s24  ;;  %v7299_v13 = vpack.c.bf16 %v968_v12, %v965_v2  ;;  %v1220_v12 = vmul.f32 %v7247_v38, %v7259_v5 }
 0x281   : > { %9539 = vst [vmem:[#allocation29_spill] sm:$0xff] %v7295_v7  ;;  %1302 = vrot.lane.b32.xlu1 %v7269_v57, %s6749_s30 }
 0x282   : > { %9540 = vst [vmem:[#allocation30_spill] sm:$0xff] %v7299_v13  ;;  %5419 = vmatprep.subr.bf16.mxu1 %v7299_v13 }
 0x283   : > { %v7304_v10 = vpop.f32.mrb[8].mxu0  ;;  %5420 = vmatpush3.bf16.msra.mxu1 %v7299_v13  ;;  %v7565_v13 = vld [vmem:[#allocation15 + $0x38] sm:$0xff] }
 0x284   : > { %1304 = vrot.lane.b32.xlu0 %v7285_v61, %s6749_s30  ;;  %v7309_v14 = vpop.f32.mrb[9].mxu0  ;;  %5421 = vmatprep.subr.bf16.mxu1 %v7295_v7  ;;  %v5377_v11 = vpop.f32.mrb[8].mxu1 }
 0x285   : > { %1082 = vrot.lane.b32.xlu1 %v7290_v63, %s6748_s24  ;;  %v7314_v15 = vpop.f32.mrb[10].mxu0  ;;  %v981_v16 = vpop.f32.mrb[9].mxu1 }
 0x286   : > { %v7316_v17 = vpop.f32.mrb[11].mxu0  ;;  %v5378_v18 = vpop.f32.mrb[10].mxu1 }
 0x287   : > { %5422 = vmatpush3.bf16.msra.mxu1 %v7295_v7  ;;  %v7319_v21 = vpack.c.bf16 %v5378_v18, %v5377_v11  ;;  %v984_v22 = vpop.f32.mrb[11].mxu1  ;;  %v7493_v18 = vld [vmem:[#allocation18 + $0x8] sm:$0xff]  ;;  %v7563_v7 = vld [vmem:[#allocation15 + $0x30] sm:$0xff] }
 0x288   : > { %1244 = vrot.lane.b32.xlu0 %v7309_v14, %s6748_s24  ;;  %v7323_v24 = vpack.c.bf16 %v984_v22, %v981_v16  ;;  %v7489_v16 = vld [vmem:[#allocation18] sm:$0xff]  ;;  %v1221_v22 = vmul.f32 %v7251_v23, %v7269_v57  ;;  %v7505_v23 = vld [vmem:[#allocation15 + $0x10] sm:$0xff]  ;;  %v7507_v57 = vld [vmem:[#allocation15 + $0x18] sm:$0xff] }
 0x289   : > { %9541 = vst [vmem:[#allocation31_spill] sm:$0xff] %v7319_v21  ;;  %1242 = vrot.lane.b32.xlu1 %v7292_v3, %s6748_s24 }
 0x28a   : > { %9542 = vst [vmem:[#allocation32_spill] sm:$0xff] %v7323_v24  ;;  %5423 = vmatprep.subr.bf16.mxu1 %v7323_v24 }
 0x28b   : > { %v7328_v27 = vpop.f32.mrb[12].mxu0  ;;  %5424 = vmatpush3.bf16.msra.mxu1 %v7323_v24 }
 0x28c   : > { %1308 = vrot.lane.b32.xlu0 %v7309_v14, %s6749_s30  ;;  %v7333_v28 = vpop.f32.mrb[13].mxu0  ;;  %5425 = vmatprep.subr.bf16.mxu1 %v7319_v21  ;;  %v5381_v29 = vpop.f32.mrb[12].mxu1 }
 0x28d   : > { %1306 = vrot.lane.b32.xlu1 %v7292_v3, %s6749_s30  ;;  %v7338_v30 = vpop.f32.mrb[14].mxu0  ;;  %v997_v33 = vpop.f32.mrb[13].mxu1 }
 0x28e   : > { %v7340_v19 = vpop.f32.mrb[15].mxu0  ;;  %v5382_v34 = vpop.f32.mrb[14].mxu1 }
 0x28f   : > { %5426 = vmatpush3.bf16.msra.mxu1 %v7319_v21  ;;  %v7343_v20 = vpack.c.bf16 %v5382_v34, %v5381_v29  ;;  %v1000_v35 = vpop.f32.mrb[15].mxu1 }
 0x290   : > { %1248 = vrot.lane.b32.xlu0 %v7333_v28, %s6748_s24  ;;  %v7347_v36 = vpack.c.bf16 %v1000_v35, %v997_v33 }
 0x291   : > { %9543 = vst [vmem:[#allocation33_spill] sm:$0xff] %v7343_v20  ;;  %1246 = vrot.lane.b32.xlu1 %v7316_v17, %s6748_s24 }
 0x292   : > { %9544 = vst [vmem:[#allocation34_spill] sm:$0xff] %v7347_v36  ;;  %5427 = vmatprep.subr.bf16.mxu1 %v7347_v36 }
 0x293   : > { %v7352_v37 = vpop.f32.mrb[16].mxu0  ;;  %5428 = vmatpush3.bf16.msra.mxu1 %v7347_v36 }
 0x294   : > { %1312 = vrot.lane.b32.xlu0 %v7333_v28, %s6749_s30  ;;  %v7357_v40 = vpop.f32.mrb[17].mxu0  ;;  %5429 = vmatprep.subr.bf16.mxu1 %v7343_v20 }
 0x295   : > { %1310 = vrot.lane.b32.xlu1 %v7316_v17, %s6749_s30  ;;  %v7362_v41 = vpop.f32.mrb[18].mxu0 }
 0x296   : > { %v7364_v42 = vpop.f32.mrb[19].mxu0 }
 0x297   : > { %5430 = vmatpush3.bf16.msra.mxu1 %v7343_v20 }
 0x298   : > { %1252 = vrot.lane.b32.xlu0 %v7357_v40, %s6748_s24 }
 0x299   : > { %1250 = vrot.lane.b32.xlu1 %v7340_v19, %s6748_s24 }
 0x29b   : > { %v7371_v25 = vpop.f32.mrb[20].mxu0 }
 0x29c   : > { %9545 = vst [vmem:[#allocation35_spill] sm:$0xff] %v7371_v25  ;;  %1316 = vrot.lane.b32.xlu0 %v7357_v40, %s6749_s30  ;;  %v7375_v43 = vpop.f32.mrb[21].mxu0 }
 0x29d   : > { %1314 = vrot.lane.b32.xlu1 %v7340_v19, %s6749_s30  ;;  %v7379_v1 = vpop.f32.mrb[22].mxu0 }
 0x29e   : > { %9546 = vst [vmem:[#allocation36_spill] sm:$0xff] %v7379_v1  ;;  %v7381_v26 = vpop.f32.mrb[23].mxu0 }
 0x2a0   : > { %1256 = vrot.lane.b32.xlu0 %v7375_v43, %s6748_s24 }
 0x2a1   : > { %1254 = vrot.lane.b32.xlu1 %v7364_v42, %s6748_s24 }
 0x2a3   : > { %v7387_v44 = vpop.f32.mrb[24].mxu0 }
 0x2a4   : > { %9547 = vst [vmem:[#allocation37_spill] sm:$0xff] %v7387_v44  ;;  %1320 = vrot.lane.b32.xlu0 %v7375_v43, %s6749_s30  ;;  %v7391_v45 = vpop.f32.mrb[25].mxu0 }
 0x2a5   : > { %1318 = vrot.lane.b32.xlu1 %v7364_v42, %s6749_s30  ;;  %v7395_v46 = vpop.f32.mrb[26].mxu0 }
 0x2a6   : > { %9548 = vst [vmem:[#allocation38_spill] sm:$0xff] %v7395_v46  ;;  %v7397_v47 = vpop.f32.mrb[27].mxu0 }
 0x2a8   : > { %1260 = vrot.lane.b32.xlu0 %v7391_v45, %s6748_s24 }
 0x2a9   : > { %1258 = vrot.lane.b32.xlu1 %v7381_v26, %s6748_s24 }
 0x2ab   : > { %v7403_v31 = vpop.f32.mrb[28].mxu0 }
 0x2ac   : > { %9549 = vst [vmem:[#allocation39_spill] sm:$0xff] %v7403_v31  ;;  %1324 = vrot.lane.b32.xlu0 %v7391_v45, %s6749_s30  ;;  %v7407_v0 = vpop.f32.mrb[29].mxu0 }
 0x2ad   : > { %1322 = vrot.lane.b32.xlu1 %v7381_v26, %s6749_s30  ;;  %v7411_v4 = vpop.f32.mrb[30].mxu0 }
 0x2ae   : > { %9550 = vst [vmem:[#allocation40_spill] sm:$0xff] %v7411_v4  ;;  %v7413_v32 = vpop.f32.mrb[31].mxu0 }
 0x2b0   : > { %1264 = vrot.lane.b32.xlu0 %v7407_v0, %s6748_s24 }
 0x2b1   : > { %1262 = vrot.lane.b32.xlu1 %v7397_v47, %s6748_s24 }
 0x2b4   : > { %1328 = vrot.lane.b32.xlu0 %v7407_v0, %s6749_s30 }
 0x2b5   : > { %1326 = vrot.lane.b32.xlu1 %v7397_v47, %s6749_s30 }
 0x2b8   : > { %1140 = vrot.lane.b32.xlu0 %v7249_v39, %s6749_s30 }
 0x2b9   : > { %1266 = vrot.lane.b32.xlu1 %v7413_v32, %s6748_s24 }
 0x2bc   : > { %1144 = vrot.lane.b32.xlu0 %v7280_v9, %s6749_s30 }
 0x2bd   : > { %1330 = vrot.lane.b32.xlu1 %v7413_v32, %s6749_s30 }
 0x2c0   : > { %1084 = vrot.lane.b32.xlu0 %v7304_v10, %s6748_s24 }
 0x2c1   : > { %1142 = vrot.lane.b32.xlu1 %v7263_v53, %s6749_s30  ;;  %v1029_v53 = vld [vmem:[#allocation17 + $0x8] sm:$0xff] }
 0x2c4   : > { %1088 = vrot.lane.b32.xlu0 %v7328_v27, %s6748_s24 }
 0x2c5   : > { %1146 = vrot.lane.b32.xlu1 %v7290_v63, %s6749_s30 }
 0x2c8   : > { %1148 = vrot.lane.b32.xlu0 %v7304_v10, %s6749_s30 }
 0x2c9   : > { %1086 = vrot.lane.b32.xlu1 %v7314_v15, %s6748_s24 }
 0x2cc   : > { %1152 = vrot.lane.b32.xlu0 %v7328_v27, %s6749_s30 }
 0x2cd   : > { %1090 = vrot.lane.b32.xlu1 %v7338_v30, %s6748_s24 }
 0x2d0   : > { %1092 = vrot.lane.b32.xlu0 %v7352_v37, %s6748_s24 }
 0x2d1   : > { %1150 = vrot.lane.b32.xlu1 %v7314_v15, %s6749_s30 }
 0x2d4   : > { %1096 = vrot.lane.b32.xlu0 %v7371_v25, %s6748_s24 }
 0x2d5   : > { %1154 = vrot.lane.b32.xlu1 %v7338_v30, %s6749_s30 }
 0x2d8   : > { %1156 = vrot.lane.b32.xlu0 %v7352_v37, %s6749_s30 }
 0x2d9   : > { %1094 = vrot.lane.b32.xlu1 %v7362_v41, %s6748_s24 }
 0x2dc   : > { %1160 = vrot.lane.b32.xlu0 %v7371_v25, %s6749_s30  ;;  %v7619_v25 = vld [vmem:[#allocation15 + $0x58] sm:$0xff] }
 0x2dd   : > { %1098 = vrot.lane.b32.xlu1 %v7379_v1, %s6748_s24  ;;  %9558 = vst [vmem:[#allocation48_spill] sm:$0xff] %v7619_v25 }
 0x2e0   : > { %1100 = vrot.lane.b32.xlu0 %v7387_v44, %s6748_s24 }
 0x2e1   : > { %1158 = vrot.lane.b32.xlu1 %v7362_v41, %s6749_s30 }
 0x2e4   : > { %1104 = vrot.lane.b32.xlu0 %v7403_v31, %s6748_s24 }
 0x2e5   : > { %1162 = vrot.lane.b32.xlu1 %v7379_v1, %s6749_s30  ;;  %v7617_v1 = vld [vmem:[#allocation15 + $0x50] sm:$0xff] }
 0x2e6   : > { %v1077_v49 = vpop.permute.xlu0 %1076  ;;  %9557 = vst [vmem:[#allocation47_spill] sm:$0xff] %v7617_v1 }
 0x2e7   : > { %v1108_v50 = vmul.f32 %v1077_v49, %v1028_v48  ;;  %v1301_v39 = vpop.permute.xlu1 %1300 }
 0x2e8   : > { %1164 = vrot.lane.b32.xlu0 %v7387_v44, %s6749_s30  ;;  %v1332_v34 = vmul.f32 %v1301_v39, %v7489_v16 }
 0x2e9   : > { %v7474_v52 = vadd.f32 %v1108_v50, %v7255_v51  ;;  %1102 = vrot.lane.b32.xlu1 %v7395_v46, %s6748_s24 }
 0x2ea   : > { %v1237_v54 = vpop.permute.xlu0 %1236 }
 0x2eb   : > { %v1079_v58 = vpop.permute.xlu1 %1078  ;;  %v1268_v62 = vmul.f32 %v1237_v54, %v1028_v48 }
 0x2ec   : > { %v1109_v60 = vmul.f32 %v1079_v58, %v1029_v53  ;;  %1168 = vrot.lane.b32.xlu0 %v7403_v31, %s6749_s30  ;;  %v7515_v58 = vld [vmem:[#allocation17 + $0x10] sm:$0xff]  ;;  %v7593_v31 = vld [vmem:[#allocation15 + $0x48] sm:$0xff] }
 0x2ed   : > { %1106 = vrot.lane.b32.xlu1 %v7411_v4, %s6748_s24  ;;  %v1284_v29 = vadd.f32 %v1268_v62, %v1220_v12  ;;  %v7519_v62 = vld [vmem:[#allocation17 + $0x18] sm:$0xff]  ;;  %s9363_s24 = scalar_lea.hbm %s9727_s20, %s5126_s17 }
 0x2ee   : > { %v7483_v2 = vadd.f32 %v1109_v60, %v7267_v56  ;;  %v7485_v6 = vpop.permute.xlu0 %1080  ;;  %v7517_v60 = vld [vmem:[#allocation18 + $0x10] sm:$0xff] }
 0x2ef   : > { %v1239_v51 = vpop.permute.xlu1 %1238  ;;  %v1348_v38 = vadd.f32 %v1332_v34, %v1284_v29  ;;  %v1222_v29 = vmul.f32 %v7505_v23, %v7285_v61  ;;  %v7537_v61 = vld [vmem:[#allocation15 + $0x28] sm:$0xff] }
 0x2f0   : > { %v1269_v11 = vmul.f32 %v1239_v51, %v1029_v53 }
 0x2f1   : > { %1166 = vrot.lane.b32.xlu1 %v7395_v46, %s6749_s30  ;;  %v7595_v46 = vld [vmem:[#allocation18 + $0x40] sm:$0xff] }
 0x2f2   : > { %v1241_v56 = vpop.permute.xlu0 %1240  ;;  %v1285_v35 = vadd.f32 %v1269_v11, %v1221_v22  ;;  %v7523_v22 = vld [vmem:[#allocation18 + $0x18] sm:$0xff]  ;;  %9554 = vst [vmem:[#allocation44_spill] sm:$0xff] %v7595_v46 }
 0x2f3   : > { %v1303_v33 = vpop.permute.xlu1 %1302  ;;  %v1270_v12 = vmul.f32 %v1241_v56, %v7515_v58  ;;  %v7533_v56 = vld [vmem:[#allocation17 + $0x28] sm:$0xff] }
 0x2f4   : > { %v1333_v48 = vmul.f32 %v1303_v33, %v7493_v18  ;;  %v1223_v33 = vmul.f32 %v7507_v57, %v7292_v3  ;;  %v7539_v3 = vld [vmem:[#allocation18 + $0x20] sm:$0xff] }
 0x2f5   : > { %1170 = vrot.lane.b32.xlu1 %v7411_v4, %s6749_s30  ;;  %v7591_v4 = vld [vmem:[#allocation15 + $0x40] sm:$0xff]  ;;  %s6647_s30 = scalar_lea.vmem %s9365_s10, 2048 }
 0x2f6   : > { %v1349_v5 = vadd.f32 %v1333_v48, %v1285_v35  ;;  %v1305_v49 = vpop.permute.xlu0 %1304  ;;  %p6648_p10 = scmp.ne.s32.totalorder %s9365_s10, %s6647_s30 }
 0x2f7   : > { %v7501_v50 = vpop.permute.xlu1 %1082  ;;  %v1334_v34 = vmul.f32 %v1305_v49, %v7517_v60 }
 0x2f8   : > { %v7503_v53 = vpack.c.bf16 %v1349_v5, %v1348_v38  ;;  %v1286_v38 = vadd.f32 %v1270_v12, %v1222_v29  ;;  %v7545_v29 = vld [vmem:[#allocation18 + $0x28] sm:$0xff]  ;;  %p6649_p11 = pnand %p6648_p10, %p9729_p1 }
 0x2fa   : > { %9551 = vst [vmem:[#allocation41_spill] sm:$0xff] %v7503_v53  ;;  %1930 = vrot.lane.b32.xlu0 %v7503_v53, %s6750_s18  ;;  %5687 = vmatprep.subr.msk.bf16.mxu0 %vm1463_vm0, %v7503_v53  ;;  %v1245_v39 = vpop.permute.xlu0 %1244  ;;  %v1489_v54 = vsel %vm1463_vm0, %v7503_v53, 0  ;;  %v7535_v53 = vld [vmem:[#allocation15 + $0x20] sm:$0xff]  ;;  %p6650_p12 = pneg %p6649_p11 }
 0x2fb   : > { %v1243_v51 = vpop.permute.xlu1 %1242  ;;  %5384 = vmatpush3.bf16.xpose.msra.mxu0 %v1489_v54  ;;  %v1272_v24 = vmul.f32 %v1245_v39, %v7531_v55 }
 0x2fc   : > { %v1271_v11 = vmul.f32 %v1243_v51, %v7519_v62  ;;  %v1350_v51 = vadd.f32 %v1334_v34, %v1286_v38  ;;  %v1225_v34 = vmul.f32 %v7537_v61, %v7316_v17  ;;  %v7561_v17 = vld [vmem:[#allocation17 + $0x38] sm:$0xff] }
 0x2fe   : > { %v1309_v35 = vpop.permute.xlu0 %1308  ;;  %v1287_v5 = vadd.f32 %v1271_v11, %v1223_v33  ;;  %v1224_v33 = vmul.f32 %v7535_v53, %v7309_v14 }
 0x2ff   : > { %v1307_v48 = vpop.permute.xlu1 %1306 }
 0x300   : > { %v1335_v54 = vmul.f32 %v1307_v48, %v7523_v22  ;;  %v1336_v48 = vmul.f32 %v1309_v35, %v7539_v3 }
 0x302   : > { %v1351_v20 = vadd.f32 %v1335_v54, %v1287_v5  ;;  %v1249_v21 = vpop.permute.xlu0 %1248  ;;  %v1288_v5 = vadd.f32 %v1272_v24, %v1224_v33  ;;  %v7573_v33 = vld [vmem:[#allocation18 + $0x38] sm:$0xff] }
 0x303   : > { %v1247_v49 = vpop.permute.xlu1 %1246 }
 0x304   : > { %v7542_v12 = vpack.c.bf16 %v1351_v20, %v1350_v51  ;;  %v1273_v11 = vmul.f32 %v1247_v49, %v7533_v56  ;;  %v7559_v51 = vld [vmem:[#allocation17 + $0x30] sm:$0xff]  ;;  %v1352_v35 = vadd.f32 %v1336_v48, %v1288_v5  ;;  %v1227_v48 = vmul.f32 %v7565_v13, %v7340_v19  ;;  %v7589_v19 = vld [vmem:[#allocation17 + $0x48] sm:$0xff] }
 0x306   : > { %9552 = vst [vmem:[#allocation42_spill] sm:$0xff] %v7542_v12  ;;  %1932 = vrot.lane.b32.xlu1 %v7542_v12, %s6750_s18  ;;  %5688 = vmatprep.subr.msk.bf16.mxu0 %vm1463_vm0, %v7542_v12  ;;  %v1313_v20 = vpop.permute.xlu0 %1312  ;;  %v1492_v39 = vsel %vm1463_vm0, %v7542_v12, 0  ;;  %v1289_v54 = vadd.f32 %v1273_v11, %v1225_v34  ;;  %v1226_v34 = vmul.f32 %v7563_v7, %v7333_v28 }
 0x307   : > { %v1311_v38 = vpop.permute.xlu1 %1310  ;;  %5386 = vmatpush3.bf16.xpose.msra.mxu0 %v1492_v39  ;;  %v1274_v39 = vmul.f32 %v1249_v21, %v7559_v51 }
 0x308   : > { %v1337_v14 = vmul.f32 %v1311_v38, %v7545_v29  ;;  %v1338_v38 = vmul.f32 %v1313_v20, %v7567_v59 }
 0x30a   : > { %v1353_v49 = vadd.f32 %v1337_v14, %v1289_v54  ;;  %v1253_v36 = vpop.permute.xlu0 %1252  ;;  %v1290_v54 = vadd.f32 %v1274_v39, %v1226_v34  ;;  %v7601_v34 = vld [vmem:[#allocation18 + $0x48] sm:$0xff] }
 0x30b   : > { %v1251_v12 = vpop.permute.xlu1 %1250  ;;  %9556 = vst [vmem:[#allocation46_spill] sm:$0xff] %v7601_v34 }
 0x30c   : > { %v7570_v24 = vpack.c.bf16 %v1353_v49, %v1352_v35  ;;  %v1275_v11 = vmul.f32 %v1251_v12, %v7561_v17  ;;  %v7587_v35 = vld [vmem:[#allocation17 + $0x40] sm:$0xff]  ;;  %v1354_v20 = vadd.f32 %v1338_v38, %v1290_v54  ;;  %v1229_v38 = vmul.f32 %v7593_v31, %v7364_v42 }
 0x30e   : > { %9553 = vst [vmem:[#allocation43_spill] sm:$0xff] %v7570_v24  ;;  %1934 = vrot.lane.b32.xlu0 %v7570_v24, %s6750_s18  ;;  %5689 = vmatprep.subr.msk.bf16.mxu0 %vm1463_vm0, %v7570_v24  ;;  %v1317_v21 = vpop.permute.xlu0 %1316  ;;  %v1495_v12 = vsel %vm1463_vm0, %v7570_v24, 0  ;;  %v1291_v14 = vadd.f32 %v1275_v11, %v1227_v48  ;;  %v1228_v48 = vmul.f32 %v7591_v4, %v7357_v40  ;;  %v7615_v40 = vld [vmem:[#allocation17 + $0x58] sm:$0xff] }
 0x30f   : > { %v1315_v5 = vpop.permute.xlu1 %1314  ;;  %5388 = vmatpush3.bf16.xpose.msra.mxu0 %v1495_v12  ;;  %v1276_v12 = vmul.f32 %v1253_v36, %v7587_v35 }
 0x310   : > { %v1339_v28 = vmul.f32 %v1315_v5, %v7573_v33  ;;  %v1340_v5 = vmul.f32 %v1317_v21, %v7595_v46  ;;  %v7621_v46 = vld [vmem:[#allocation18 + $0x50] sm:$0xff] }
 0x311   : > { %9559 = vst [vmem:[#allocation49_spill] sm:$0xff] %v7621_v46 }
 0x312   : > { %v1355_v49 = vadd.f32 %v1339_v28, %v1291_v14  ;;  %v1257_v8 = vpop.permute.xlu0 %1256 }
 0x313   : > { %v1255_v24 = vpop.permute.xlu1 %1254 }
 0x314   : > { %v7598_v39 = vpack.c.bf16 %v1355_v49, %v1354_v20  ;;  %v1277_v11 = vmul.f32 %v1255_v24, %v7589_v19  ;;  %v1292_v24 = vadd.f32 %v1276_v12, %v1228_v48  ;;  %v7613_v49 = vld [vmem:[#allocation17 + $0x50] sm:$0xff]  ;;  %v7627_v48 = vld [vmem:[#allocation18 + $0x58] sm:$0xff] }
 0x316   : > { %9555 = vst [vmem:[#allocation45_spill] sm:$0xff] %v7598_v39  ;;  %5690 = vmatprep.subr.msk.bf16.mxu0 %vm1463_vm0, %v7598_v39  ;;  %v1321_v54 = vpop.permute.xlu0 %1320  ;;  %v1498_v36 = vsel %vm1463_vm0, %v7598_v39, 0  ;;  %v1293_v28 = vadd.f32 %v1277_v11, %v1229_v38  ;;  %v1356_v42 = vadd.f32 %v1340_v5, %v1292_v24  ;;  %v1230_v38 = vmul.f32 %v7617_v1, %v7375_v43  ;;  %v7641_v43 = vld [vmem:[#allocation17 + $0x68] sm:$0xff] }
 0x317   : > { %v1319_v14 = vpop.permute.xlu1 %1318  ;;  %5390 = vmatpush3.bf16.xpose.msra.mxu0 %v1498_v36  ;;  %v1278_v36 = vmul.f32 %v1257_v8, %v7613_v49  ;;  %v1231_v5 = vmul.f32 %v7619_v25, %v7381_v26  ;;  %9561 = vst [vmem:[#allocation51_spill] sm:$0xff] %v7641_v43  ;;  %v7645_v1 = vld [vmem:[#allocation15 + $0x68] sm:$0xff] }
 0x318   : > { %v1341_v20 = vmul.f32 %v1319_v14, %v7601_v34  ;;  %v1342_v14 = vmul.f32 %v1321_v54, %v7621_v46  ;;  %v7643_v46 = vld [vmem:[#allocation15 + $0x60] sm:$0xff]  ;;  %9563 = vst [vmem:[#allocation53_spill] sm:$0xff] %v7645_v1 }
 0x319   : > { %9562 = vst [vmem:[#allocation52_spill] sm:$0xff] %v7643_v46  ;;  %v7647_v34 = vld [vmem:[#allocation18 + $0x60] sm:$0xff] }
 0x31a   : > { %v1357_v44 = vadd.f32 %v1341_v20, %v1293_v28  ;;  %v1261_v21 = vpop.permute.xlu0 %1260  ;;  %9564 = vst [vmem:[#allocation54_spill] sm:$0xff] %v7647_v34 }
 0x31b   : > { %v1259_v39 = vpop.permute.xlu1 %1258 }
 0x31c   : > { %v7624_v12 = vpack.c.bf16 %v1357_v44, %v1356_v42  ;;  %v1279_v11 = vmul.f32 %v1259_v39, %v7615_v40  ;;  %v1294_v39 = vadd.f32 %v1278_v36, %v1230_v38  ;;  %v7639_v42 = vld [vmem:[#allocation17 + $0x60] sm:$0xff]  ;;  %v7653_v38 = vld [vmem:[#allocation18 + $0x68] sm:$0xff] }
 0x31e   : > { %9560 = vst [vmem:[#allocation50_spill] sm:$0xff] %v7624_v12  ;;  %5691 = vmatprep.subr.msk.bf16.mxu0 %vm1463_vm0, %v7624_v12  ;;  %v1325_v24 = vpop.permute.xlu0 %1324  ;;  %v1501_v8 = vsel %vm1463_vm0, %v7624_v12, 0  ;;  %v1295_v28 = vadd.f32 %v1279_v11, %v1231_v5  ;;  %v1358_v26 = vadd.f32 %v1342_v14, %v1294_v39  ;;  %v1232_v5 = vmul.f32 %v7643_v46, %v7391_v45  ;;  %v7667_v45 = vld [vmem:[#allocation17 + $0x78] sm:$0xff] }
 0x31f   : > { %v1323_v44 = vpop.permute.xlu1 %1322  ;;  %5392 = vmatpush3.bf16.xpose.msra.mxu0 %v1501_v8  ;;  %v1280_v8 = vmul.f32 %v1261_v21, %v7639_v42  ;;  %v1233_v14 = vmul.f32 %v7645_v1, %v7397_v47  ;;  %v7671_v46 = vld [vmem:[#allocation15 + $0x78] sm:$0xff] }
 0x320   : > { %v1343_v20 = vmul.f32 %v1323_v44, %v7627_v48  ;;  %v1344_v44 = vmul.f32 %v1325_v24, %v7647_v34  ;;  %v7669_v34 = vld [vmem:[#allocation15 + $0x70] sm:$0xff] }
 0x322   : > { %v1359_v25 = vadd.f32 %v1343_v20, %v1295_v28  ;;  %v1265_v54 = vpop.permute.xlu0 %1264 }
 0x323   : > { %v1263_v12 = vpop.permute.xlu1 %1262 }
 0x324   : > { %v7650_v36 = vpack.c.bf16 %v1359_v25, %v1358_v26  ;;  %v1281_v11 = vmul.f32 %v1263_v12, %v7641_v43  ;;  %v1296_v12 = vadd.f32 %v1280_v8, %v1232_v5  ;;  %v7665_v26 = vld [vmem:[#allocation17 + $0x70] sm:$0xff] }
 0x325   : > { %v7673_v43 = vld [vmem:[#allocation18 + $0x70] sm:$0xff]  ;;  %v1282_v8 = vmul.f32 %v1265_v54, %v7665_v26 }
 0x326   : > { %9565 = vst [vmem:[#allocation55_spill] sm:$0xff] %v7650_v36  ;;  %5692 = vmatprep.subr.msk.bf16.mxu0 %vm1463_vm0, %v7650_v36  ;;  %v1329_v39 = vpop.permute.xlu0 %1328  ;;  %v1504_v25 = vsel %vm1463_vm0, %v7650_v36, 0  ;;  %v1297_v28 = vadd.f32 %v1281_v11, %v1233_v14  ;;  %v1360_v47 = vadd.f32 %v1344_v44, %v1296_v12  ;;  %9566 = vst [vmem:[#allocation56_spill] sm:$0xff] %v7673_v43  ;;  %v7681_v44 = vld [vmem:[#allocation18 + $0x78] sm:$0xff] }
 0x327   : > { %v1327_v21 = vpop.permute.xlu1 %1326  ;;  %5394 = vmatpush3.bf16.xpose.msra.mxu0 %v1504_v25  ;;  %v1235_v12 = vmul.f32 %v7671_v46, %v7413_v32  ;;  %v1110_v32 = vmul.f32 %v7485_v6, %v7515_v58 }
 0x328   : > { %v1345_v20 = vmul.f32 %v1327_v21, %v7653_v38  ;;  %v1234_v21 = vmul.f32 %v7669_v34, %v7407_v0 }
 0x32a   : > { %v1361_v1 = vadd.f32 %v1345_v20, %v1297_v28  ;;  %v1141_v24 = vpop.permute.xlu0 %1140  ;;  %v1346_v28 = vmul.f32 %v1329_v39, %v7673_v43  ;;  %v1111_v39 = vmul.f32 %v7501_v50, %v7519_v62 }
 0x32b   : > { %v1172_v36 = vmul.f32 %v1141_v24, %v7489_v16  ;;  %v1267_v25 = vpop.permute.xlu1 %1266 }
 0x32c   : > { %v7677_v11 = vpack.c.bf16 %v1361_v1, %v1360_v47  ;;  %v1283_v5 = vmul.f32 %v1267_v25, %v7667_v45 }
 0x32d   : > { %v1188_v14 = vadd.f32 %v1172_v36, %v7474_v52  ;;  %v1298_v52 = vadd.f32 %v1282_v8, %v1234_v21  ;;  %v1062_v8 = vmul.f32 %v7505_v23, %v7280_v9 }
 0x32e   : > { %9567 = vst [vmem:[#allocation57_spill] sm:$0xff] %v7677_v11  ;;  %5693 = vmatprep.subr.msk.bf16.mxu0 %vm1463_vm0, %v7677_v11  ;;  %v1145_v16 = vpop.permute.xlu0 %1144  ;;  %v1507_v1 = vsel %vm1463_vm0, %v7677_v11, 0  ;;  %v1299_v36 = vadd.f32 %v1283_v5, %v1235_v12  ;;  %v1063_v5 = vmul.f32 %v7507_v57, %v7290_v63 }
 0x32f   : > { %v1331_v54 = vpop.permute.xlu1 %1330  ;;  %5396 = vmatpush3.bf16.xpose.msra.mxu0 %v1507_v1  ;;  %v1362_v47 = vadd.f32 %v1346_v28, %v1298_v52  ;;  %v1174_v21 = vmul.f32 %v1145_v16, %v7517_v60 }
 0x330   : > { %v1347_v20 = vmul.f32 %v1331_v54, %v7681_v44  ;;  %v1127_v62 = vadd.f32 %v1111_v39, %v1063_v5  ;;  %v1065_v54 = vmul.f32 %v7537_v61, %v7314_v15 }
 0x332   : > { %v1363_v0 = vadd.f32 %v1347_v20, %v1299_v36  ;;  %v1085_v24 = vpop.permute.xlu0 %1084 }
 0x333   : > { %v1143_v25 = vpop.permute.xlu1 %1142  ;;  %v1112_v16 = vmul.f32 %v1085_v24, %v7531_v55 }
 0x334   : > { %v7697_v43 = vpack.c.bf16 %v1363_v0, %v1362_v47  ;;  %v1173_v11 = vmul.f32 %v1143_v25, %v7493_v18  ;;  %v1126_v18 = vadd.f32 %v1110_v32, %v1062_v8 }
 0x336   : > { %v1189_v12 = vadd.f32 %v1173_v11, %v7483_v2  ;;  %5694 = vmatprep.subr.msk.bf16.mxu0 %vm1463_vm0, %v7697_v43  ;;  %v1089_v6 = vpop.permute.xlu0 %1088  ;;  %v1510_v50 = vsel %vm1463_vm0, %v7697_v43, 0  ;;  %v1190_v63 = vadd.f32 %v1174_v21, %v1126_v18 }
 0x337   : > { %v1147_v58 = vpop.permute.xlu1 %1146  ;;  %5398 = vmatpush3.bf16.xpose.msra.mxu0 %v1510_v50  ;;  %v1114_v0 = vmul.f32 %v1089_v6, %v7559_v51  ;;  %v1069_v6 = vmul.f32 %v7593_v31, %v7362_v41  ;;  %v9569_v50 = vld [vmem:[#allocation44_spill] sm:$0xff]  ;;  %v9575_v41 = vld [vmem:[#allocation49_spill] sm:$0xff] }
 0x338   : > { %v7710_v28 = vpack.c.bf16 %v1189_v12, %v1188_v14  ;;  %v1175_v9 = vmul.f32 %v1147_v58, %v7523_v22  ;;  %v1064_v22 = vmul.f32 %v7535_v53, %v7304_v10  ;;  %v1067_v10 = vmul.f32 %v7565_v13, %v7338_v30 }
 0x33a   : > { %v1191_v23 = vadd.f32 %v1175_v9, %v1127_v62  ;;  %5399 = vmatprep.mubr.msk.bf16.mxu0 %vm1463_vm0, %v7710_v28  ;;  %v1149_v2 = vpop.permute.xlu0 %1148  ;;  %v1128_v20 = vadd.f32 %v1112_v16, %v1064_v22 }
 0x33b   : > { %v1087_v57 = vpop.permute.xlu1 %1086  ;;  %v1176_v52 = vmul.f32 %v1149_v2, %v7539_v3 }
 0x33c   : > { %v7715_v60 = vpack.c.bf16 %v1191_v23, %v1190_v63  ;;  %v1113_v14 = vmul.f32 %v1087_v57, %v7533_v56  ;;  %v1066_v56 = vmul.f32 %v7563_v7, %v7328_v27 }
 0x33d   : > { %v1192_v53 = vadd.f32 %v1176_v52, %v1128_v20 }
 0x33e   : > { %5400 = vmatmul.mubr.msk.bf16.vlgmr.msra.gmra.mrb[32].mxu0 %vm1463_vm0, %v7715_v60  ;;  %v1153_v11 = vpop.permute.xlu0 %1152  ;;  %v1129_v25 = vadd.f32 %v1113_v14, %v1065_v54  ;;  %v1130_v39 = vadd.f32 %v1114_v0, %v1066_v56 }
 0x33f   : > { %v1091_v1 = vpop.permute.xlu1 %1090  ;;  %v1178_v15 = vmul.f32 %v1153_v11, %v7567_v59  ;;  %v9571_v11 = vld [vmem:[#allocation35_spill] sm:$0xff] }
 0x340   : > { %v1115_v32 = vmul.f32 %v1091_v1, %v7561_v17  ;;  %v9573_v1 = vld [vmem:[#allocation36_spill] sm:$0xff] }
 0x341   : > { %v1194_v5 = vadd.f32 %v1178_v15, %v1130_v39  ;;  %v9581_v39 = vld [vmem:[#allocation53_spill] sm:$0xff] }
 0x342   : > { %v1093_v36 = vpop.permute.xlu0 %1092  ;;  %v1131_v8 = vadd.f32 %v1115_v32, %v1067_v10 }
 0x343   : > { %v1151_v47 = vpop.permute.xlu1 %1150  ;;  %v1116_v30 = vmul.f32 %v1093_v36, %v7587_v35  ;;  %v9570_v35 = vld [vmem:[#allocation46_spill] sm:$0xff] }
 0x344   : > { %v1177_v55 = vmul.f32 %v1151_v47, %v7545_v29 }
 0x346   : > { %v1193_v61 = vadd.f32 %v1177_v55, %v1129_v25  ;;  %v1097_v3 = vpop.permute.xlu0 %1096 }
 0x347   : > { %v1155_v24 = vpop.permute.xlu1 %1154  ;;  %v1118_v63 = vmul.f32 %v1097_v3, %v7613_v49  ;;  %v9579_v3 = vld [vmem:[#allocation52_spill] sm:$0xff] }
 0x348   : > { %v7734_v51 = vpack.c.bf16 %v1193_v61, %v1192_v53  ;;  %v1179_v17 = vmul.f32 %v1155_v24, %v7573_v33  ;;  %v1068_v33 = vmul.f32 %v7591_v4, %v7352_v37  ;;  %v9574_v37 = vld [vmem:[#allocation48_spill] sm:$0xff]  ;;  %v9577_v53 = vld [vmem:[#allocation51_spill] sm:$0xff]  ;;  %v9578_v61 = vld [vmem:[#allocation37_spill] sm:$0xff] }
 0x349   : > { %v1071_v4 = vmul.f32 %v9574_v37, %v9573_v1  ;;  %v9580_v24 = vld [vmem:[#allocation38_spill] sm:$0xff]  ;;  %v6751_v1 = vmov -1e+30  }
 0x34a   : > { %9568 = vst [vmem:[#allocation58_spill] sm:$0xff] %v7734_v51  ;;  %v1195_v29 = vadd.f32 %v1179_v17, %v1131_v8  ;;  %5403 = vmatprep.mubr.msk.bf16.mxu0 %vm1463_vm0, %v7734_v51  ;;  %v1157_v7 = vpop.permute.xlu0 %1156  ;;  %v1132_v62 = vadd.f32 %v1116_v30, %v1068_v33  ;;  %v1073_v8 = vmul.f32 %v9581_v39, %v9580_v24  ;;  %v9582_v17 = vld [vmem:[#allocation54_spill] sm:$0xff] }
 0x34b   : > { %v1095_v27 = vpop.permute.xlu1 %1094  ;;  %v1180_v58 = vmul.f32 %v1157_v7, %v9569_v50 }
 0x34c   : > { %v7739_v13 = vpack.c.bf16 %v1195_v29, %v1194_v5  ;;  %v1117_v12 = vmul.f32 %v1095_v27, %v7589_v19  ;;  %v9572_v19 = vld [vmem:[#allocation47_spill] sm:$0xff] }
 0x34d   : > { %v1070_v16 = vmul.f32 %v9572_v19, %v9571_v11  ;;  %v1196_v14 = vadd.f32 %v1180_v58, %v1132_v62 }
 0x34e   : > { %5404 = vmatmul.mubr.msk.bf16.gmra.mrb[36].mxu0 %vm1463_vm0, %v7739_v13  ;;  %v1161_v59 = vpop.permute.xlu0 %1160  ;;  %v1133_v23 = vadd.f32 %v1117_v12, %v1069_v6  ;;  %v9583_v12 = vld [vmem:[#allocation39_spill] sm:$0xff]  ;;  %v9584_v6 = vld [vmem:[#allocation40_spill] sm:$0xff] }
 0x34f   : > { %v1099_v21 = vpop.permute.xlu1 %1098  ;;  %v1182_v31 = vmul.f32 %v1161_v59, %v9575_v41  ;;  %v1134_v36 = vadd.f32 %v1118_v63, %v1070_v16  ;;  %v1074_v33 = vmul.f32 %v7669_v34, %v9583_v12  ;;  %v1075_v50 = vmul.f32 %v7671_v46, %v9584_v6 }
 0x350   : > { %v1119_v2 = vmul.f32 %v1099_v21, %v7615_v40  ;;  %v1396_v46 = vlaneseq }
 0x351   : > { %v1198_v47 = vadd.f32 %v1182_v31, %v1134_v36 }
 0x352   : > { %v1101_v18 = vpop.permute.xlu0 %1100  ;;  %v1135_v20 = vadd.f32 %v1119_v2, %v1071_v4  ;;  %v7795_v11 = vshrl.u32 %v1396_v46, 7  ;;  %v7798_v19 = vand.u32 127, %v1396_v46 }
 0x353   : > { %v1159_v9 = vpop.permute.xlu1 %1158  ;;  %v1120_v56 = vmul.f32 %v1101_v18, %v7639_v42  ;;  %v9585_v18 = vld [vmem:[#allocation56_spill] sm:$0xff] }
 0x354   : > { %v1181_v57 = vmul.f32 %v1159_v9, %v9570_v35  ;;  %v1398_v16 = vadd.s32 8, %v7795_v11  ;;  %vm1415_vm3 = vcmp.le.s32.totalorder %v7798_v19, %v7795_v11  ;;  %v1400_v4 = vadd.s32 24, %v7795_v11 }
 0x355   : > { %v1401_v39 = vadd.s32 32, %v7795_v11  ;;  %v1407_v6 = vadd.s32 80, %v7795_v11  ;;  %v1409_v46 = vadd.s32 96, %v7795_v11 }
 0x356   : > { %v1197_v22 = vadd.f32 %v1181_v57, %v1133_v23  ;;  %v1105_v54 = vpop.permute.xlu0 %1104  ;;  %vm1416_vm2 = vcmp.le.s32.totalorder %v7798_v19, %v1398_v16  ;;  %vm1418_vm4 = vcmp.le.s32.totalorder %v7798_v19, %v1400_v4 }
 0x357   : > { %v1163_v52 = vpop.permute.xlu1 %1162  ;;  %v1122_v59 = vmul.f32 %v1105_v54, %v7665_v26  ;;  %v7816_v54 = vsel %vm1415_vm3, 0.0, %v6751_v1  ;;  %vm1419_vm5 = vcmp.le.s32.totalorder %v7798_v19, %v1401_v39  ;;  %vm1425_vm10 = vcmp.le.s32.totalorder %v7798_v19, %v1407_v6  ;;  %v9594_v39 = vld [vmem:[#allocation30_spill] sm:$0xff] }
 0x358   : > { %v7758_v49 = vpack.c.bf16 %v1197_v22, %v1196_v14  ;;  %v1183_v40 = vmul.f32 %v1163_v52, %v7627_v48  ;;  %v1072_v48 = vmul.f32 %v9579_v3, %v9578_v61  ;;  %v7813_v22 = vsel %vm1416_vm2, 0.0, %v6751_v1  ;;  %v9588_v61 = vld [vmem:[#allocation50_spill] sm:$0xff] }
 0x359   : > { %v1138_v23 = vadd.f32 %v1122_v59, %v1074_v33  ;;  %v7844_v59 = vsel %vm1419_vm5, 0.0, %v6751_v1  ;;  %vm1427_vm14 = vcmp.le.s32.totalorder %v7798_v19, %v1409_v46  ;;  %vm2420_vm2 = vcmask 523520  }
 0x35a   : > { %9576 = vst [vmem:[#allocation44_spill] sm:$0xff] %v7758_v49  ;;  %v1199_v0 = vadd.f32 %v1183_v40, %v1135_v20  ;;  %5407 = vmatprep.mubr.msk.bf16.mxu0 %vm1463_vm0, %v7758_v49  ;;  %v1165_v55 = vpop.permute.xlu0 %1164  ;;  %v1136_v29 = vadd.f32 %v1120_v56, %v1072_v48  ;;  %vm2967_vm3 = vcmask 785920  }
 0x35b   : > { %v1103_v25 = vpop.permute.xlu1 %1102  ;;  %v1184_v5 = vmul.f32 %v1165_v55, %v9582_v17 }
 0x35c   : > { %v7763_v32 = vpack.c.bf16 %v1199_v0, %v1198_v47  ;;  %v1121_v15 = vmul.f32 %v1103_v25, %v9577_v53  ;;  %v7827_v47 = vsel %vm1418_vm4, 0.0, %v6751_v1  ;;  %v9587_v53 = vld [vmem:[#allocation45_spill] sm:$0xff]  ;;  %vm3514_vm4 = vcmask 1048320  }
 0x35d   : > { %v1200_v58 = vadd.f32 %v1184_v5, %v1136_v29  ;;  %v1404_v29 = vadd.s32 56, %v7795_v11 }
 0x35e   : > { %5408 = vmatmul.mubr.msk.bf16.gmra.mrb[40].mxu0 %vm1463_vm0, %v7763_v32  ;;  %v1169_v7 = vpop.permute.xlu0 %1168  ;;  %v1137_v30 = vadd.f32 %v1121_v15, %v1073_v8 }
 0x35f   : > { %v1107_v10 = vpop.permute.xlu1 %1106  ;;  %v1186_v62 = vmul.f32 %v1169_v7, %v9585_v18  ;;  %vm1422_vm6 = vcmp.le.s32.totalorder %v7798_v19, %v1404_v29  ;;  %v9598_v29 = vld [vmem:[#allocation41_spill] sm:$0xff] }
 0x360   : > { %v1123_v21 = vmul.f32 %v1107_v10, %v7667_v45  ;;  %v7854_v12 = vsel %vm1422_vm6, 0.0, %v6751_v1 }
 0x361   : > { %v1202_v45 = vadd.f32 %v1186_v62, %v1138_v23  ;;  %v1411_v23 = vadd.s32 112, %v7795_v11 }
 0x362   : > { %v1139_v2 = vadd.f32 %v1123_v21, %v1075_v50  ;;  %v1405_v21 = vadd.s32 64, %v7795_v11  ;;  %v1406_v50 = vadd.s32 72, %v7795_v11 }
 0x363   : > { %v1167_v27 = vpop.permute.xlu1 %1166  ;;  %vm1429_vm13 = vcmp.le.s32.totalorder %v7798_v19, %v1411_v23 }
 0x364   : > { %v1185_v42 = vmul.f32 %v1167_v27, %v7653_v38  ;;  %v1403_v27 = vadd.s32 48, %v7795_v11  ;;  %vm1423_vm9 = vcmp.le.s32.totalorder %v7798_v19, %v1405_v21  ;;  %vm1424_vm11 = vcmp.le.s32.totalorder %v7798_v19, %v1406_v50  ;;  %v9601_v21 = vld [vmem:[#allocation33_spill] sm:$0xff]  ;;  %v9602_v50 = vld [vmem:[#allocation43_spill] sm:$0xff] }
 0x366   : > { %v1201_v9 = vadd.f32 %v1185_v42, %v1137_v30  ;;  %v1402_v30 = vadd.s32 40, %v7795_v11  ;;  %vm1421_vm7 = vcmp.le.s32.totalorder %v7798_v19, %v1403_v27  ;;  %v9600_v27 = vld [vmem:[#allocation42_spill] sm:$0xff] }
 0x367   : > { %v1171_v63 = vpop.permute.xlu1 %1170  ;;  %v7857_v33 = vsel %vm1421_vm7, 0.0, %v6751_v1 }
 0x368   : > { %v7782_v35 = vpack.c.bf16 %v1201_v9, %v1200_v58  ;;  %v1187_v26 = vmul.f32 %v1171_v63, %v7681_v44  ;;  %v1399_v44 = vadd.s32 16, %v7795_v11  ;;  %vm1420_vm8 = vcmp.le.s32.totalorder %v7798_v19, %v1402_v30 }
 0x369   : > { %v7871_v62 = vsel %vm1420_vm8, 0.0, %v6751_v1  ;;  %v7875_v9 = vsel %vm1423_vm9, 0.0, %v6751_v1  ;;  %v1408_v63 = vadd.s32 88, %v7795_v11 }
 0x36a   : > { %9586 = vst [vmem:[#allocation46_spill] sm:$0xff] %v7782_v35  ;;  %v1203_v57 = vadd.f32 %v1187_v26, %v1139_v2  ;;  %5411 = vmatprep.mubr.msk.bf16.mxu0 %vm1463_vm0, %v7782_v35  ;;  %vm1417_vm1 = vcmp.le.s32.totalorder %v7798_v19, %v1399_v44  ;;  %v7886_v26 = vsel %vm1425_vm10, 0.0, %v6751_v1 }
 0x36b   : > { %v7803_v37 = vsel %vm1417_vm1, 0.0, %v6751_v1  ;;  %vm1426_vm12 = vcmp.le.s32.totalorder %v7798_v19, %v1408_v63 }
 0x36c   : > { %v7787_v34 = vpack.c.bf16 %v1203_v57, %v1202_v45  ;;  %v7789_v38 = vpop.permute.xlu0 %1930  ;;  %v7893_v57 = vsel %vm1424_vm11, 0.0, %v6751_v1  ;;  %v7903_v16 = vsel %vm1426_vm12, 0.0, %v6751_v1 }
 0x36d   : > { %5695 = vmatprep.subr.msk.bf16.mxu1 %vm1463_vm0, %v7789_v38 }
 0x36e   : > { %5412 = vmatmul.mubr.msk.bf16.gmra.mrb[44].mxu0 %vm1463_vm0, %v7787_v34 }
 0x378   : > { %v1933_v6 = vpop.permute.xlu1 %1932 }
 0x380   : > { %v1935_v30 = vpop.permute.xlu0 %1934 }
 0x411   : > { %v5401_v14 = vpop.f32.mrb[32].mxu0 }
 0x412   : > { %v7810_v41 = vadd.f32 %v5401_v14, %v7803_v37  ;;  %v1546_v31 = vpop.f32.mrb[33].mxu0  ;;  %v7909_v14 = vsel %vm1429_vm13, 0.0, %v6751_v1 }
 0x413   : > { %v5402_v52 = vpop.f32.mrb[34].mxu0  ;;  %v7824_v40 = vadd.f32 %v1546_v31, %v7816_v54  ;;  %v1412_v31 = vadd.s32 120, %v7795_v11 }
 0x414   : > { %1613 = vmax.xlane.f32.xlu0 %v7810_v41  ;;  %v1549_v36 = vpop.f32.mrb[35].mxu0  ;;  %v7832_v0 = vadd.f32 %v5402_v52, %v7827_v47 }
 0x415   : > { %v7821_v20 = vadd.f32 %v1549_v36, %v7813_v22  ;;  %vm1430_vm15 = vcmp.le.s32.totalorder %v7798_v19, %v1412_v31 }
 0x417   : > { %1611 = vmax.xlane.f32.xlu1 %v7821_v20 }
 0x418   : > { %1609 = vmax.xlane.f32.xlu0 %v7824_v40 }
 0x41c   : > { %1615 = vmax.xlane.f32.xlu0 %v7832_v0 }
 0x421   : > { %v5405_v25 = vpop.f32.mrb[36].mxu0 }
 0x422   : > { %v1562_v55 = vpop.f32.mrb[37].mxu0  ;;  %v7868_v18 = vadd.f32 %v5405_v25, %v7857_v33  ;;  %v7922_v25 = vsel %vm1427_vm14, 0.0, %v6751_v1 }
 0x423   : > { %v5406_v56 = vpop.f32.mrb[38].mxu0  ;;  %v7851_v42 = vadd.f32 %v1562_v55, %v7844_v59  ;;  %v1410_v55 = vadd.s32 104, %v7795_v11 }
 0x424   : > { %v1565_v10 = vpop.f32.mrb[39].mxu0  ;;  %v7865_v58 = vadd.f32 %v5406_v56, %v7854_v12 }
 0x425   : > { %v7883_v2 = vadd.f32 %v1565_v10, %v7871_v62  ;;  %v7932_v10 = vsel %vm1430_vm15, 0.0, %v6751_v1  ;;  %vm1428_vm1 = vcmp.le.s32.totalorder %v7798_v19, %v1410_v55  ;;  %v9591_v19 = vld [vmem:[#allocation55_spill] sm:$0xff] }
 0x428   : > { %1936 = vrot.lane.b32.xlu1 %v9587_v53, %s6750_s18 }
 0x431   : > { %v5409_v15 = vpop.f32.mrb[40].mxu0 }
 0x432   : > { %1938 = vrot.lane.b32.xlu0 %v9588_v61, %s6750_s18  ;;  %v1578_v3 = vpop.f32.mrb[41].mxu0  ;;  %v7900_v44 = vadd.f32 %v5409_v15, %v7886_v26 }
 0x433   : > { %v5410_v48 = vpop.f32.mrb[42].mxu0  ;;  %v7889_v45 = vadd.f32 %v1578_v3, %v7875_v9  ;;  %v7940_v3 = vsel %vm1428_vm1, 0.0, %v6751_v1  ;;  %v9592_v1 = vld [vmem:[#allocation28_spill] sm:$0xff] }
 0x434   : > { %v1581_v24 = vpop.f32.mrb[43].mxu0  ;;  %v7916_v52 = vadd.f32 %v5410_v48, %v7903_v16  ;;  %9589 = vst [vmem:[#allocation35_spill] sm:$0xff] %v7940_v3  ;;  %v9590_v48 = vld [vmem:[#allocation57_spill] sm:$0xff] }
 0x435   : > { %v7906_v4 = vadd.f32 %v1581_v24, %v7893_v57  ;;  %v9593_v24 = vld [vmem:[#allocation27_spill] sm:$0xff] }
 0x441   : > { %v5413_v8 = vpop.f32.mrb[44].mxu0 }
 0x442   : > { %v1594_v17 = vpop.f32.mrb[45].mxu0  ;;  %v7919_v36 = vadd.f32 %v5413_v8, %v7909_v14  ;;  %v9595_v8 = vld [vmem:[#allocation29_spill] sm:$0xff] }
 0x443   : > { %v5414_v5 = vpop.f32.mrb[46].mxu0  ;;  %v7929_v56 = vadd.f32 %v1594_v17, %v7922_v25  ;;  %v9596_v17 = vld [vmem:[#allocation34_spill] sm:$0xff] }
 0x444   : > { %v1597_v7 = vpop.f32.mrb[47].mxu0  ;;  %v7937_v15 = vadd.f32 %v5414_v5, %v7932_v10  ;;  %v9597_v5 = vld [vmem:[#allocation32_spill] sm:$0xff] }
 0x445   : > { %v7944_v11 = vadd.f32 %v1597_v7, %v7940_v3  ;;  %v9599_v7 = vld [vmem:[#allocation31_spill] sm:$0xff] }
 0x44c   : > { %1617 = vmax.xlane.f32.xlu1 %v7851_v42 }
 0x450   : > { %1623 = vmax.xlane.f32.xlu1 %v7865_v58 }
 0x451   : > { %1621 = vmax.xlane.f32.xlu0 %v7868_v18 }
 0x454   : > { %1619 = vmax.xlane.f32.xlu1 %v7883_v2 }
 0x455   : > { %1625 = vmax.xlane.f32.xlu0 %v7889_v45 }
 0x458   : > { %1629 = vmax.xlane.f32.xlu1 %v7900_v44 }
 0x459   : > { %1627 = vmax.xlane.f32.xlu0 %v7906_v4 }
 0x45c   : > { %1631 = vmax.xlane.f32.xlu1 %v7916_v52 }
 0x45d   : > { %1637 = vmax.xlane.f32.xlu0 %v7919_v36 }
 0x460   : > { %1633 = vmax.xlane.f32.xlu1 %v7929_v56 }
 0x464   : > { %1639 = vmax.xlane.f32.xlu1 %v7937_v15 }
 0x468   : > { %1635 = vmax.xlane.f32.xlu1 %v7944_v11 }
 0x473   : > { %1942 = vrot.lane.b32.xlu0 %v9590_v48, %s6750_s18 }
 0x477   : > { %1944 = vrot.lane.b32.xlu0 %v7697_v43, %s6750_s18 }
 0x479   : > { %1940 = vrot.lane.b32.xlu1 %v9591_v19, %s6750_s18 }
 0x47b   : > { %1906 = vrot.lane.b32.xlu0 %v7710_v28, %s6750_s18 }
 0x47d   : > { %1908 = vrot.lane.b32.xlu1 %v7715_v60, %s6750_s18 }
 0x47f   : > { %1910 = vrot.lane.b32.xlu0 %v7734_v51, %s6750_s18 }
 0x481   : > { %1912 = vrot.lane.b32.xlu1 %v7739_v13, %s6750_s18 }
 0x483   : > { %1914 = vrot.lane.b32.xlu0 %v7758_v49, %s6750_s18 }
 0x485   : > { %1916 = vrot.lane.b32.xlu1 %v7763_v32, %s6750_s18 }
 0x487   : > { %1918 = vrot.lane.b32.xlu0 %v7782_v35, %s6750_s18 }
 0x489   : > { %1920 = vrot.lane.b32.xlu1 %v7787_v34, %s6750_s18 }
 0x48b   : > { %2243 = vrot.lane.b32.xlu0 %v9592_v1, %s6750_s18 }
 0x48d   : > { %2245 = vrot.lane.b32.xlu1 %v9593_v24, %s6750_s18 }
 0x48f   : > { %2247 = vrot.lane.b32.xlu0 %v9594_v39, %s6750_s18 }
 0x491   : > { %2249 = vrot.lane.b32.xlu1 %v9595_v8, %s6750_s18 }
 0x493   : > { %2255 = vrot.lane.b32.xlu0 %v9596_v17, %s6750_s18 }
 0x495   : > { %2251 = vrot.lane.b32.xlu1 %v9597_v5, %s6750_s18 }
 0x497   : > { %2477 = vrot.lane.b32.xlu0 %v9598_v29, %s6752_s22 }
 0x499   : > { %2253 = vrot.lane.b32.xlu1 %v9599_v7, %s6750_s18 }
 0x49b   : > { %2479 = vrot.lane.b32.xlu0 %v9600_v27, %s6752_s22 }
 0x49d   : > { %2257 = vrot.lane.b32.xlu1 %v9601_v21, %s6750_s18 }
 0x49f   : > { %2483 = vrot.lane.b32.xlu0 %v9587_v53, %s6752_s22 }
 0x4a1   : > { %2481 = vrot.lane.b32.xlu1 %v9602_v50, %s6752_s22  ;;  %v1614_v63 = vpop.xlane.xlu0 %1613 }
 0x4a2   : > { %v1643_v46 = vsub.f32 %v7810_v41, %v1614_v63 }
 0x4a4   : > { %v1612_v23 = vpop.xlane.xlu1 %1611  ;;  %v1661_v39 = vmul.f32 1.442695, %v1643_v46 }
 0x4a5   : > { %v1642_v31 = vsub.f32 %v7821_v20, %v1612_v23  ;;  %v1610_v55 = vpop.xlane.xlu0 %1609 }
 0x4a6   : > { %v1641_v27 = vsub.f32 %v7824_v40, %v1610_v55 }
 0x4a7   : > { %v1659_v29 = vmul.f32 1.442695, %v1642_v31 }
 0x4a8   : > { %v1657_v17 = vmul.f32 1.442695, %v1641_v27 }
 0x4a9   : > { %5989 = vpow2.f32 %v1659_v29  ;;  %v1616_v1 = vpop.xlane.xlu0 %1615 }
 0x4aa   : > { %5991 = vpow2.f32 %v1657_v17  ;;  %v1644_v53 = vsub.f32 %v7832_v0, %v1616_v1  ;;  %v1971_v0 = vsel %vm1463_vm0, %v7789_v38, 0  ;;  %v1937_v1 = vpop.permute.xlu1 %1936 }
 0x4ab   : > { %5993 = vpow2.f32 %v1661_v39  ;;  %v1980_v39 = vsel %vm1463_vm0, %v1937_v1, 0 }
 0x4ac   : > { %v1663_v35 = vmul.f32 1.442695, %v1644_v53  ;;  %v1977_v53 = vsel %vm1463_vm0, %v1935_v30, 0 }
 0x4ad   : > { %v1939_v29 = vpop.permute.xlu0 %1938 }
 0x4ae   : > { %5995 = vpow2.f32 %v1663_v35  ;;  %v1974_v35 = vsel %vm1463_vm0, %v1933_v6, 0 }
 0x4b3   : > { %v7997_v49 = vpop.eup %5989 }
 0x4b4   : > { %9603 = vst [vmem:[#allocation47_spill] sm:$0xff] %v7997_v49  ;;  %v7999_v51 = vpop.eup %5991 }
 0x4b5   : > { %9604 = vst [vmem:[#allocation36_spill] sm:$0xff] %v7999_v51  ;;  %v1737_v41 = vpack.c.bf16 %v7997_v49, %v7999_v51  ;;  %v8003_v20 = vpop.eup %5993  ;;  %v9643_v49 = vld [vmem:[#allocation45_spill] sm:$0xff] }
 0x4b6   : > { %9605 = vst [vmem:[#allocation48_spill] sm:$0xff] %v8003_v20 }
 0x4b7   : > { %5431 = vmatprep.mubr.bf16.mxu1 %v1737_v41 }
 0x4b8   : > { %v8005_v40 = vpop.eup %5995 }
 0x4b9   : > { %9606 = vst [vmem:[#allocation49_spill] sm:$0xff] %v8005_v40  ;;  %v1738_v17 = vpack.c.bf16 %v8005_v40, %v8003_v20 }
 0x4bb   : > { %5432 = vmatmul.mubr.bf16.vlgmr.msra.gmra.mrb[16].mxu1 %v1738_v17 }
 0x4bc   : > { %5448 = vmatpush3.bf16.xpose.msra.mxu1 %v1971_v0 }
 0x4bd   : > { %5696 = vmatprep.subr.msk.bf16.mxu1 %vm1463_vm0, %v1933_v6  ;;  %v1983_v6 = vsel %vm1463_vm0, %v1939_v29, 0 }
 0x4c4   : > { %5450 = vmatpush3.bf16.xpose.msra.mxu1 %v1974_v35 }
 0x4c5   : > { %5697 = vmatprep.subr.msk.bf16.mxu1 %vm1463_vm0, %v1935_v30 }
 0x4cc   : > { %5452 = vmatpush3.bf16.xpose.msra.mxu1 %v1977_v53 }
 0x4cd   : > { %5698 = vmatprep.subr.msk.bf16.mxu1 %vm1463_vm0, %v1937_v1 }
 0x4d4   : > { %5454 = vmatpush3.bf16.xpose.msra.mxu1 %v1980_v39 }
 0x4d5   : > { %5699 = vmatprep.subr.msk.bf16.mxu1 %vm1463_vm0, %v1939_v29 }
 0x4d9   : > { %v1618_v38 = vpop.xlane.xlu1 %1617 }
 0x4da   : > { %v1645_v27 = vsub.f32 %v7851_v42, %v1618_v38 }
 0x4dc   : > { %5456 = vmatpush3.bf16.xpose.msra.mxu1 %v1983_v6  ;;  %v1665_v46 = vmul.f32 1.442695, %v1645_v27 }
 0x4dd   : > { %v1624_v63 = vpop.xlane.xlu1 %1623 }
 0x4de   : > { %v1648_v23 = vsub.f32 %v7865_v58, %v1624_v63  ;;  %v1622_v30 = vpop.xlane.xlu0 %1621  ;;  %5997 = vpow2.f32 %v1665_v46 }
 0x4df   : > { %v1647_v31 = vsub.f32 %v7868_v18, %v1622_v30 }
 0x4e0   : > { %v1671_v55 = vmul.f32 1.442695, %v1648_v23 }
 0x4e1   : > { %v1669_v41 = vmul.f32 1.442695, %v1647_v31  ;;  %v1620_v17 = vpop.xlane.xlu1 %1619 }
 0x4e2   : > { %v1646_v0 = vsub.f32 %v7883_v2, %v1620_v17  ;;  %v1626_v35 = vpop.xlane.xlu0 %1625  ;;  %5999 = vpow2.f32 %v1671_v55 }
 0x4e3   : > { %v1649_v53 = vsub.f32 %v7889_v45, %v1626_v35  ;;  %6001 = vpow2.f32 %v1669_v41 }
 0x4e4   : > { %v1667_v42 = vmul.f32 1.442695, %v1646_v0 }
 0x4e5   : > { %v1630_v1 = vpop.xlane.xlu1 %1629  ;;  %v1673_v39 = vmul.f32 1.442695, %v1649_v53 }
 0x4e6   : > { %6003 = vpow2.f32 %v1667_v42  ;;  %v1651_v58 = vsub.f32 %v7900_v44, %v1630_v1  ;;  %v1628_v29 = vpop.xlane.xlu0 %1627 }
 0x4e7   : > { %v1650_v18 = vsub.f32 %v7906_v4, %v1628_v29  ;;  %6005 = vpow2.f32 %v1673_v39 }
 0x4e8   : > { %v1677_v38 = vmul.f32 1.442695, %v1651_v58  ;;  %v8027_v23 = vpop.eup %5997 }
 0x4e9   : > { %v1675_v27 = vmul.f32 1.442695, %v1650_v18  ;;  %v1632_v6 = vpop.xlane.xlu1 %1631  ;;  %9607 = vst [vmem:[#allocation51_spill] sm:$0xff] %v8027_v23 }
 0x4ea   : > { %v1652_v2 = vsub.f32 %v7916_v52, %v1632_v6  ;;  %v1638_v63 = vpop.xlane.xlu0 %1637 }
 0x4eb   : > { %6007 = vpow2.f32 %v1675_v27  ;;  %v1655_v53 = vsub.f32 %v7919_v36, %v1638_v63 }
 0x4ec   : > { %v1679_v45 = vmul.f32 1.442695, %v1652_v2  ;;  %6009 = vpow2.f32 %v1677_v38  ;;  %v8029_v46 = vpop.eup %5999 }
 0x4ed   : > { %v1634_v30 = vpop.xlane.xlu1 %1633  ;;  %9608 = vst [vmem:[#allocation37_spill] sm:$0xff] %v8029_v46  ;;  %v8031_v31 = vpop.eup %6001  ;;  %v1685_v27 = vmul.f32 1.442695, %v1655_v53 }
 0x4ee   : > { %6011 = vpow2.f32 %v1679_v45  ;;  %v1943_v44 = vpop.permute.xlu0 %1942  ;;  %9609 = vst [vmem:[#allocation52_spill] sm:$0xff] %v8031_v31  ;;  %v1653_v55 = vsub.f32 %v7929_v56, %v1634_v30  ;;  %v1740_v35 = vpack.c.bf16 %v8029_v46, %v8031_v31 }
 0x4f0   : > { %v8033_v4 = vpop.eup %6003  ;;  %v1681_v1 = vmul.f32 1.442695, %v1653_v55 }
 0x4f1   : > { %9610 = vst [vmem:[#allocation38_spill] sm:$0xff] %v8033_v4  ;;  %v1640_v41 = vpop.xlane.xlu1 %1639  ;;  %v1739_v52 = vpack.c.bf16 %v8033_v4, %v8027_v23  ;;  %v8042_v42 = vpop.eup %6005  ;;  %v9642_v4 = vld [vmem:[#allocation42_spill] sm:$0xff] }
 0x4f2   : > { %v1656_v17 = vsub.f32 %v7937_v15, %v1640_v41  ;;  %v1945_v0 = vpop.permute.xlu0 %1944  ;;  %9611 = vst [vmem:[#allocation53_spill] sm:$0xff] %v8042_v42  ;;  %6013 = vpow2.f32 %v1681_v1 }
 0x4f3   : > { %5435 = vmatprep.mubr.bf16.mxu1 %v1739_v52 }
 0x4f4   : > { %5436 = vmatmul.mubr.bf16.gmra.mrb[20].mxu1 %v1740_v35  ;;  %v1687_v56 = vmul.f32 1.442695, %v1656_v17  ;;  %v1989_v35 = vsel %vm1463_vm0, %v1943_v44, 0 }
 0x4f5   : > { %v8044_v39 = vpop.eup %6007  ;;  %v1636_v58 = vpop.xlane.xlu1 %1635 }
 0x4f6   : > { %9612 = vst [vmem:[#allocation54_spill] sm:$0xff] %v8044_v39  ;;  %v1654_v29 = vsub.f32 %v7944_v11, %v1636_v58  ;;  %v1907_v18 = vpop.permute.xlu0 %1906  ;;  %v1741_v15 = vpack.c.bf16 %v8044_v39, %v8042_v42  ;;  %v8049_v38 = vpop.eup %6009  ;;  %6015 = vpow2.f32 %v1687_v56  ;;  %v9641_v42 = vld [vmem:[#allocation41_spill] sm:$0xff] }
 0x4f7   : > { %9613 = vst [vmem:[#allocation39_spill] sm:$0xff] %v8049_v38 }
 0x4f8   : > { %v8051_v6 = vpop.eup %6011  ;;  %v1683_v36 = vmul.f32 1.442695, %v1654_v29  ;;  %5439 = vmatprep.mubr.bf16.mxu1 %v1741_v15 }
 0x4f9   : > { %9614 = vst [vmem:[#allocation40_spill] sm:$0xff] %v8051_v6  ;;  %v1941_v2 = vpop.permute.xlu1 %1940  ;;  %v1742_v63 = vpack.c.bf16 %v8051_v6, %v8049_v38  ;;  %v9640_v38 = vld [vmem:[#allocation34_spill] sm:$0xff] }
 0x4fa   : > { %6017 = vpow2.f32 %v1683_v36  ;;  %5700 = vmatprep.subr.msk.bf16.mxu1 %vm1463_vm0, %v1941_v2  ;;  %v1911_v11 = vpop.permute.xlu0 %1910  ;;  %v1986_v45 = vsel %vm1463_vm0, %v1941_v2, 0  ;;  %v1992_v36 = vsel %vm1463_vm0, %v1945_v0, 0 }
 0x4fb   : > { %6019 = vpow2.f32 %v1685_v27  ;;  %5458 = vmatpush3.bf16.xpose.msra.mxu1 %v1986_v45 }
 0x4fc   : > { %5440 = vmatmul.mubr.bf16.gmra.mrb[24].mxu1 %v1742_v63  ;;  %5701 = vmatprep.subr.msk.bf16.mxu1 %vm1463_vm0, %v1943_v44  ;;  %v8058_v52 = vpop.eup %6013 }
 0x4fd   : > { %v1909_v30 = vpop.permute.xlu1 %1908  ;;  %9615 = vst [vmem:[#allocation56_spill] sm:$0xff] %v8058_v52 }
 0x4fe   : > { %v1915_v55 = vpop.permute.xlu0 %1914 }
 0x500   : > { %v8061_v53 = vpop.eup %6015 }
 0x501   : > { %v1913_v41 = vpop.permute.xlu1 %1912  ;;  %9616 = vst [vmem:[#allocation50_spill] sm:$0xff] %v8061_v53 }
 0x502   : > { %v1919_v17 = vpop.permute.xlu0 %1918 }
 0x503   : > { %5460 = vmatpush3.bf16.xpose.msra.mxu1 %v1989_v35 }
 0x504   : > { %v8063_v1 = vpop.eup %6017  ;;  %5702 = vmatprep.subr.msk.bf16.mxu1 %vm1463_vm0, %v1945_v0 }
 0x505   : > { %9617 = vst [vmem:[#allocation57_spill] sm:$0xff] %v8063_v1  ;;  %v8066_v56 = vpop.eup %6019  ;;  %v1917_v58 = vpop.permute.xlu1 %1916  ;;  %v1743_v29 = vpack.c.bf16 %v8063_v1, %v8058_v52 }
 0x506   : > { %9618 = vst [vmem:[#allocation55_spill] sm:$0xff] %v8066_v56  ;;  %v2244_v15 = vpop.permute.xlu0 %2243  ;;  %v1744_v27 = vpack.c.bf16 %v8061_v53, %v8066_v56 }
 0x507   : > { %5443 = vmatprep.mubr.bf16.mxu1 %v1743_v29  ;;  %5479 = vmatprep.subr.bf16.mxu0 %v2244_v15 }
 0x508   : > { %5444 = vmatmul.mubr.bf16.gmra.mrb[28].mxu1 %v1744_v27  ;;  %5480 = vmatpush3.bf16.msra.mxu0 %v2244_v15 }
 0x509   : > { %v1921_v44 = vpop.permute.xlu1 %1920  ;;  %5463 = vmatprep.mubr.msk.bf16.mxu1 %vm1463_vm0, %v1907_v18 }
 0x50a   : > { %v2248_v63 = vpop.permute.xlu0 %2247 }
 0x50b   : > { %5462 = vmatpush3.bf16.xpose.msra.mxu1 %v1992_v36 }
 0x50d   : > { %v2246_v2 = vpop.permute.xlu1 %2245 }
 0x50e   : > { %5481 = vmatprep.subr.bf16.mxu0 %v2246_v2  ;;  %v2256_v0 = vpop.permute.xlu0 %2255 }
 0x50f   : > { %5482 = vmatpush3.bf16.msra.mxu0 %v2246_v2 }
 0x510   : > { %5483 = vmatprep.subr.bf16.mxu0 %v2248_v63 }
 0x511   : > { %v2250_v45 = vpop.permute.xlu1 %2249 }
 0x512   : > { %5464 = vmatmul.mubr.msk.bf16.vlgmr.msra.gmra.mrb[32].mxu1 %vm1463_vm0, %v1909_v30 }
 0x513   : > { %5467 = vmatprep.mubr.msk.bf16.mxu1 %vm1463_vm0, %v1911_v11  ;;  %5484 = vmatpush3.bf16.msra.mxu0 %v2248_v63  ;;  %v8080_v11 = vpop.permute.xlu0 %2477 }
 0x514   : > { %5485 = vmatprep.subr.bf16.mxu0 %v2250_v45 }
 0x515   : > { %v2252_v35 = vpop.permute.xlu1 %2251 }
 0x517   : > { %5486 = vmatpush3.bf16.msra.mxu0 %v2250_v45  ;;  %v8221_v6 = vpop.permute.xlu0 %2479 }
 0x518   : > { %5487 = vmatprep.subr.bf16.mxu0 %v2252_v35 }
 0x519   : > { %v2254_v18 = vpop.permute.xlu1 %2253 }
 0x51a   : > { %5468 = vmatmul.mubr.msk.bf16.gmra.mrb[36].mxu1 %vm1463_vm0, %v1913_v41 }
 0x51b   : > { %5471 = vmatprep.mubr.msk.bf16.mxu1 %vm1463_vm0, %v1915_v55  ;;  %5488 = vmatpush3.bf16.msra.mxu0 %v2252_v35  ;;  %v8227_v39 = vpop.permute.xlu0 %2483 }
 0x51c   : > { %5489 = vmatprep.subr.bf16.mxu0 %v2254_v18 }
 0x51d   : > { %v2258_v30 = vpop.permute.xlu1 %2257 }
 0x51f   : > { %5490 = vmatpush3.bf16.msra.mxu0 %v2254_v18 }
 0x520   : > { %5491 = vmatprep.subr.bf16.mxu0 %v2256_v0 }
 0x521   : > { %v8229_v46 = vpop.permute.xlu1 %2481 }
 0x522   : > { %5472 = vmatmul.mubr.msk.bf16.gmra.mrb[40].mxu1 %vm1463_vm0, %v1917_v58 }
 0x523   : > { %5475 = vmatprep.mubr.msk.bf16.mxu1 %vm1463_vm0, %v1919_v17  ;;  %5492 = vmatpush3.bf16.msra.mxu0 %v2256_v0 }
 0x524   : > { %5493 = vmatprep.subr.bf16.mxu0 %v2258_v30 }
 0x527   : > { %5494 = vmatpush3.bf16.msra.mxu0 %v2258_v30 }
 0x528   : > { %5703 = vmatprep.subr.msk.bf16.mxu0 %vm1463_vm0, %v8080_v11 }
 0x52a   : > { %5476 = vmatmul.mubr.msk.bf16.gmra.mrb[44].mxu1 %vm1463_vm0, %v1921_v44 }
 0x58e   : > { %v8085_v55 = vpop.f32.mrb[16].mxu1 }
 0x58f   : > { %9619 = vst [vmem:[#allocation27_spill] sm:$0xff] %v8085_v55  ;;  %v8087_v41 = vpop.f32.mrb[17].mxu1 }
 0x590   : > { %9620 = vst [vmem:[#allocation31_spill] sm:$0xff] %v8087_v41  ;;  %v8089_v29 = vpop.f32.mrb[18].mxu1 }
 0x591   : > { %9621 = vst [vmem:[#allocation43_spill] sm:$0xff] %v8089_v29  ;;  %v8091_v58 = vpop.f32.mrb[19].mxu1 }
 0x592   : > { %9622 = vst [vmem:[#allocation59_spill] sm:$0xff] %v8091_v58 }
 0x5c7   : > { %v8093_v15 = vpop.f32.mrb[20].mxu1 }
 0x5c8   : > { %9623 = vst [vmem:[#allocation60_spill] sm:$0xff] %v8093_v15  ;;  %v8095_v17 = vpop.f32.mrb[21].mxu1 }
 0x5c9   : > { %9624 = vst [vmem:[#allocation61_spill] sm:$0xff] %v8095_v17  ;;  %v8097_v27 = vpop.f32.mrb[22].mxu1 }
 0x5ca   : > { %9625 = vst [vmem:[#allocation62_spill] sm:$0xff] %v8097_v27  ;;  %v8099_v36 = vpop.f32.mrb[23].mxu1 }
 0x5cb   : > { %9626 = vst [vmem:[#allocation63_spill] sm:$0xff] %v8099_v36 }
 0x5cf   : > { %v8101_v2 = vpop.f32.mrb[24].mxu1 }
 0x5d0   : > { %9627 = vst [vmem:[#allocation64_spill] sm:$0xff] %v8101_v2  ;;  %v8103_v63 = vpop.f32.mrb[25].mxu1 }
 0x5d1   : > { %9628 = vst [vmem:[#allocation65_spill] sm:$0xff] %v8103_v63  ;;  %v8105_v44 = vpop.f32.mrb[26].mxu1 }
 0x5d2   : > { %9629 = vst [vmem:[#allocation66_spill] sm:$0xff] %v8105_v44  ;;  %v8107_v45 = vpop.f32.mrb[27].mxu1 }
 0x5d3   : > { %9630 = vst [vmem:[#allocation67_spill] sm:$0xff] %v8107_v45 }
 0x5db   : > { %v8109_v35 = vpop.f32.mrb[28].mxu1 }
 0x5dc   : > { %9631 = vst [vmem:[#allocation68_spill] sm:$0xff] %v8109_v35  ;;  %v8111_v18 = vpop.f32.mrb[29].mxu1 }
 0x5dd   : > { %9632 = vst [vmem:[#allocation69_spill] sm:$0xff] %v8111_v18  ;;  %v8113_v0 = vpop.f32.mrb[30].mxu1 }
 0x5de   : > { %9633 = vst [vmem:[#allocation70_spill] sm:$0xff] %v8113_v0  ;;  %v8115_v30 = vpop.f32.mrb[31].mxu1 }
 0x5df   : > { %9634 = vst [vmem:[#allocation71_spill] sm:$0xff] %v8115_v30 }
 0x5e5   : > { %v5465_v56 = vpop.f32.mrb[32].mxu1 }
 0x5e6   : > { %v8118_v53 = vadd.f32 %v5465_v56, %v7803_v37  ;;  %v2028_v27 = vpop.f32.mrb[33].mxu1 }
 0x5e7   : > { %v5466_v2 = vpop.f32.mrb[34].mxu1  ;;  %v8125_v35 = vadd.f32 %v2028_v27, %v7816_v54 }
 0x5e8   : > { %2095 = vmax.xlane.f32.xlu0 %v8118_v53  ;;  %v2031_v63 = vpop.f32.mrb[35].mxu1  ;;  %v8130_v30 = vadd.f32 %v5466_v2, %v7827_v47 }
 0x5e9   : > { %v8122_v44 = vadd.f32 %v2031_v63, %v7813_v22 }
 0x5eb   : > { %2093 = vmax.xlane.f32.xlu1 %v8122_v44 }
 0x5ec   : > { %2091 = vmax.xlane.f32.xlu0 %v8125_v35 }
 0x5ed   : > { %v5469_v0 = vpop.f32.mrb[36].mxu1 }
 0x5ee   : > { %v8133_v56 = vadd.f32 %v5469_v0, %v7857_v33  ;;  %v2044_v18 = vpop.f32.mrb[37].mxu1 }
 0x5ef   : > { %v5470_v45 = vpop.f32.mrb[38].mxu1  ;;  %v8141_v15 = vadd.f32 %v2044_v18, %v7844_v59 }
 0x5f0   : > { %2097 = vmax.xlane.f32.xlu0 %v8130_v30  ;;  %2103 = vmax.xlane.f32.xlu1 %v8133_v56  ;;  %v2047_v63 = vpop.f32.mrb[39].mxu1  ;;  %v8146_v0 = vadd.f32 %v5470_v45, %v7854_v12 }
 0x5f1   : > { %v8138_v27 = vadd.f32 %v2047_v63, %v7871_v62 }
 0x5f4   : > { %2101 = vmax.xlane.f32.xlu0 %v8138_v27  ;;  %2099 = vmax.xlane.f32.xlu1 %v8141_v15 }
 0x5f5   : > { %v5473_v2 = vpop.f32.mrb[40].mxu1 }
 0x5f6   : > { %v8149_v36 = vadd.f32 %v5473_v2, %v7886_v26  ;;  %v2060_v17 = vpop.f32.mrb[41].mxu1 }
 0x5f7   : > { %v5474_v1 = vpop.f32.mrb[42].mxu1  ;;  %v8154_v18 = vadd.f32 %v2060_v17, %v7875_v9 }
 0x5f8   : > { %2105 = vmax.xlane.f32.xlu1 %v8146_v0  ;;  %2111 = vmax.xlane.f32.xlu0 %v8149_v36  ;;  %v2063_v63 = vpop.f32.mrb[43].mxu1  ;;  %v8158_v55 = vadd.f32 %v5474_v1, %v7903_v16 }
 0x5f9   : > { %v8166_v52 = vadd.f32 %v2063_v63, %v7893_v57  ;;  %v9637_v63 = vld [vmem:[#allocation46_spill] sm:$0xff] }
 0x5fc   : > { %2107 = vmax.xlane.f32.xlu1 %v8154_v18 }
 0x5fd   : > { %v5477_v29 = vpop.f32.mrb[44].mxu1 }
 0x5fe   : > { %v2076_v45 = vpop.f32.mrb[45].mxu1  ;;  %v8170_v17 = vadd.f32 %v5477_v29, %v7909_v14 }
 0x5ff   : > { %v8161_v2 = vadd.f32 %v2076_v45, %v7922_v25  ;;  %v5478_v58 = vpop.f32.mrb[46].mxu1  ;;  %v9639_v45 = vld [vmem:[#allocation30_spill] sm:$0xff] }
 0x600   : > { %2113 = vmax.xlane.f32.xlu1 %v8158_v55  ;;  %v2079_v41 = vpop.f32.mrb[47].mxu1  ;;  %v8174_v1 = vadd.f32 %v5478_v58, %v7932_v10  ;;  %v9636_v58 = vld [vmem:[#allocation44_spill] sm:$0xff] }
 0x601   : > { %2115 = vmax.xlane.f32.xlu0 %v8161_v2  ;;  %v8192_v29 = vadd.f32 %v2079_v41, %v7940_v3  ;;  %v9635_v41 = vld [vmem:[#allocation58_spill] sm:$0xff] }
 0x604   : > { %2109 = vmax.xlane.f32.xlu1 %v8166_v52 }
 0x608   : > { %2119 = vmax.xlane.f32.xlu1 %v8170_v17 }
 0x60c   : > { %2121 = vmax.xlane.f32.xlu1 %v8174_v1 }
 0x617   : > { %2487 = vrot.lane.b32.xlu0 %v9591_v19, %s6752_s22 }
 0x61d   : > { %2485 = vrot.lane.b32.xlu1 %v9588_v61, %s6752_s22 }
 0x621   : > { %2455 = vrot.lane.b32.xlu1 %v7715_v60, %s6752_s22 }
 0x625   : > { %2459 = vrot.lane.b32.xlu1 %v7739_v13, %s6752_s22 }
 0x629   : > { %2463 = vrot.lane.b32.xlu1 %v7763_v32, %s6752_s22 }
 0x62d   : > { %2467 = vrot.lane.b32.xlu1 %v7787_v34, %s6752_s22 }
 0x631   : > { %2792 = vrot.lane.b32.xlu1 %v9593_v24, %s6752_s22 }
 0x635   : > { %2796 = vrot.lane.b32.xlu1 %v9595_v8, %s6752_s22 }
 0x636   : > { %2117 = vmax.xlane.f32.xlu0 %v8192_v29 }
 0x639   : > { %2798 = vrot.lane.b32.xlu1 %v9597_v5, %s6752_s22 }
 0x63d   : > { %2800 = vrot.lane.b32.xlu1 %v9599_v7, %s6752_s22 }
 0x641   : > { %2804 = vrot.lane.b32.xlu1 %v9601_v21, %s6752_s22 }
 0x645   : > { %3028 = vrot.lane.b32.xlu1 %v9602_v50, %s6753_s12  ;;  %v9638_v50 = vld [vmem:[#allocation28_spill] sm:$0xff] }
 0x64c   : > { %2489 = vrot.lane.b32.xlu0 %v9590_v48, %s6752_s22 }
 0x650   : > { %2491 = vrot.lane.b32.xlu0 %v7697_v43, %s6752_s22 }
 0x654   : > { %2453 = vrot.lane.b32.xlu0 %v7710_v28, %s6752_s22 }
 0x658   : > { %2457 = vrot.lane.b32.xlu0 %v9635_v41, %s6752_s22 }
 0x65c   : > { %2461 = vrot.lane.b32.xlu0 %v9636_v58, %s6752_s22 }
 0x660   : > { %2465 = vrot.lane.b32.xlu0 %v9637_v63, %s6752_s22 }
 0x664   : > { %2790 = vrot.lane.b32.xlu0 %v9638_v50, %s6752_s22 }
 0x668   : > { %2794 = vrot.lane.b32.xlu0 %v9639_v45, %s6752_s22 }
 0x66c   : > { %2802 = vrot.lane.b32.xlu0 %v9640_v38, %s6752_s22 }
 0x670   : > { %3024 = vrot.lane.b32.xlu0 %v9641_v42, %s6753_s12 }
 0x674   : > { %3026 = vrot.lane.b32.xlu0 %v9642_v4, %s6753_s12 }
 0x675   : > { %v2096_v40 = vpop.xlane.xlu0 %2095 }
 0x676   : > { %v2125_v51 = vsub.f32 %v8118_v53, %v2096_v40 }
 0x678   : > { %v2094_v31 = vpop.xlane.xlu1 %2093  ;;  %3030 = vrot.lane.b32.xlu0 %v9643_v49, %s6753_s12  ;;  %v2143_v45 = vmul.f32 1.442695, %v2125_v51 }
 0x679   : > { %v2124_v23 = vsub.f32 %v8122_v44, %v2094_v31  ;;  %v2092_v20 = vpop.xlane.xlu0 %2091 }
 0x67a   : > { %v2123_v21 = vsub.f32 %v8125_v35, %v2092_v20 }
 0x67b   : > { %v2141_v42 = vmul.f32 1.442695, %v2124_v23 }
 0x67c   : > { %v2139_v38 = vmul.f32 1.442695, %v2123_v21 }
 0x67d   : > { %6021 = vpow2.f32 %v2141_v42  ;;  %v2104_v5 = vpop.xlane.xlu1 %2103  ;;  %v2098_v8 = vpop.xlane.xlu0 %2097 }
 0x67e   : > { %6023 = vpow2.f32 %v2139_v38  ;;  %v2126_v4 = vsub.f32 %v8130_v30, %v2098_v8  ;;  %v2129_v63 = vsub.f32 %v8133_v56, %v2104_v5 }
 0x67f   : > { %6025 = vpow2.f32 %v2143_v45 }
 0x680   : > { %v2145_v50 = vmul.f32 1.442695, %v2126_v4  ;;  %v2151_v23 = vmul.f32 1.442695, %v2129_v63  ;;  %v2518_v4 = vsel %vm1463_vm0, %v8080_v11, 0 }
 0x681   : > { %v2100_v49 = vpop.xlane.xlu1 %2099  ;;  %v2102_v58 = vpop.xlane.xlu0 %2101 }
 0x682   : > { %v2127_v31 = vsub.f32 %v8141_v15, %v2100_v49  ;;  %v2128_v40 = vsub.f32 %v8138_v27, %v2102_v58  ;;  %6027 = vpow2.f32 %v2145_v50 }
 0x684   : > { %v2147_v20 = vmul.f32 1.442695, %v2127_v31  ;;  %v2149_v21 = vmul.f32 1.442695, %v2128_v40 }
 0x685   : > { %v2106_v53 = vpop.xlane.xlu1 %2105  ;;  %v2112_v30 = vpop.xlane.xlu0 %2111 }
 0x686   : > { %6029 = vpow2.f32 %v2147_v20  ;;  %v2130_v51 = vsub.f32 %v8146_v0, %v2106_v53  ;;  %v2133_v50 = vsub.f32 %v8149_v36, %v2112_v30 }
 0x687   : > { %v8243_v38 = vpop.eup %6021  ;;  %6031 = vpow2.f32 %v2149_v21 }
 0x688   : > { %v8245_v8 = vpop.eup %6023  ;;  %v2153_v5 = vmul.f32 1.442695, %v2130_v51  ;;  %6033 = vpow2.f32 %v2151_v23  ;;  %v2159_v20 = vmul.f32 1.442695, %v2133_v50 }
 0x689   : > { %v2108_v44 = vpop.xlane.xlu1 %2107  ;;  %v2219_v15 = vpack.c.bf16 %v8243_v38, %v8245_v8  ;;  %v8249_v35 = vpop.eup %6025 }
 0x68a   : > { %6035 = vpow2.f32 %v2153_v5  ;;  %v2131_v56 = vsub.f32 %v8154_v18, %v2108_v44 }
 0x68b   : > { %5495 = vmatprep.mubr.bf16.mxu0 %v2219_v15  ;;  %v2524_v15 = vsel %vm1463_vm0, %v8229_v46, 0 }
 0x68c   : > { %v8252_v27 = vpop.eup %6027  ;;  %v2155_v42 = vmul.f32 1.442695, %v2131_v56 }
 0x68d   : > { %v2114_v0 = vpop.xlane.xlu1 %2113  ;;  %v2220_v63 = vpack.c.bf16 %v8252_v27, %v8249_v35 }
 0x68e   : > { %v2134_v58 = vsub.f32 %v8158_v55, %v2114_v0  ;;  %6037 = vpow2.f32 %v2155_v42 }
 0x68f   : > { %5496 = vmatmul.mubr.bf16.vlgmr.msra.gmra.mrb[48].mxu0 %v2220_v63 }
 0x690   : > { %v8258_v45 = vpop.eup %6029  ;;  %v2161_v18 = vmul.f32 1.442695, %v2134_v58  ;;  %5512 = vmatpush3.bf16.xpose.msra.mxu0 %v2518_v4  ;;  %v2527_v58 = vsel %vm1463_vm0, %v8227_v39, 0 }
 0x691   : > { %v8262_v49 = vpop.eup %6031  ;;  %v2110_v31 = vpop.xlane.xlu1 %2109  ;;  %5704 = vmatprep.subr.msk.bf16.mxu0 %vm1463_vm0, %v8221_v6 }
 0x692   : > { %v2132_v55 = vsub.f32 %v8166_v52, %v2110_v31  ;;  %v2221_v36 = vpack.c.bf16 %v8262_v49, %v8258_v45  ;;  %v8269_v40 = vpop.eup %6033  ;;  %6039 = vpow2.f32 %v2161_v18  ;;  %v2521_v52 = vsel %vm1463_vm0, %v8221_v6, 0 }
 0x694   : > { %v8271_v21 = vpop.eup %6035  ;;  %v2157_v11 = vmul.f32 1.442695, %v2132_v55  ;;  %5499 = vmatprep.mubr.bf16.mxu0 %v2221_v36 }
 0x695   : > { %v2222_v23 = vpack.c.bf16 %v8271_v21, %v8269_v40  ;;  %v2120_v53 = vpop.xlane.xlu1 %2119 }
 0x696   : > { %6041 = vpow2.f32 %v2157_v11 }
 0x697   : > { %6043 = vpow2.f32 %v2159_v20  ;;  %5500 = vmatmul.mubr.bf16.gmra.mrb[52].mxu0 %v2222_v23 }
 0x698   : > { %5514 = vmatpush3.bf16.xpose.msra.mxu0 %v2521_v52  ;;  %v8279_v51 = vpop.eup %6037 }
 0x699   : > { %5705 = vmatprep.subr.msk.bf16.mxu0 %vm1463_vm0, %v8229_v46  ;;  %v2122_v0 = vpop.xlane.xlu1 %2121  ;;  %v2116_v46 = vpop.xlane.xlu0 %2115 }
 0x69a   : > { %v2135_v18 = vsub.f32 %v8161_v2, %v2116_v46  ;;  %v2138_v31 = vsub.f32 %v8174_v1, %v2122_v0 }
 0x69c   : > { %v8281_v5 = vpop.eup %6039  ;;  %v2163_v55 = vmul.f32 1.442695, %v2135_v18  ;;  %v2169_v36 = vmul.f32 1.442695, %v2138_v31 }
 0x69d   : > { %9644 = vst [vmem:[#allocation58_spill] sm:$0xff] %v8281_v5  ;;  %v2486_v63 = vpop.permute.xlu1 %2485  ;;  %v2488_v42 = vpop.permute.xlu0 %2487 }
 0x69e   : > { %v2530_v50 = vsel %vm1463_vm0, %v2486_v63, 0  ;;  %v2533_v4 = vsel %vm1463_vm0, %v2488_v42, 0  ;;  %6045 = vpow2.f32 %v2163_v55 }
 0x69f   : > { %6047 = vpow2.f32 %v2169_v36 }
 0x6a0   : > { %v8283_v44 = vpop.eup %6041  ;;  %5516 = vmatpush3.bf16.xpose.msra.mxu0 %v2524_v15 }
 0x6a1   : > { %v8287_v30 = vpop.eup %6043  ;;  %v2223_v6 = vpack.c.bf16 %v8283_v44, %v8279_v51  ;;  %5706 = vmatprep.subr.msk.bf16.mxu0 %vm1463_vm0, %v8227_v39  ;;  %v2137_v39 = vsub.f32 %v8170_v17, %v2120_v53  ;;  %v2456_v15 = vpop.permute.xlu1 %2455 }
 0x6a2   : > { %v2224_v56 = vpack.c.bf16 %v8281_v5, %v8287_v30 }
 0x6a3   : > { %5503 = vmatprep.mubr.bf16.mxu0 %v2223_v6  ;;  %v2167_v23 = vmul.f32 1.442695, %v2137_v39 }
 0x6a4   : > { %5504 = vmatmul.mubr.bf16.gmra.mrb[56].mxu0 %v2224_v56 }
 0x6a5   : > { %v2460_v17 = vpop.permute.xlu1 %2459 }
 0x6a8   : > { %5518 = vmatpush3.bf16.xpose.msra.mxu0 %v2527_v58  ;;  %v8308_v56 = vpop.eup %6045 }
 0x6a9   : > { %5707 = vmatprep.subr.msk.bf16.mxu0 %vm1463_vm0, %v2486_v63  ;;  %9645 = vst [vmem:[#allocation41_spill] sm:$0xff] %v8308_v56  ;;  %v8311_v0 = vpop.eup %6047  ;;  %v2464_v46 = vpop.permute.xlu1 %2463 }
 0x6aa   : > { %9646 = vst [vmem:[#allocation42_spill] sm:$0xff] %v8311_v0 }
 0x6ad   : > { %v2468_v31 = vpop.permute.xlu1 %2467 }
 0x6b0   : > { %5520 = vmatpush3.bf16.xpose.msra.mxu0 %v2530_v50 }
 0x6b1   : > { %5708 = vmatprep.subr.msk.bf16.mxu0 %vm1463_vm0, %v2488_v42  ;;  %v2793_v55 = vpop.permute.xlu1 %2792 }
 0x6b8   : > { %5522 = vmatpush3.bf16.xpose.msra.mxu0 %v2533_v4 }
 0x6c3   : > { %v2118_v20 = vpop.xlane.xlu0 %2117 }
 0x6c4   : > { %v2136_v11 = vsub.f32 %v8192_v29, %v2118_v20  ;;  %v2797_v20 = vpop.permute.xlu1 %2796 }
 0x6c6   : > { %v2165_v52 = vmul.f32 1.442695, %v2136_v11 }
 0x6c7   : > { %v2490_v6 = vpop.permute.xlu0 %2489 }
 0x6c8   : > { %6049 = vpow2.f32 %v2165_v52  ;;  %5709 = vmatprep.subr.msk.bf16.mxu0 %vm1463_vm0, %v2490_v6  ;;  %v2536_v2 = vsel %vm1463_vm0, %v2490_v6, 0 }
 0x6c9   : > { %6051 = vpow2.f32 %v2167_v23  ;;  %5524 = vmatpush3.bf16.xpose.msra.mxu0 %v2536_v2  ;;  %v2799_v23 = vpop.permute.xlu1 %2798 }
 0x6cb   : > { %v2492_v1 = vpop.permute.xlu0 %2491 }
 0x6cc   : > { %5710 = vmatprep.subr.msk.bf16.mxu0 %vm1463_vm0, %v2492_v1  ;;  %v2539_v29 = vsel %vm1463_vm0, %v2492_v1, 0 }
 0x6cd   : > { %v2801_v52 = vpop.permute.xlu1 %2800 }
 0x6cf   : > { %v2454_v53 = vpop.permute.xlu0 %2453 }
 0x6d1   : > { %5526 = vmatpush3.bf16.xpose.msra.mxu0 %v2539_v29  ;;  %v2805_v6 = vpop.permute.xlu1 %2804 }
 0x6d2   : > { %v8313_v58 = vpop.eup %6049 }
 0x6d3   : > { %9647 = vst [vmem:[#allocation45_spill] sm:$0xff] %v8313_v58  ;;  %v8315_v63 = vpop.eup %6051  ;;  %v2458_v50 = vpop.permute.xlu0 %2457  ;;  %v2225_v42 = vpack.c.bf16 %v8313_v58, %v8308_v56 }
 0x6d4   : > { %9648 = vst [vmem:[#allocation72_spill] sm:$0xff] %v8315_v63  ;;  %v2226_v4 = vpack.c.bf16 %v8311_v0, %v8315_v63 }
 0x6d5   : > { %5507 = vmatprep.mubr.bf16.mxu0 %v2225_v42 }
 0x6d6   : > { %5508 = vmatmul.mubr.bf16.gmra.mrb[60].mxu0 %v2226_v4 }
 0x6d7   : > { %5527 = vmatprep.mubr.msk.bf16.mxu0 %vm1463_vm0, %v2454_v53  ;;  %v2462_v18 = vpop.permute.xlu0 %2461 }
 0x6db   : > { %v2466_v39 = vpop.permute.xlu0 %2465 }
 0x6de   : > { %5528 = vmatmul.mubr.msk.bf16.vlgmr.msra.gmra.mrb[64].mxu0 %vm1463_vm0, %v2456_v15 }
 0x6df   : > { %5531 = vmatprep.mubr.msk.bf16.mxu0 %vm1463_vm0, %v2458_v50  ;;  %v2791_v36 = vpop.permute.xlu0 %2790 }
 0x6e0   : > { %5543 = vmatprep.subr.bf16.mxu1 %v2791_v36 }
 0x6e1   : > { %5544 = vmatpush3.bf16.msra.mxu1 %v2791_v36 }
 0x6e2   : > { %5545 = vmatprep.subr.bf16.mxu1 %v2793_v55 }
 0x6e3   : > { %v2795_v11 = vpop.permute.xlu0 %2794 }
 0x6e5   : > { %5546 = vmatpush3.bf16.msra.mxu1 %v2793_v55 }
 0x6e6   : > { %5532 = vmatmul.mubr.msk.bf16.gmra.mrb[68].mxu0 %vm1463_vm0, %v2460_v17  ;;  %5547 = vmatprep.subr.bf16.mxu1 %v2795_v11 }
 0x6e7   : > { %5535 = vmatprep.mubr.msk.bf16.mxu0 %vm1463_vm0, %v2462_v18  ;;  %v2803_v15 = vpop.permute.xlu0 %2802 }
 0x6e9   : > { %5548 = vmatpush3.bf16.msra.mxu1 %v2795_v11 }
 0x6ea   : > { %5549 = vmatprep.subr.bf16.mxu1 %v2797_v20 }
 0x6eb   : > { %v8329_v2 = vpop.permute.xlu0 %3024 }
 0x6ed   : > { %5550 = vmatpush3.bf16.msra.mxu1 %v2797_v20 }
 0x6ee   : > { %5536 = vmatmul.mubr.msk.bf16.gmra.mrb[72].mxu0 %vm1463_vm0, %v2464_v46  ;;  %5551 = vmatprep.subr.bf16.mxu1 %v2799_v23 }
 0x6ef   : > { %5539 = vmatprep.mubr.msk.bf16.mxu0 %vm1463_vm0, %v2466_v39 }
 0x6f1   : > { %5552 = vmatpush3.bf16.msra.mxu1 %v2799_v23 }
 0x6f2   : > { %5553 = vmatprep.subr.bf16.mxu1 %v2801_v52 }
 0x6f5   : > { %5554 = vmatpush3.bf16.msra.mxu1 %v2801_v52 }
 0x6f6   : > { %5540 = vmatmul.mubr.msk.bf16.gmra.mrb[76].mxu0 %vm1463_vm0, %v2468_v31  ;;  %5555 = vmatprep.subr.bf16.mxu1 %v2803_v15 }
 0x6f9   : > { %5556 = vmatpush3.bf16.msra.mxu1 %v2803_v15 }
 0x6fa   : > { %5557 = vmatprep.subr.bf16.mxu1 %v2805_v6 }
 0x6fd   : > { %5558 = vmatpush3.bf16.msra.mxu1 %v2805_v6 }
 0x6fe   : > { %5711 = vmatprep.subr.msk.bf16.mxu1 %vm1463_vm0, %v8329_v2 }
 0x762   : > { %v8333_v1 = vpop.f32.mrb[48].mxu0 }
 0x763   : > { %v8335_v17 = vpop.f32.mrb[49].mxu0 }
 0x764   : > { %v8337_v53 = vpop.f32.mrb[50].mxu0 }
 0x765   : > { %v8339_v29 = vpop.f32.mrb[51].mxu0 }
 0x76a   : > { %v8341_v46 = vpop.f32.mrb[52].mxu0 }
 0x76b   : > { %9649 = vst [vmem:[#allocation73_spill] sm:$0xff] %v8341_v46  ;;  %v8343_v50 = vpop.f32.mrb[53].mxu0 }
 0x76c   : > { %9650 = vst [vmem:[#allocation74_spill] sm:$0xff] %v8343_v50  ;;  %v8345_v42 = vpop.f32.mrb[54].mxu0 }
 0x76d   : > { %9651 = vst [vmem:[#allocation75_spill] sm:$0xff] %v8345_v42  ;;  %v8347_v4 = vpop.f32.mrb[55].mxu0 }
 0x76e   : > { %9652 = vst [vmem:[#allocation76_spill] sm:$0xff] %v8347_v4 }
 0x777   : > { %v8349_v18 = vpop.f32.mrb[56].mxu0 }
 0x778   : > { %9653 = vst [vmem:[#allocation77_spill] sm:$0xff] %v8349_v18  ;;  %v8351_v31 = vpop.f32.mrb[57].mxu0 }
 0x779   : > { %9654 = vst [vmem:[#allocation78_spill] sm:$0xff] %v8351_v31  ;;  %v8353_v39 = vpop.f32.mrb[58].mxu0 }
 0x77a   : > { %9655 = vst [vmem:[#allocation79_spill] sm:$0xff] %v8353_v39  ;;  %v8355_v55 = vpop.f32.mrb[59].mxu0 }
 0x77b   : > { %9656 = vst [vmem:[#allocation80_spill] sm:$0xff] %v8355_v55 }
 0x7a9   : > { %v8357_v36 = vpop.f32.mrb[60].mxu0 }
 0x7aa   : > { %9657 = vst [vmem:[#allocation81_spill] sm:$0xff] %v8357_v36  ;;  %v8359_v20 = vpop.f32.mrb[61].mxu0 }
 0x7ab   : > { %9658 = vst [vmem:[#allocation82_spill] sm:$0xff] %v8359_v20  ;;  %v8361_v11 = vpop.f32.mrb[62].mxu0 }
 0x7ac   : > { %9659 = vst [vmem:[#allocation83_spill] sm:$0xff] %v8361_v11  ;;  %v8363_v23 = vpop.f32.mrb[63].mxu0 }
 0x7ad   : > { %9660 = vst [vmem:[#allocation84_spill] sm:$0xff] %v8363_v23 }
 0x7b1   : > { %v5529_v52 = vpop.f32.mrb[64].mxu0 }
 0x7b2   : > { %v8366_v15 = vadd.f32 %v5529_v52, %v7803_v37  ;;  %v2575_v6 = vpop.f32.mrb[65].mxu0 }
 0x7b3   : > { %v5530_v18 = vpop.f32.mrb[66].mxu0  ;;  %v8373_v36 = vadd.f32 %v2575_v6, %v7816_v54 }
 0x7b4   : > { %2642 = vmax.xlane.f32.xlu0 %v8366_v15  ;;  %v2578_v42 = vpop.f32.mrb[67].mxu0  ;;  %v8378_v23 = vadd.f32 %v5530_v18, %v7827_v47 }
 0x7b5   : > { %v8370_v39 = vadd.f32 %v2578_v42, %v7813_v22 }
 0x7b7   : > { %2640 = vmax.xlane.f32.xlu1 %v8370_v39 }
 0x7b8   : > { %2638 = vmax.xlane.f32.xlu0 %v8373_v36 }
 0x7b9   : > { %v5533_v11 = vpop.f32.mrb[68].mxu0 }
 0x7ba   : > { %v8381_v52 = vadd.f32 %v5533_v11, %v7857_v33  ;;  %v2591_v20 = vpop.f32.mrb[69].mxu0 }
 0x7bb   : > { %v5534_v55 = vpop.f32.mrb[70].mxu0  ;;  %v8389_v46 = vadd.f32 %v2591_v20, %v7844_v59 }
 0x7bc   : > { %2644 = vmax.xlane.f32.xlu0 %v8378_v23  ;;  %2650 = vmax.xlane.f32.xlu1 %v8381_v52  ;;  %v2594_v42 = vpop.f32.mrb[71].mxu0  ;;  %v8394_v11 = vadd.f32 %v5534_v55, %v7854_v12 }
 0x7bd   : > { %v8386_v6 = vadd.f32 %v2594_v42, %v7871_v62 }
 0x7c0   : > { %2648 = vmax.xlane.f32.xlu0 %v8386_v6  ;;  %2646 = vmax.xlane.f32.xlu1 %v8389_v46 }
 0x7c1   : > { %v5537_v18 = vpop.f32.mrb[72].mxu0 }
 0x7c2   : > { %v8397_v31 = vadd.f32 %v5537_v18, %v7886_v26  ;;  %v2607_v4 = vpop.f32.mrb[73].mxu0 }
 0x7c3   : > { %v5538_v50 = vpop.f32.mrb[74].mxu0  ;;  %v8402_v20 = vadd.f32 %v2607_v4, %v7875_v9 }
 0x7c4   : > { %2652 = vmax.xlane.f32.xlu1 %v8394_v11  ;;  %2658 = vmax.xlane.f32.xlu0 %v8397_v31  ;;  %v2610_v42 = vpop.f32.mrb[75].mxu0  ;;  %v8406_v58 = vadd.f32 %v5538_v50, %v7903_v16 }
 0x7c5   : > { %v8414_v5 = vadd.f32 %v2610_v42, %v7893_v57 }
 0x7c8   : > { %2654 = vmax.xlane.f32.xlu1 %v8402_v20 }
 0x7c9   : > { %v5541_v0 = vpop.f32.mrb[76].mxu0 }
 0x7ca   : > { %v2623_v55 = vpop.f32.mrb[77].mxu0  ;;  %v8418_v4 = vadd.f32 %v5541_v0, %v7909_v14 }
 0x7cb   : > { %v8409_v18 = vadd.f32 %v2623_v55, %v7922_v25  ;;  %v5542_v63 = vpop.f32.mrb[78].mxu0 }
 0x7cc   : > { %2660 = vmax.xlane.f32.xlu1 %v8406_v58  ;;  %v2626_v56 = vpop.f32.mrb[79].mxu0  ;;  %v8422_v50 = vadd.f32 %v5542_v63, %v7932_v10 }
 0x7cd   : > { %2662 = vmax.xlane.f32.xlu0 %v8409_v18 }
 0x7d0   : > { %2656 = vmax.xlane.f32.xlu1 %v8414_v5 }
 0x7d4   : > { %2666 = vmax.xlane.f32.xlu1 %v8418_v4 }
 0x7d8   : > { %2668 = vmax.xlane.f32.xlu1 %v8422_v50 }
 0x7e3   : > { %3034 = vrot.lane.b32.xlu0 %v9591_v19, %s6753_s12  ;;  %v8440_v19 = vadd.f32 %v2626_v56, %v7940_v3 }
 0x7e9   : > { %3032 = vrot.lane.b32.xlu1 %v9588_v61, %s6753_s12  ;;  %v9666_v61 = vld [vmem:[#allocation32_spill] sm:$0xff] }
 0x7ed   : > { %3002 = vrot.lane.b32.xlu1 %v7715_v60, %s6753_s12  ;;  %v9661_v60 = vld [vmem:[#allocation44_spill] sm:$0xff] }
 0x7f1   : > { %3006 = vrot.lane.b32.xlu1 %v7739_v13, %s6753_s12  ;;  %v9662_v13 = vld [vmem:[#allocation46_spill] sm:$0xff] }
 0x7f5   : > { %3010 = vrot.lane.b32.xlu1 %v7763_v32, %s6753_s12  ;;  %v9663_v32 = vld [vmem:[#allocation28_spill] sm:$0xff] }
 0x7f9   : > { %3014 = vrot.lane.b32.xlu1 %v7787_v34, %s6753_s12  ;;  %v9665_v34 = vld [vmem:[#allocation29_spill] sm:$0xff] }
 0x7fd   : > { %3339 = vrot.lane.b32.xlu1 %v9593_v24, %s6753_s12  ;;  %v8471_v24 = vpop.permute.xlu1 %3028 }
 0x801   : > { %3347 = vrot.lane.b32.xlu1 %v9599_v7, %s6753_s12  ;;  %v9667_v7 = vld [vmem:[#allocation34_spill] sm:$0xff] }
 0x802   : > { %2664 = vmax.xlane.f32.xlu0 %v8440_v19 }
 0x818   : > { %3036 = vrot.lane.b32.xlu0 %v9590_v48, %s6753_s12 }
 0x81c   : > { %3038 = vrot.lane.b32.xlu0 %v7697_v43, %s6753_s12  ;;  %v9664_v43 = vld [vmem:[#allocation30_spill] sm:$0xff] }
 0x820   : > { %3000 = vrot.lane.b32.xlu0 %v7710_v28, %s6753_s12  ;;  %v8463_v28 = vpop.permute.xlu0 %3026 }
 0x824   : > { %3004 = vrot.lane.b32.xlu0 %v9635_v41, %s6753_s12  ;;  %v8469_v48 = vpop.permute.xlu0 %3030 }
 0x825   : > { %2173 = vadd.xlane.f32.xlu1 %v8243_v38 }
 0x828   : > { %3008 = vrot.lane.b32.xlu0 %v9661_v60, %s6753_s12 }
 0x829   : > { %2177 = vadd.xlane.f32.xlu1 %v8252_v27  ;;  %v9668_v27 = vld [vmem:[#allocation33_spill] sm:$0xff] }
 0x82c   : > { %3012 = vrot.lane.b32.xlu0 %v9662_v13, %s6753_s12 }
 0x830   : > { %3337 = vrot.lane.b32.xlu0 %v9663_v32, %s6753_s12 }
 0x834   : > { %3341 = vrot.lane.b32.xlu0 %v9664_v43, %s6753_s12 }
 0x838   : > { %3343 = vrot.lane.b32.xlu0 %v9665_v34, %s6753_s12 }
 0x83c   : > { %3345 = vrot.lane.b32.xlu0 %v9666_v61, %s6753_s12 }
 0x840   : > { %3349 = vrot.lane.b32.xlu0 %v9667_v7, %s6753_s12 }
 0x841   : > { %v2643_v41 = vpop.xlane.xlu0 %2642 }
 0x842   : > { %v2672_v63 = vsub.f32 %v8366_v15, %v2643_v41 }
 0x844   : > { %v2641_v38 = vpop.xlane.xlu1 %2640  ;;  %3351 = vrot.lane.b32.xlu0 %v9668_v27, %s6753_s12  ;;  %v2690_v43 = vmul.f32 1.442695, %v2672_v63 }
 0x845   : > { %v2671_v56 = vsub.f32 %v8370_v39, %v2641_v38  ;;  %v2639_v0 = vpop.xlane.xlu0 %2638 }
 0x846   : > { %v2670_v42 = vsub.f32 %v8373_v36, %v2639_v0 }
 0x847   : > { %v2688_v55 = vmul.f32 1.442695, %v2671_v56 }
 0x848   : > { %v2686_v60 = vmul.f32 1.442695, %v2670_v42 }
 0x849   : > { %6053 = vpow2.f32 %v2688_v55  ;;  %v2651_v13 = vpop.xlane.xlu1 %2650  ;;  %v2645_v32 = vpop.xlane.xlu0 %2644 }
 0x84a   : > { %6055 = vpow2.f32 %v2686_v60  ;;  %v2673_v34 = vsub.f32 %v8378_v23, %v2645_v32  ;;  %v2676_v7 = vsub.f32 %v8381_v52, %v2651_v13 }
 0x84b   : > { %6057 = vpow2.f32 %v2690_v43 }
 0x84c   : > { %v2692_v61 = vmul.f32 1.442695, %v2673_v34  ;;  %v2698_v38 = vmul.f32 1.442695, %v2676_v7  ;;  %v3065_v7 = vsel %vm1463_vm0, %v8329_v2, 0 }
 0x84d   : > { %v2647_v27 = vpop.xlane.xlu1 %2646  ;;  %v2649_v3 = vpop.xlane.xlu0 %2648 }
 0x84e   : > { %v2674_v39 = vsub.f32 %v8389_v46, %v2647_v27  ;;  %v2675_v15 = vsub.f32 %v8386_v6, %v2649_v3  ;;  %6059 = vpow2.f32 %v2692_v61 }
 0x850   : > { %v2694_v36 = vmul.f32 1.442695, %v2674_v39  ;;  %v2696_v41 = vmul.f32 1.442695, %v2675_v15 }
 0x851   : > { %v2653_v56 = vpop.xlane.xlu1 %2652  ;;  %v2659_v60 = vpop.xlane.xlu0 %2658 }
 0x852   : > { %6061 = vpow2.f32 %v2694_v36  ;;  %v2677_v0 = vsub.f32 %v8394_v11, %v2653_v56  ;;  %v2680_v11 = vsub.f32 %v8397_v31, %v2659_v60 }
 0x853   : > { %v6054_v63 = vpop.eup %6053  ;;  %6063 = vpow2.f32 %v2696_v41 }
 0x854   : > { %v6056_v23 = vpop.eup %6055  ;;  %v2700_v42 = vmul.f32 1.442695, %v2677_v0  ;;  %6065 = vpow2.f32 %v2698_v38  ;;  %v2706_v36 = vmul.f32 1.442695, %v2680_v11 }
 0x855   : > { %v2655_v52 = vpop.xlane.xlu1 %2654  ;;  %v2766_v55 = vpack.c.bf16 %v6054_v63, %v6056_v23  ;;  %v6058_v46 = vpop.eup %6057 }
 0x856   : > { %6067 = vpow2.f32 %v2700_v42  ;;  %v2678_v3 = vsub.f32 %v8402_v20, %v2655_v52 }
 0x857   : > { %5559 = vmatprep.mubr.bf16.mxu1 %v2766_v55 }
 0x858   : > { %v6060_v6 = vpop.eup %6059  ;;  %v2702_v61 = vmul.f32 1.442695, %v2678_v3 }
 0x859   : > { %v2661_v13 = vpop.xlane.xlu1 %2660  ;;  %2724 = vadd.xlane.f32.xlu1 %v6060_v6  ;;  %v2767_v43 = vpack.c.bf16 %v6060_v6, %v6058_v46 }
 0x85a   : > { %v2681_v32 = vsub.f32 %v8406_v58, %v2661_v13  ;;  %6069 = vpow2.f32 %v2702_v61  ;;  %v2663_v60 = vpop.xlane.xlu0 %2662 }
 0x85b   : > { %5560 = vmatmul.mubr.bf16.vlgmr.msra.gmra.mrb[48].mxu1 %v2767_v43 }
 0x85c   : > { %v8488_v34 = vpop.eup %6061  ;;  %v2708_v39 = vmul.f32 1.442695, %v2681_v32  ;;  %5576 = vmatpush3.bf16.xpose.msra.mxu1 %v3065_v7 }
 0x85d   : > { %v8492_v27 = vpop.eup %6063  ;;  %v2657_v20 = vpop.xlane.xlu1 %2656  ;;  %5712 = vmatprep.subr.msk.bf16.mxu1 %vm1463_vm0, %v8463_v28  ;;  %2720 = vadd.xlane.f32.xlu1 %v6054_v63 }
 0x85e   : > { %v2679_v58 = vsub.f32 %v8414_v5, %v2657_v20  ;;  %v2768_v31 = vpack.c.bf16 %v8492_v27, %v8488_v34  ;;  %v8499_v15 = vpop.eup %6065  ;;  %6071 = vpow2.f32 %v2708_v39  ;;  %v3068_v5 = vsel %vm1463_vm0, %v8463_v28, 0  ;;  %v3035_v6 = vpop.permute.xlu0 %3034 }
 0x85f   : > { %v3080_v13 = vsel %vm1463_vm0, %v3035_v6, 0 }
 0x860   : > { %v8501_v41 = vpop.eup %6067  ;;  %v2704_v2 = vmul.f32 1.442695, %v2679_v58  ;;  %5563 = vmatprep.mubr.bf16.mxu1 %v2768_v31 }
 0x861   : > { %v2769_v38 = vpack.c.bf16 %v8501_v41, %v8499_v15  ;;  %v2667_v56 = vpop.xlane.xlu1 %2666 }
 0x862   : > { %6073 = vpow2.f32 %v2704_v2 }
 0x863   : > { %6075 = vpow2.f32 %v2706_v36  ;;  %2171 = vadd.xlane.f32.xlu0 %v8245_v8  ;;  %5564 = vmatmul.mubr.bf16.gmra.mrb[52].mxu1 %v2769_v38  ;;  %v3071_v8 = vsel %vm1463_vm0, %v8471_v24, 0 }
 0x864   : > { %5578 = vmatpush3.bf16.xpose.msra.mxu1 %v3068_v5  ;;  %v8511_v0 = vpop.eup %6069 }
 0x865   : > { %5713 = vmatprep.subr.msk.bf16.mxu1 %vm1463_vm0, %v8471_v24  ;;  %v2669_v55 = vpop.xlane.xlu1 %2668 }
 0x867   : > { %2175 = vadd.xlane.f32.xlu0 %v8249_v35 }
 0x868   : > { %v8513_v63 = vpop.eup %6071 }
 0x869   : > { %v3033_v24 = vpop.permute.xlu1 %3032 }
 0x86a   : > { %v3077_v3 = vsel %vm1463_vm0, %v3033_v24, 0 }
 0x86b   : > { %2179 = vadd.xlane.f32.xlu0 %v8258_v45  ;;  %v3074_v45 = vsel %vm1463_vm0, %v8469_v48, 0 }
 0x86c   : > { %v8516_v42 = vpop.eup %6073  ;;  %5580 = vmatpush3.bf16.xpose.msra.mxu1 %v3071_v8 }
 0x86d   : > { %v8520_v52 = vpop.eup %6075  ;;  %v2770_v28 = vpack.c.bf16 %v8516_v42, %v8511_v0  ;;  %5714 = vmatprep.subr.msk.bf16.mxu1 %vm1463_vm0, %v8469_v48  ;;  %v2684_v48 = vsub.f32 %v8418_v4, %v2667_v56 }
 0x86e   : > { %v2771_v35 = vpack.c.bf16 %v8513_v63, %v8520_v52 }
 0x86f   : > { %2722 = vadd.xlane.f32.xlu0 %v6058_v46  ;;  %5567 = vmatprep.mubr.bf16.mxu1 %v2770_v28  ;;  %v2682_v46 = vsub.f32 %v8409_v18, %v2663_v60  ;;  %v2714_v7 = vmul.f32 1.442695, %v2684_v48  ;;  %v3003_v18 = vpop.permute.xlu1 %3002 }
 0x870   : > { %5568 = vmatmul.mubr.bf16.gmra.mrb[56].mxu1 %v2771_v35 }
 0x871   : > { %v2710_v32 = vmul.f32 1.442695, %v2682_v46 }
 0x873   : > { %2718 = vadd.xlane.f32.xlu0 %v6056_v23  ;;  %v2685_v23 = vsub.f32 %v8422_v50, %v2669_v55  ;;  %6077 = vpow2.f32 %v2710_v32  ;;  %v3007_v4 = vpop.permute.xlu1 %3006  ;;  %v9669_v32 = vmov 0  }
 0x874   : > { %5582 = vmatpush3.bf16.xpose.msra.mxu1 %v3074_v45 }
 0x875   : > { %5715 = vmatprep.subr.msk.bf16.mxu1 %vm1463_vm0, %v3033_v24  ;;  %v2716_v43 = vmul.f32 1.442695, %v2685_v23 }
 0x877   : > { %6079 = vpow2.f32 %v2716_v43  ;;  %v3011_v35 = vpop.permute.xlu1 %3010 }
 0x87b   : > { %v3015_v45 = vpop.permute.xlu1 %3014 }
 0x87c   : > { %5584 = vmatpush3.bf16.xpose.msra.mxu1 %v3077_v3 }
 0x87d   : > { %5716 = vmatprep.subr.msk.bf16.mxu1 %vm1463_vm0, %v3035_v6  ;;  %v8541_v36 = vpop.eup %6077 }
 0x87f   : > { %v3340_v3 = vpop.permute.xlu1 %3339 }
 0x881   : > { %v8544_v2 = vpop.eup %6079 }
 0x883   : > { %v3348_v23 = vpop.permute.xlu1 %3347 }
 0x884   : > { %5586 = vmatpush3.bf16.xpose.msra.mxu1 %v3080_v13 }
 0x88f   : > { %v2665_v11 = vpop.xlane.xlu0 %2664 }
 0x890   : > { %v2683_v61 = vsub.f32 %v8440_v19, %v2665_v11 }
 0x892   : > { %v2712_v39 = vmul.f32 1.442695, %v2683_v61 }
 0x893   : > { %v3037_v20 = vpop.permute.xlu0 %3036 }
 0x894   : > { %6081 = vpow2.f32 %v2712_v39  ;;  %5717 = vmatprep.subr.msk.bf16.mxu1 %vm1463_vm0, %v3037_v20  ;;  %v3083_v58 = vsel %vm1463_vm0, %v3037_v20, 0 }
 0x895   : > { %6083 = vpow2.f32 %v2714_v7  ;;  %5588 = vmatpush3.bf16.xpose.msra.mxu1 %v3083_v58 }
 0x897   : > { %v3039_v50 = vpop.permute.xlu0 %3038 }
 0x898   : > { %5718 = vmatprep.subr.msk.bf16.mxu1 %vm1463_vm0, %v3039_v50  ;;  %v3086_v19 = vsel %vm1463_vm0, %v3039_v50, 0 }
 0x89b   : > { %v3001_v31 = vpop.permute.xlu0 %3000 }
 0x89d   : > { %5590 = vmatpush3.bf16.xpose.msra.mxu1 %v3086_v19 }
 0x89e   : > { %v8546_v38 = vpop.eup %6081 }
 0x89f   : > { %v8548_v5 = vpop.eup %6083  ;;  %v3005_v56 = vpop.permute.xlu0 %3004  ;;  %v2772_v8 = vpack.c.bf16 %v8546_v38, %v8541_v36 }
 0x8a0   : > { %v2773_v28 = vpack.c.bf16 %v8544_v2, %v8548_v5 }
 0x8a1   : > { %5571 = vmatprep.mubr.bf16.mxu1 %v2772_v8 }
 0x8a2   : > { %5572 = vmatmul.mubr.bf16.gmra.mrb[60].mxu1 %v2773_v28 }
 0x8a3   : > { %5591 = vmatprep.mubr.msk.bf16.mxu1 %vm1463_vm0, %v3001_v31  ;;  %v3009_v55 = vpop.permute.xlu0 %3008 }
 0x8a7   : > { %v3013_v24 = vpop.permute.xlu0 %3012 }
 0x8aa   : > { %5592 = vmatmul.mubr.msk.bf16.vlgmr.msra.gmra.mrb[64].mxu1 %vm1463_vm0, %v3003_v18 }
 0x8ab   : > { %5595 = vmatprep.mubr.msk.bf16.mxu1 %vm1463_vm0, %v3005_v56  ;;  %v3338_v60 = vpop.permute.xlu0 %3337 }
 0x8ac   : > { %5607 = vmatprep.subr.bf16.mxu0 %v3338_v60 }
 0x8ad   : > { %5608 = vmatpush3.bf16.msra.mxu0 %v3338_v60 }
 0x8ae   : > { %5609 = vmatprep.subr.bf16.mxu0 %v3340_v3 }
 0x8af   : > { %v3342_v6 = vpop.permute.xlu0 %3341 }
 0x8b1   : > { %5610 = vmatpush3.bf16.msra.mxu0 %v3340_v3 }
 0x8b2   : > { %5596 = vmatmul.mubr.msk.bf16.gmra.mrb[68].mxu1 %vm1463_vm0, %v3007_v4  ;;  %5611 = vmatprep.subr.bf16.mxu0 %v3342_v6  ;;  %v2174_v11 = vpop.xlane.xlu1 %2173 }
 0x8b3   : > { %5599 = vmatprep.mubr.msk.bf16.mxu1 %vm1463_vm0, %v3009_v55  ;;  %v3344_v13 = vpop.permute.xlu0 %3343  ;;  %6085 = vrcp.f32 %v2174_v11 }
 0x8b5   : > { %5612 = vmatpush3.bf16.msra.mxu0 %v3342_v6 }
 0x8b6   : > { %5613 = vmatprep.subr.bf16.mxu0 %v3344_v13  ;;  %v2178_v61 = vpop.xlane.xlu1 %2177 }
 0x8b7   : > { %v3346_v46 = vpop.permute.xlu0 %3345 }
 0x8b9   : > { %5614 = vmatpush3.bf16.msra.mxu0 %v3344_v13 }
 0x8ba   : > { %5600 = vmatmul.mubr.msk.bf16.gmra.mrb[72].mxu1 %vm1463_vm0, %v3011_v35  ;;  %5615 = vmatprep.subr.bf16.mxu0 %v3346_v46 }
 0x8bb   : > { %5603 = vmatprep.mubr.msk.bf16.mxu1 %vm1463_vm0, %v3013_v24  ;;  %v3350_v48 = vpop.permute.xlu0 %3349 }
 0x8bd   : > { %5616 = vmatpush3.bf16.msra.mxu0 %v3346_v46  ;;  %v6086_v20 = vpop.eup %6085 }
 0x8be   : > { %5617 = vmatprep.subr.bf16.mxu0 %v3348_v23  ;;  %v8567_v50 = vmul.f32 %v6086_v20, %v8339_v29 }
 0x8bf   : > { %v3352_v43 = vpop.permute.xlu0 %3351 }
 0x8c1   : > { %5618 = vmatpush3.bf16.msra.mxu0 %v3348_v23 }
 0x8c2   : > { %5604 = vmatmul.mubr.msk.bf16.gmra.mrb[76].mxu1 %vm1463_vm0, %v3015_v45  ;;  %5619 = vmatprep.subr.bf16.mxu0 %v3350_v48 }
 0x8c3   : > { %4074 = vmatprep.mubr.bf16.mxu1 %v9669_v32 }
 0x8c5   : > { %5620 = vmatpush3.bf16.msra.mxu0 %v3350_v48 }
 0x8c6   : > { %5621 = vmatprep.subr.bf16.mxu0 %v3352_v43 }
 0x8c9   : > { %5622 = vmatpush3.bf16.msra.mxu0 %v3352_v43 }
 0x8f0   : > { %v2172_v7 = vpop.xlane.xlu0 %2171 }
 0x8f1   : > { %6087 = vrcp.f32 %v2172_v7 }
 0x8f2   : > { %6089 = vrcp.f32 %v2178_v61 }
 0x8f4   : > { %v2176_v39 = vpop.xlane.xlu0 %2175 }
 0x8f5   : > { %6091 = vrcp.f32 %v2176_v39 }
 0x8f8   : > { %v8579_v35 = vpop.xlane.xlu0 %2179 }
 0x8fb   : > { %v6088_v58 = vpop.eup %6087 }
 0x8fc   : > { %v8564_v18 = vmul.f32 %v6088_v58, %v8335_v17  ;;  %v6090_v4 = vpop.eup %6089  ;;  %v2725_v17 = vpop.xlane.xlu1 %2724 }
 0x8fd   : > { %v8575_v8 = vmul.f32 %v6090_v4, %v8337_v53  ;;  %v2723_v55 = vpop.xlane.xlu0 %2722  ;;  %6093 = vrcp.f32 %v2725_v17 }
 0x8ff   : > { %v6092_v19 = vpop.eup %6091 }
 0x900   : > { %v8572_v56 = vmul.f32 %v6092_v19, %v8333_v1  ;;  %v2721_v29 = vpop.xlane.xlu1 %2720 }
 0x901   : > { %v2719_v45 = vpop.xlane.xlu0 %2718  ;;  %6095 = vrcp.f32 %v2721_v29 }
 0x902   : > { %6097 = vrcp.f32 %v2723_v55 }
 0x903   : > { %6099 = vrcp.f32 %v2719_v45 }
 0x904   : > { %6101 = vrcp.f32 %v8579_v35 }
 0x907   : > { %v6094_v24 = vpop.eup %6093 }
 0x90b   : > { %v6096_v1 = vpop.eup %6095 }
 0x90c   : > { %v6098_v6 = vpop.eup %6097 }
 0x90d   : > { %v6100_v13 = vpop.eup %6099 }
 0x92e   : > { %v5561_v60 = vpop.f32.mrb[48].mxu1 }
 0x92f   : > { %v2848_v3 = vpop.f32.mrb[49].mxu1  ;;  %v8581_v46 = vmul.f32 %v6098_v6, %v5561_v60 }
 0x930   : > { %v5562_v53 = vpop.f32.mrb[50].mxu1  ;;  %v8585_v43 = vmul.f32 %v6100_v13, %v2848_v3 }
 0x931   : > { %v8583_v23 = vmul.f32 %v6094_v24, %v5562_v53  ;;  %v2851_v48 = vpop.f32.mrb[51].mxu1 }
 0x932   : > { %v8587_v11 = vmul.f32 %v6096_v1, %v2851_v48 }
 0x933   : > { %v9690_v35 = vpack.c.bf16 %v8583_v23, %v8581_v46 }
 0x936   : > { %v8593_v39 = vpop.f32.mrb[52].mxu1 }
 0x937   : > { %v8595_v20 = vpop.f32.mrb[53].mxu1 }
 0x938   : > { %v8597_v58 = vpop.f32.mrb[54].mxu1 }
 0x939   : > { %v8599_v4 = vpop.f32.mrb[55].mxu1 }
 0x943   : > { %v8601_v19 = vpop.f32.mrb[56].mxu1 }
 0x944   : > { %v8603_v17 = vpop.f32.mrb[57].mxu1 }
 0x945   : > { %v8605_v55 = vpop.f32.mrb[58].mxu1 }
 0x946   : > { %v8607_v29 = vpop.f32.mrb[59].mxu1 }
 0x975   : > { %v8609_v45 = vpop.f32.mrb[60].mxu1 }
 0x976   : > { %v8611_v24 = vpop.f32.mrb[61].mxu1 }
 0x977   : > { %v8613_v60 = vpop.f32.mrb[62].mxu1 }
 0x978   : > { %v8615_v1 = vpop.f32.mrb[63].mxu1 }
 0x97d   : > { %v5593_v3 = vpop.f32.mrb[64].mxu1 }
 0x97e   : > { %v8618_v6 = vadd.f32 %v5593_v3, %v7803_v37  ;;  %v3122_v53 = vpop.f32.mrb[65].mxu1 }
 0x97f   : > { %v8621_v13 = vadd.f32 %v3122_v53, %v7816_v54  ;;  %v5594_v48 = vpop.f32.mrb[66].mxu1 }
 0x980   : > { %3189 = vmax.xlane.f32.xlu1 %v8618_v6  ;;  %v3125_v61 = vpop.f32.mrb[67].mxu1  ;;  %v8626_v7 = vadd.f32 %v5594_v48, %v7827_v47 }
 0x981   : > { %3185 = vmax.xlane.f32.xlu0 %v8621_v13  ;;  %v8631_v37 = vadd.f32 %v3125_v61, %v7813_v22 }
 0x984   : > { %3191 = vmax.xlane.f32.xlu1 %v8626_v7 }
 0x985   : > { %2183 = vadd.xlane.f32.xlu0 %v8269_v40  ;;  %v5597_v28 = vpop.f32.mrb[68].mxu1 }
 0x986   : > { %v3138_v3 = vpop.f32.mrb[69].mxu1  ;;  %v8641_v40 = vadd.f32 %v5597_v28, %v7857_v33 }
 0x987   : > { %v8634_v54 = vadd.f32 %v3138_v3, %v7844_v59  ;;  %v5598_v53 = vpop.f32.mrb[70].mxu1 }
 0x988   : > { %3187 = vmax.xlane.f32.xlu1 %v8631_v37  ;;  %v3141_v31 = vpop.f32.mrb[71].mxu1  ;;  %v8646_v48 = vadd.f32 %v5598_v53, %v7854_v12 }
 0x989   : > { %3193 = vmax.xlane.f32.xlu0 %v8634_v54 }
 0x98c   : > { %2181 = vadd.xlane.f32.xlu1 %v8262_v49 }
 0x98d   : > { %2726 = vadd.xlane.f32.xlu0 %v8488_v34  ;;  %v5601_v47 = vpop.f32.mrb[72].mxu1  ;;  %v8651_v34 = vadd.f32 %v3141_v31, %v7871_v62 }
 0x98e   : > { %v3154_v22 = vpop.f32.mrb[73].mxu1  ;;  %v8654_v28 = vadd.f32 %v5601_v47, %v7886_v26 }
 0x98f   : > { %v5602_v61 = vpop.f32.mrb[74].mxu1  ;;  %v8659_v12 = vadd.f32 %v3154_v22, %v7875_v9 }
 0x990   : > { %3197 = vmax.xlane.f32.xlu1 %v8641_v40  ;;  %v3157_v59 = vpop.f32.mrb[75].mxu1  ;;  %v8664_v62 = vadd.f32 %v5602_v61, %v7903_v16 }
 0x991   : > { %2730 = vadd.xlane.f32.xlu0 %v8499_v15  ;;  %v8671_v26 = vadd.f32 %v3157_v59, %v7893_v57  ;;  %v9677_v15 = vld [vmem:[#allocation48_spill] sm:$0xff] }
 0x994   : > { %3199 = vmax.xlane.f32.xlu1 %v8646_v48 }
 0x995   : > { %2187 = vadd.xlane.f32.xlu0 %v8279_v51  ;;  %v5605_v49 = vpop.f32.mrb[76].mxu1 }
 0x996   : > { %v3170_v33 = vpop.f32.mrb[77].mxu1  ;;  %v8676_v9 = vadd.f32 %v5605_v49, %v7909_v14  ;;  %v9671_v14 = vld [vmem:[#allocation35_spill] sm:$0xff] }
 0x997   : > { %v5606_v3 = vpop.f32.mrb[78].mxu1  ;;  %v8681_v16 = vadd.f32 %v3170_v33, %v7922_v25  ;;  %v9673_v25 = vld [vmem:[#allocation72_spill] sm:$0xff] }
 0x998   : > { %3195 = vmax.xlane.f32.xlu1 %v8651_v34  ;;  %v3173_v32 = vpop.f32.mrb[79].mxu1  ;;  %v8686_v57 = vadd.f32 %v5606_v3, %v7932_v10  ;;  %v9674_v10 = vld [vmem:[#allocation45_spill] sm:$0xff] }
 0x999   : > { %3205 = vmax.xlane.f32.xlu0 %v8654_v28  ;;  %v8691_v51 = vadd.f32 %v3173_v32, %v9671_v14  ;;  %v9687_v32 = vld [vmem:[#allocation54_spill] sm:$0xff] }
 0x99c   : > { %2185 = vadd.xlane.f32.xlu1 %v8271_v21  ;;  %v9670_v21 = vld [vmem:[#allocation58_spill] sm:$0xff] }
 0x99d   : > { %3201 = vmax.xlane.f32.xlu0 %v8659_v12 }
 0x9a0   : > { %2728 = vadd.xlane.f32.xlu1 %v8492_v27  ;;  %v9676_v27 = vld [vmem:[#allocation36_spill] sm:$0xff] }
 0x9a1   : > { %3207 = vmax.xlane.f32.xlu0 %v8664_v62 }
 0x9a4   : > { %2732 = vadd.xlane.f32.xlu1 %v8501_v41  ;;  %v9678_v41 = vld [vmem:[#allocation51_spill] sm:$0xff] }
 0x9a5   : > { %2191 = vadd.xlane.f32.xlu0 %v8287_v30  ;;  %v9675_v30 = vld [vmem:[#allocation42_spill] sm:$0xff] }
 0x9a8   : > { %3203 = vmax.xlane.f32.xlu1 %v8671_v26 }
 0x9a9   : > { %2734 = vadd.xlane.f32.xlu0 %v8511_v0  ;;  %v9679_v0 = vld [vmem:[#allocation47_spill] sm:$0xff] }
 0x9ac   : > { %2189 = vadd.xlane.f32.xlu1 %v8283_v44  ;;  %v9672_v44 = vld [vmem:[#allocation41_spill] sm:$0xff] }
 0x9ad   : > { %3213 = vmax.xlane.f32.xlu0 %v8676_v9 }
 0x9b0   : > { %2193 = vadd.xlane.f32.xlu1 %v9670_v21  ;;  %v9689_v21 = vld [vmem:[#allocation39_spill] sm:$0xff] }
 0x9b1   : > { %3209 = vmax.xlane.f32.xlu0 %v8681_v16 }
 0x9b4   : > { %3215 = vmax.xlane.f32.xlu1 %v8686_v57 }
 0x9b5   : > { %2738 = vadd.xlane.f32.xlu0 %v8520_v52  ;;  %v9682_v52 = vld [vmem:[#allocation38_spill] sm:$0xff] }
 0x9b8   : > { %3211 = vmax.xlane.f32.xlu1 %v8691_v51 }
 0x9b9   : > { %2195 = vadd.xlane.f32.xlu0 %v9672_v44  ;;  %v6102_v44 = vpop.eup %6101 }
 0x9bc   : > { %2736 = vadd.xlane.f32.xlu1 %v8516_v42  ;;  %v9681_v42 = vld [vmem:[#allocation49_spill] sm:$0xff] }
 0x9bd   : > { %2199 = vadd.xlane.f32.xlu0 %v9673_v25 }
 0x9c0   : > { %2740 = vadd.xlane.f32.xlu1 %v8513_v63  ;;  %v9680_v63 = vld [vmem:[#allocation52_spill] sm:$0xff] }
 0x9c1   : > { %2742 = vadd.xlane.f32.xlu0 %v8541_v36  ;;  %v9683_v36 = vld [vmem:[#allocation37_spill] sm:$0xff] }
 0x9c4   : > { %2197 = vadd.xlane.f32.xlu1 %v9674_v10 }
 0x9c5   : > { %2746 = vadd.xlane.f32.xlu0 %v8548_v5  ;;  %v9686_v5 = vpack.c.bf16 %v8587_v11, %v8585_v43 }
 0x9c8   : > { %2201 = vadd.xlane.f32.xlu1 %v9675_v30 }
 0x9c9   : > { %1689 = vadd.xlane.f32.xlu0 %v9676_v27 }
 0x9cc   : > { %2744 = vadd.xlane.f32.xlu1 %v8546_v38  ;;  %v9684_v38 = vpack.c.bf16 %v8567_v50, %v8564_v18 }
 0x9cd   : > { %1693 = vadd.xlane.f32.xlu0 %v9677_v15 }
 0x9d0   : > { %2748 = vadd.xlane.f32.xlu1 %v8544_v2  ;;  %v9685_v2 = vpack.c.bf16 %v8575_v8, %v8572_v56 }
 0x9d1   : > { %1697 = vadd.xlane.f32.xlu0 %v9678_v41 }
 0x9d4   : > { %1691 = vadd.xlane.f32.xlu1 %v9679_v0 }
 0x9d5   : > { %1701 = vadd.xlane.f32.xlu0 %v9680_v63 }
 0x9d8   : > { %1695 = vadd.xlane.f32.xlu1 %v9681_v42 }
 0x9dc   : > { %1699 = vadd.xlane.f32.xlu1 %v9682_v52 }
 0x9e0   : > { %1703 = vadd.xlane.f32.xlu1 %v9683_v36 }
 0x9eb   : > { %2396 = vrot.lane.b32.xlu0 %v9684_v38, %s6753_s12 }
 0x9f1   : > { %2398 = vrot.lane.b32.xlu1 %v9685_v2, %s6753_s12  ;;  %v9691_v2 = vld [vmem:[#allocation74_spill] sm:$0xff] }
 0x9f5   : > { %2943 = vrot.lane.b32.xlu1 %v9686_v5, %s6752_s22  ;;  %v2368_v5 = vmul.f32 %v6102_v44, %v9691_v2 }
 0xa0a   : > { %1707 = vadd.xlane.f32.xlu0 %v9687_v32  ;;  %v9692_v32 = vld [vmem:[#allocation76_spill] sm:$0xff] }
 0xa0d   : > { %v3190_v31 = vpop.xlane.xlu1 %3189 }
 0xa0e   : > { %v3186_v53 = vpop.xlane.xlu0 %3185  ;;  %v3219_v61 = vsub.f32 %v8618_v6, %v3190_v31 }
 0xa0f   : > { %v3217_v47 = vsub.f32 %v8621_v13, %v3186_v53  ;;  %v9688_v13 = vld [vmem:[#allocation53_spill] sm:$0xff] }
 0xa10   : > { %v3237_v43 = vmul.f32 1.442695, %v3219_v61 }
 0xa11   : > { %v3192_v22 = vpop.xlane.xlu1 %3191  ;;  %v3233_v59 = vmul.f32 1.442695, %v3217_v47 }
 0xa12   : > { %v3220_v18 = vsub.f32 %v8626_v7, %v3192_v22  ;;  %v2184_v50 = vpop.xlane.xlu0 %2183 }
 0xa13   : > { %6103 = vpow2.f32 %v3233_v59 }
 0xa14   : > { %v3239_v56 = vmul.f32 1.442695, %v3220_v18 }
 0xa15   : > { %v3188_v8 = vpop.xlane.xlu1 %3187 }
 0xa16   : > { %v3218_v49 = vsub.f32 %v8631_v37, %v3188_v8  ;;  %v3194_v33 = vpop.xlane.xlu0 %3193  ;;  %6105 = vpow2.f32 %v3239_v56  ;;  %v9693_v56 = vld [vmem:[#allocation78_spill] sm:$0xff] }
 0xa17   : > { %v3221_v37 = vsub.f32 %v8634_v54, %v3194_v33 }
 0xa18   : > { %v3235_v11 = vmul.f32 1.442695, %v3218_v49 }
 0xa19   : > { %v2182_v3 = vpop.xlane.xlu1 %2181  ;;  %1705 = vadd.xlane.f32.xlu1 %v9688_v13  ;;  %v3241_v41 = vmul.f32 1.442695, %v3221_v37 }
 0xa1a   : > { %6107 = vpow2.f32 %v3235_v11  ;;  %v2727_v7 = vpop.xlane.xlu0 %2726 }
 0xa1b   : > { %6109 = vpow2.f32 %v3237_v43 }
 0xa1c   : > { %6111 = vrcp.f32 %v2182_v3 }
 0xa1d   : > { %v3198_v6 = vpop.xlane.xlu1 %3197  ;;  %1709 = vadd.xlane.f32.xlu1 %v9689_v21  ;;  %v8737_v10 = vpop.eup %6103 }
 0xa1e   : > { %v2731_v14 = vpop.xlane.xlu0 %2730  ;;  %v3223_v0 = vsub.f32 %v8641_v40, %v3198_v6 }
 0xa20   : > { %2945 = vrot.lane.b32.xlu0 %v9690_v35, %s6752_s22  ;;  %v8740_v15 = vpop.eup %6105  ;;  %v3245_v40 = vmul.f32 1.442695, %v3223_v0 }
 0xa21   : > { %v3200_v25 = vpop.xlane.xlu1 %3199 }
 0xa22   : > { %v3224_v30 = vsub.f32 %v8646_v48, %v3200_v25  ;;  %v2188_v27 = vpop.xlane.xlu0 %2187 }
 0xa23   : > { %6113 = vrcp.f32 %v2188_v27 }
 0xa24   : > { %v8743_v63 = vpop.eup %6107  ;;  %v3247_v42 = vmul.f32 1.442695, %v3224_v30  ;;  %6115 = vrcp.f32 %v2184_v50 }
 0xa25   : > { %v8745_v54 = vpop.eup %6109  ;;  %v3196_v46 = vpop.xlane.xlu1 %3195  ;;  %v3313_v23 = vpack.c.bf16 %v8743_v63, %v8737_v10  ;;  %6117 = vpow2.f32 %v3241_v41  ;;  %v9694_v41 = vld [vmem:[#allocation73_spill] sm:$0xff] }
 0xa26   : > { %v6112_v52 = vpop.eup %6111  ;;  %v3222_v48 = vsub.f32 %v8651_v34, %v3196_v46  ;;  %v3206_v36 = vpop.xlane.xlu0 %3205  ;;  %v3314_v38 = vpack.c.bf16 %v8740_v15, %v8745_v54  ;;  %6119 = vrcp.f32 %v2727_v7 }
 0xa27   : > { %5623 = vmatprep.mubr.bf16.mxu0 %v3313_v23  ;;  %v2369_v31 = vmul.f32 %v6112_v52, %v9692_v32  ;;  %6121 = vpow2.f32 %v3247_v42  ;;  %v3227_v61 = vsub.f32 %v8654_v28, %v3206_v36  ;;  %v9695_v42 = vld [vmem:[#allocation75_spill] sm:$0xff] }
 0xa28   : > { %v3243_v53 = vmul.f32 1.442695, %v3222_v48  ;;  %5624 = vmatmul.mubr.bf16.vlgmr.msra.gmra.mrb[80].mxu0 %v3314_v38 }
 0xa29   : > { %v2186_v47 = vpop.xlane.xlu1 %2185  ;;  %v2382_v22 = vpack.c.bf16 %v2369_v31, %v2368_v5  ;;  %v3253_v7 = vmul.f32 1.442695, %v3227_v61 }
 0xa2a   : > { %6123 = vpow2.f32 %v3243_v53  ;;  %v3202_v18 = vpop.xlane.xlu0 %3201 }
 0xa2b   : > { %6125 = vpow2.f32 %v3245_v40  ;;  %v3225_v33 = vsub.f32 %v8659_v12, %v3202_v18  ;;  %v9696_v18 = vld [vmem:[#allocation40_spill] sm:$0xff] }
 0xa2c   : > { %6127 = vrcp.f32 %v2186_v47 }
 0xa2d   : > { %v6114_v34 = vpop.eup %6113  ;;  %v2729_v50 = vpop.xlane.xlu1 %2728  ;;  %v3249_v37 = vmul.f32 1.442695, %v3225_v33 }
 0xa2e   : > { %6129 = vrcp.f32 %v2729_v50  ;;  %2400 = vrot.lane.b32.xlu1 %v2382_v22, %s6753_s12  ;;  %v3208_v59 = vpop.xlane.xlu0 %3207  ;;  %v8757_v8 = vmul.f32 %v6114_v34, %v9693_v56  ;;  %v6116_v49 = vpop.eup %6115  ;;  %v9697_v50 = vld [vmem:[#allocation77_spill] sm:$0xff] }
 0xa2f   : > { %6131 = vrcp.f32 %v2731_v14  ;;  %v8760_v43 = vpop.eup %6117  ;;  %v3228_v11 = vsub.f32 %v8664_v62, %v3208_v59  ;;  %v2370_v0 = vmul.f32 %v6116_v49, %v9694_v41 }
 0xa30   : > { %v6120_v13 = vpop.eup %6119 }
 0xa31   : > { %v2733_v3 = vpop.xlane.xlu1 %2732  ;;  %v8763_v6 = vpop.eup %6121  ;;  %v3255_v14 = vmul.f32 1.442695, %v3228_v11  ;;  %v8777_v38 = vmul.f32 %v6120_v13, %v8595_v20 }
 0xa32   : > { %6133 = vrcp.f32 %v2733_v3  ;;  %v2192_v28 = vpop.xlane.xlu0 %2191 }
 0xa33   : > { %6135 = vrcp.f32 %v2192_v28 }
 0xa34   : > { %v8765_v21 = vpop.eup %6123  ;;  %6137 = vpow2.f32 %v3253_v7 }
 0xa35   : > { %v8767_v35 = vpop.eup %6125  ;;  %v3204_v44 = vpop.xlane.xlu1 %3203  ;;  %v3315_v12 = vpack.c.bf16 %v8765_v21, %v8760_v43 }
 0xa36   : > { %v6128_v25 = vpop.eup %6127  ;;  %v3226_v62 = vsub.f32 %v8671_v26, %v3204_v44  ;;  %v2735_v30 = vpop.xlane.xlu0 %2734  ;;  %v3316_v27 = vpack.c.bf16 %v8763_v6, %v8767_v35 }
 0xa37   : > { %6139 = vrcp.f32 %v2735_v30  ;;  %5627 = vmatprep.mubr.bf16.mxu0 %v3315_v12  ;;  %v2371_v46 = vmul.f32 %v6128_v25, %v9695_v42  ;;  %v9698_v25 = vld [vmem:[#allocation80_spill] sm:$0xff]  ;;  %v9699_v42 = vld [vmem:[#allocation79_spill] sm:$0xff] }
 0xa38   : > { %v6130_v23 = vpop.eup %6129  ;;  %6141 = vpow2.f32 %v3249_v37  ;;  %v3251_v52 = vmul.f32 1.442695, %v3226_v62  ;;  %5628 = vmatmul.mubr.bf16.gmra.mrb[84].mxu0 %v3316_v27 }
 0xa39   : > { %6143 = vpow2.f32 %v3255_v14  ;;  %v2190_v48 = vpop.xlane.xlu1 %2189  ;;  %v2383_v36 = vpack.c.bf16 %v2371_v46, %v2370_v0  ;;  %v8780_v26 = vmul.f32 %v6130_v23, %v8599_v4  ;;  %v6132_v40 = vpop.eup %6131 }
 0xa3a   : > { %6145 = vpow2.f32 %v3251_v52  ;;  %v3214_v2 = vpop.xlane.xlu0 %3213  ;;  %v8786_v53 = vmul.f32 %v6132_v40, %v8593_v39 }
 0xa3b   : > { %6147 = vrcp.f32 %v2190_v48  ;;  %2402 = vrot.lane.b32.xlu1 %v2383_v36, %s6753_s12  ;;  %v2929_v5 = vpack.c.bf16 %v8780_v26, %v8777_v38  ;;  %v3231_v4 = vsub.f32 %v8676_v9, %v3214_v2 }
 0xa3c   : > { %v6134_v32 = vpop.eup %6133 }
 0xa3d   : > { %v2194_v31 = vpop.xlane.xlu1 %2193  ;;  %v8789_v20 = vmul.f32 %v6134_v32, %v8597_v58  ;;  %v6136_v47 = vpop.eup %6135  ;;  %v3261_v33 = vmul.f32 1.442695, %v3231_v4 }
 0xa3e   : > { %6149 = vrcp.f32 %v2194_v31  ;;  %v3210_v22 = vpop.xlane.xlu0 %3209  ;;  %v8796_v61 = vmul.f32 %v6136_v47, %v9697_v50  ;;  %v8798_v59 = vpop.eup %6137 }
 0xa3f   : > { %1711 = vadd.xlane.f32.xlu0 %v9696_v18  ;;  %v2930_v34 = vpack.c.bf16 %v8789_v20, %v8786_v53  ;;  %v3229_v39 = vsub.f32 %v8681_v16, %v3210_v22  ;;  %v9700_v22 = vld [vmem:[#allocation82_spill] sm:$0xff]  ;;  %v9714_v53 = vld [vmem:[#allocation67_spill] sm:$0xff] }
 0xa41   : > { %v6140_v56 = vpop.eup %6139  ;;  %v3216_v58 = vpop.xlane.xlu1 %3215  ;;  %v3257_v28 = vmul.f32 1.442695, %v3229_v39 }
 0xa42   : > { %v8801_v49 = vpop.eup %6141  ;;  %v3232_v9 = vsub.f32 %v8686_v57, %v3216_v58  ;;  %v2739_v11 = vpop.xlane.xlu0 %2738  ;;  %v8805_v3 = vmul.f32 %v6140_v56, %v8603_v17 }
 0xa43   : > { %v8807_v13 = vpop.eup %6143  ;;  %6151 = vrcp.f32 %v2739_v11 }
 0xa44   : > { %v8809_v7 = vpop.eup %6145  ;;  %v3263_v14 = vmul.f32 1.442695, %v3232_v9  ;;  %6153 = vpow2.f32 %v3261_v33  ;;  %v3318_v17 = vpack.c.bf16 %v8807_v13, %v8798_v59 }
 0xa45   : > { %v6148_v37 = vpop.eup %6147  ;;  %v3212_v16 = vpop.xlane.xlu1 %3211  ;;  %v3317_v44 = vpack.c.bf16 %v8809_v7, %v8801_v49 }
 0xa46   : > { %v3230_v12 = vsub.f32 %v8691_v51, %v3212_v16  ;;  %v2196_v57 = vpop.xlane.xlu0 %2195  ;;  %v8817_v62 = vmul.f32 %v6148_v37, %v9698_v25  ;;  %v9701_v37 = vld [vmem:[#allocation81_spill] sm:$0xff] }
 0xa47   : > { %6155 = vrcp.f32 %v2196_v57  ;;  %5631 = vmatprep.mubr.bf16.mxu0 %v3317_v44 }
 0xa48   : > { %v6150_v30 = vpop.eup %6149  ;;  %6157 = vpow2.f32 %v3257_v28  ;;  %v3259_v27 = vmul.f32 1.442695, %v3230_v12  ;;  %5632 = vmatmul.mubr.bf16.gmra.mrb[88].mxu0 %v3318_v17  ;;  %v2384_v41 = vpack.c.bf16 %v8817_v62, %v8757_v8 }
 0xa49   : > { %6159 = vpow2.f32 %v3263_v14  ;;  %v2737_v0 = vpop.xlane.xlu1 %2736  ;;  %v8822_v51 = vmul.f32 %v6150_v30, %v9699_v42 }
 0xa4a   : > { %6161 = vpow2.f32 %v3259_v27  ;;  %v2200_v46 = vpop.xlane.xlu0 %2199  ;;  %v9702_v27 = vld [vmem:[#allocation84_spill] sm:$0xff] }
 0xa4b   : > { %6163 = vrcp.f32 %v2737_v0  ;;  %v2385_v23 = vpack.c.bf16 %v8822_v51, %v8796_v61 }
 0xa4c   : > { %6165 = vrcp.f32 %v2200_v46 }
 0xa4d   : > { %v2741_v52 = vpop.xlane.xlu1 %2740  ;;  %v6152_v48 = vpop.eup %6151 }
 0xa4e   : > { %6167 = vrcp.f32 %v2741_v52  ;;  %v2743_v36 = vpop.xlane.xlu0 %2742  ;;  %v8827_v40 = vmul.f32 %v6152_v48, %v8601_v19  ;;  %v8829_v2 = vpop.eup %6153  ;;  %v9704_v48 = vld [vmem:[#allocation83_spill] sm:$0xff] }
 0xa4f   : > { %6169 = vrcp.f32 %v2743_v36 }
 0xa51   : > { %v6156_v32 = vpop.eup %6155  ;;  %v2198_v31 = vpop.xlane.xlu1 %2197 }
 0xa52   : > { %v8831_v47 = vpop.eup %6157  ;;  %6171 = vrcp.f32 %v2198_v31  ;;  %v2747_v4 = vpop.xlane.xlu0 %2746  ;;  %v8834_v18 = vmul.f32 %v6156_v32, %v9700_v22 }
 0xa53   : > { %v8836_v50 = vpop.eup %6159  ;;  %6173 = vrcp.f32 %v2747_v4 }
 0xa54   : > { %v8838_v39 = vpop.eup %6161  ;;  %v3320_v9 = vpack.c.bf16 %v8836_v50, %v8829_v2 }
 0xa55   : > { %v6164_v56 = vpop.eup %6163  ;;  %v2202_v58 = vpop.xlane.xlu1 %2201  ;;  %2947 = vrot.lane.b32.xlu0 %v2929_v5, %s6752_s22  ;;  %v3319_v19 = vpack.c.bf16 %v8838_v39, %v8831_v47 }
 0xa56   : > { %v6166_v33 = vpop.eup %6165  ;;  %6175 = vrcp.f32 %v2202_v58  ;;  %v8849_v11 = vmul.f32 %v6164_v56, %v8607_v29  ;;  %v1690_v28 = vpop.xlane.xlu0 %1689 }
 0xa57   : > { %5635 = vmatprep.mubr.bf16.mxu0 %v3319_v19  ;;  %v8852_v14 = vmul.f32 %v6166_v33, %v9701_v37 }
 0xa58   : > { %v6168_v16 = vpop.eup %6167  ;;  %5636 = vmatmul.mubr.bf16.gmra.mrb[92].mxu0 %v3320_v9  ;;  %v2931_v38 = vpack.c.bf16 %v8849_v11, %v8805_v3 }
 0xa59   : > { %v6170_v26 = vpop.eup %6169  ;;  %v2745_v5 = vpop.xlane.xlu1 %2744  ;;  %v8857_v44 = vmul.f32 %v6168_v16, %v8605_v55  ;;  %v9703_v55 = vld [vmem:[#allocation56_spill] sm:$0xff]  ;;  %v9706_v16 = vld [vmem:[#allocation59_spill] sm:$0xff] }
 0xa5a   : > { %6177 = vrcp.f32 %v2745_v5  ;;  %v8860_v12 = vmul.f32 %v6170_v26, %v8611_v24  ;;  %v1694_v25 = vpop.xlane.xlu0 %1693 }
 0xa5b   : > { %v2932_v29 = vpack.c.bf16 %v8857_v44, %v8827_v40 }
 0xa5c   : > { %v6172_v57 = vpop.eup %6171 }
 0xa5d   : > { %v6174_v17 = vpop.eup %6173  ;;  %v2749_v30 = vpop.xlane.xlu1 %2748  ;;  %v8865_v0 = vmul.f32 %v6172_v57, %v9702_v27 }
 0xa5e   : > { %6179 = vrcp.f32 %v2749_v30  ;;  %v8868_v42 = vmul.f32 %v6174_v17, %v8609_v45  ;;  %v1698_v32 = vpop.xlane.xlu0 %1697 }
 0xa5f   : > { %1713 = vadd.xlane.f32.xlu1 %v9703_v55  ;;  %v2386_v24 = vpack.c.bf16 %v8865_v0, %v8834_v18  ;;  %6181 = vrcp.f32 %v1690_v28 }
 0xa60   : > { %v6176_v46 = vpop.eup %6175 }
 0xa61   : > { %v1692_v52 = vpop.xlane.xlu1 %1691  ;;  %v8874_v36 = vmul.f32 %v6176_v46, %v9704_v48 }
 0xa62   : > { %6183 = vrcp.f32 %v1692_v52  ;;  %v1702_v19 = vpop.xlane.xlu0 %1701 }
 0xa63   : > { %3271 = vadd.xlane.f32.xlu1 %v8740_v15  ;;  %v2387_v31 = vpack.c.bf16 %v8874_v36, %v8852_v14  ;;  %6185 = vrcp.f32 %v1694_v25  ;;  %v9707_v25 = vld [vmem:[#allocation27_spill] sm:$0xff] }
 0xa64   : > { %v6178_v45 = vpop.eup %6177 }
 0xa65   : > { %v1696_v4 = vpop.xlane.xlu1 %1695  ;;  %v8880_v22 = vmul.f32 %v6178_v45, %v8615_v1  ;;  %v9709_v45 = vld [vmem:[#allocation57_spill] sm:$0xff] }
 0xa66   : > { %6187 = vrcp.f32 %v1696_v4  ;;  %v2397_v55 = vpop.permute.xlu0 %2396 }
 0xa67   : > { %3267 = vadd.xlane.f32.xlu1 %v8743_v63  ;;  %v2933_v56 = vpack.c.bf16 %v8880_v22, %v8860_v12  ;;  %6189 = vrcp.f32 %v1698_v32  ;;  %v9705_v63 = vld [vmem:[#allocation31_spill] sm:$0xff] }
 0xa68   : > { %v6180_v58 = vpop.eup %6179 }
 0xa69   : > { %v1700_v33 = vpop.xlane.xlu1 %1699  ;;  %v8886_v15 = vmul.f32 %v6180_v58, %v8613_v60  ;;  %v6182_v9 = vpop.eup %6181  ;;  %v9711_v58 = vld [vmem:[#allocation63_spill] sm:$0xff] }
 0xa6a   : > { %6191 = vrcp.f32 %v1700_v33  ;;  %v1850_v37 = vmul.f32 %v6182_v9, %v9705_v63  ;;  %v9712_v63 = vld [vmem:[#allocation60_spill] sm:$0xff] }
 0xa6b   : > { %3279 = vadd.xlane.f32.xlu1 %v8763_v6  ;;  %v2934_v1 = vpack.c.bf16 %v8886_v15, %v8868_v42  ;;  %6193 = vrcp.f32 %v1702_v19  ;;  %v9708_v6 = vld [vmem:[#allocation43_spill] sm:$0xff] }
 0xa6c   : > { %v6184_v28 = vpop.eup %6183 }
 0xa6d   : > { %v1851_v26 = vmul.f32 %v6184_v28, %v9706_v16  ;;  %v1704_v5 = vpop.xlane.xlu1 %1703  ;;  %v6186_v57 = vpop.eup %6185  ;;  %v9713_v16 = vld [vmem:[#allocation62_spill] sm:$0xff] }
 0xa6e   : > { %6195 = vrcp.f32 %v1704_v5  ;;  %v1852_v30 = vmul.f32 %v6186_v57, %v9707_v25 }
 0xa6f   : > { %v1866_v17 = vpack.c.bf16 %v1851_v26, %v1850_v37  ;;  %3275 = vadd.xlane.f32.xlu1 %v8765_v21  ;;  %v9710_v21 = vld [vmem:[#allocation61_spill] sm:$0xff] }
 0xa70   : > { %v6188_v60 = vpop.eup %6187 }
 0xa71   : > { %v1853_v27 = vmul.f32 %v6188_v60, %v9708_v6  ;;  %1874 = vst.msk [vmem:[#allocation5] sm:$0xff] %vm1463_vm0, %v1866_v17  ;;  %v2399_v46 = vpop.permute.xlu1 %2398  ;;  %v6190_v52 = vpop.eup %6189 }
 0xa72   : > { %2421 = vst.msk [vmem:[#allocation5] sm:$0xff] %vm2420_vm2, %v2397_v55  ;;  %v1854_v4 = vmul.f32 %v6190_v52, %v9710_v21  ;;  %v9717_v52 = vld [vmem:[#allocation66_spill] sm:$0xff] }
 0xa73   : > { %v1867_v48 = vpack.c.bf16 %v1853_v27, %v1852_v30  ;;  %3287 = vadd.xlane.f32.xlu1 %v8807_v13 }
 0xa74   : > { %v6192_v32 = vpop.eup %6191  ;;  %1715 = vadd.xlane.f32.xlu0 %v9709_v45 }
 0xa75   : > { %v1855_v19 = vmul.f32 %v6192_v32, %v9711_v58  ;;  %1875 = vst.msk [vmem:[#allocation5 + $0x8] sm:$0xff] %vm1463_vm0, %v1867_v48  ;;  %v2944_v33 = vpop.permute.xlu1 %2943  ;;  %v6194_v9 = vpop.eup %6193 }
 0xa76   : > { %2422 = vst.msk [vmem:[#allocation5 + $0x8] sm:$0xff] %vm2420_vm2, %v2399_v46  ;;  %v1856_v37 = vmul.f32 %v6194_v9, %v9712_v63  ;;  %v9716_v46 = vld [vmem:[#allocation64_spill] sm:$0xff]  ;;  %v9719_v63 = vld [vmem:[#allocation71_spill] sm:$0xff] }
 0xa77   : > { %2968 = vst.msk [vmem:[#allocation5] sm:$0xff] %vm2967_vm3, %v2944_v33  ;;  %3283 = vadd.xlane.f32.xlu1 %v8809_v7  ;;  %v1868_v28 = vpack.c.bf16 %v1855_v19, %v1854_v4 }
 0xa78   : > { %v6196_v13 = vpop.eup %6195 }
 0xa79   : > { %v1857_v26 = vmul.f32 %v6196_v13, %v9713_v16  ;;  %1876 = vst.msk [vmem:[#allocation5 + $0x10] sm:$0xff] %vm1463_vm0, %v1868_v28  ;;  %v9718_v28 = vld [vmem:[#allocation69_spill] sm:$0xff] }
 0xa7b   : > { %3295 = vadd.xlane.f32.xlu1 %v8836_v50  ;;  %v1869_v5 = vpack.c.bf16 %v1857_v26, %v1856_v37 }
 0xa7d   : > { %1877 = vst.msk [vmem:[#allocation5 + $0x18] sm:$0xff] %vm1463_vm0, %v1869_v5 }
 0xa7f   : > { %3291 = vadd.xlane.f32.xlu1 %v8838_v39 }
 0xa8a   : > { %2949 = vrot.lane.b32.xlu0 %v2930_v34, %s6752_s22  ;;  %v9715_v34 = vld [vmem:[#allocation65_spill] sm:$0xff] }
 0xa97   : > { %v1708_v7 = vpop.xlane.xlu0 %1707 }
 0xa98   : > { %6197 = vrcp.f32 %v1708_v7 }
 0xa9b   : > { %v2946_v57 = vpop.permute.xlu0 %2945 }
 0xa9c   : > { %2969 = vst.msk [vmem:[#allocation5 + $0x8] sm:$0xff] %vm2967_vm3, %v2946_v57 }
 0xaa2   : > { %v6198_v25 = vpop.eup %6197 }
 0xaa3   : > { %v1859_v20 = vmul.f32 %v6198_v25, %v9714_v53  ;;  %v5886_v25 = vld [vmem:[#allocation11 + $0x8] sm:$0xff]  }
 0xaa6   : > { %v1706_v17 = vpop.xlane.xlu1 %1705 }
 0xaa7   : > { %6199 = vrcp.f32 %v1706_v17 }
 0xaa9   : > { %3269 = vadd.xlane.f32.xlu0 %v8745_v54 }
 0xaaa   : > { %v1710_v50 = vpop.xlane.xlu1 %1709 }
 0xaab   : > { %6201 = vrcp.f32 %v1710_v50 }
 0xaad   : > { %3265 = vadd.xlane.f32.xlu0 %v8737_v10 }
 0xaae   : > { %v2401_v60 = vpop.permute.xlu1 %2400 }
 0xaaf   : > { %2423 = vst.msk [vmem:[#allocation5 + $0x10] sm:$0xff] %vm2420_vm2, %v2401_v60  ;;  %v5885_v60 = vld [vmem:[#allocation11] sm:$0xff]  }
 0xab0   : > { %5639 = vmatprep.subr.bf16.mxu0 %v5885_v60 }
 0xab1   : > { %v6200_v39 = vpop.eup %6199  ;;  %3277 = vadd.xlane.f32.xlu0 %v8767_v35  ;;  %5640 = vmatpush3.bf16.msra.mxu0 %v5885_v60 }
 0xab2   : > { %v1858_v30 = vmul.f32 %v6200_v39, %v9715_v34  ;;  %v2403_v6 = vpop.permute.xlu1 %2402  ;;  %5641 = vmatprep.subr.bf16.mxu0 %v5886_v25  ;;  %v5887_v39 = vld [vmem:[#allocation11 + $0x10] sm:$0xff]  }
 0xab3   : > { %2424 = vst.msk [vmem:[#allocation5 + $0x18] sm:$0xff] %vm2420_vm2, %v2403_v6  ;;  %v5889_v6 = vld [vmem:[#allocation11 + $0x20] sm:$0xff]  }
 0xab4   : > { %v1870_v27 = vpack.c.bf16 %v1859_v20, %v1858_v30  ;;  %v5888_v20 = vld [vmem:[#allocation11 + $0x18] sm:$0xff]  }
 0xab5   : > { %3273 = vadd.xlane.f32.xlu0 %v8760_v43  ;;  %v6202_v35 = vpop.eup %6201  ;;  %5642 = vmatpush3.bf16.msra.mxu0 %v5886_v25 }
 0xab6   : > { %1878 = vst.msk [vmem:[#allocation5 + $0x20] sm:$0xff] %vm1463_vm0, %v1870_v27  ;;  %v1860_v43 = vmul.f32 %v6202_v35, %v9716_v46  ;;  %5643 = vmatprep.subr.bf16.mxu0 %v5887_v39 }
 0xab9   : > { %3285 = vadd.xlane.f32.xlu0 %v8798_v59  ;;  %5644 = vmatpush3.bf16.msra.mxu0 %v5887_v39 }
 0xaba   : > { %5645 = vmatprep.subr.bf16.mxu0 %v5888_v20 }
 0xabd   : > { %3281 = vadd.xlane.f32.xlu0 %v8801_v49  ;;  %5646 = vmatpush3.bf16.msra.mxu0 %v5888_v20 }
 0xabe   : > { %5647 = vmatprep.subr.bf16.mxu0 %v5889_v6 }
 0xac1   : > { %3293 = vadd.xlane.f32.xlu0 %v8829_v2  ;;  %5648 = vmatpush3.bf16.msra.mxu0 %v5889_v6 }
 0xac5   : > { %3289 = vadd.xlane.f32.xlu0 %v8831_v47 }
 0xacc   : > { %v1712_v10 = vpop.xlane.xlu0 %1711 }
 0xacd   : > { %6203 = vrcp.f32 %v1712_v10 }
 0xad0   : > { %v2948_v54 = vpop.permute.xlu0 %2947 }
 0xad1   : > { %2970 = vst.msk [vmem:[#allocation5 + $0x10] sm:$0xff] %vm2967_vm3, %v2948_v54 }
 0xad7   : > { %v6204_v55 = vpop.eup %6203 }
 0xad8   : > { %v1861_v48 = vmul.f32 %v6204_v55, %v9717_v52 }
 0xada   : > { %v1871_v32 = vpack.c.bf16 %v1861_v48, %v1860_v43  ;;  %v5890_v43 = vld [vmem:[#allocation11 + $0x28] sm:$0xff]  }
 0xadb   : > { %5649 = vmatprep.subr.bf16.mxu0 %v5890_v43 }
 0xadc   : > { %1879 = vst.msk [vmem:[#allocation5 + $0x28] sm:$0xff] %vm1463_vm0, %v1871_v32  ;;  %5650 = vmatpush3.bf16.msra.mxu0 %v5890_v43  ;;  %v5891_v32 = vld [vmem:[#allocation11 + $0x30] sm:$0xff]  }
 0xadd   : > { %5651 = vmatprep.subr.bf16.mxu0 %v5891_v32 }
 0xae0   : > { %5652 = vmatpush3.bf16.msra.mxu0 %v5891_v32 }
 0xaec   : > { %v1714_v2 = vpop.xlane.xlu1 %1713 }
 0xaed   : > { %6205 = vrcp.f32 %v1714_v2  ;;  %v5892_v2 = vld [vmem:[#allocation11 + $0x38] sm:$0xff]  }
 0xaee   : > { %5653 = vmatprep.subr.bf16.mxu0 %v5892_v2 }
 0xaef   : > { %5654 = vmatpush3.bf16.msra.mxu0 %v5892_v2 }
 0xaf0   : > { %v3272_v53 = vpop.xlane.xlu1 %3271 }
 0xaf4   : > { %v3268_v34 = vpop.xlane.xlu1 %3267 }
 0xaf7   : > { %v6206_v58 = vpop.eup %6205 }
 0xaf8   : > { %v1862_v13 = vmul.f32 %v6206_v58, %v9718_v28  ;;  %v3280_v35 = vpop.xlane.xlu1 %3279 }
 0xafb   : > { %v8934_v59 = vpop.f32.mrb[80].mxu0 }
 0xafc   : > { %v8936_v49 = vpop.f32.mrb[81].mxu0  ;;  %v3276_v46 = vpop.xlane.xlu1 %3275 }
 0xafd   : > { %v8938_v47 = vpop.f32.mrb[82].mxu0 }
 0xafe   : > { %v8940_v45 = vpop.f32.mrb[83].mxu0 }
 0xb00   : > { %v3288_v48 = vpop.xlane.xlu1 %3287 }
 0xb01   : > { %v1716_v21 = vpop.xlane.xlu0 %1715 }
 0xb02   : > { %6207 = vrcp.f32 %v1716_v21 }
 0xb03   : > { %6209 = vrcp.f32 %v3272_v53 }
 0xb05   : > { %v2950_v4 = vpop.permute.xlu0 %2949 }
 0xb06   : > { %2971 = vst.msk [vmem:[#allocation5 + $0x18] sm:$0xff] %vm2967_vm3, %v2950_v4 }
 0xb0b   : > { %v8943_v19 = vpop.f32.mrb[84].mxu0 }
 0xb0c   : > { %v6208_v33 = vpop.eup %6207  ;;  %v8945_v9 = vpop.f32.mrb[85].mxu0 }
 0xb0d   : > { %v1863_v37 = vmul.f32 %v6208_v33, %v9719_v63  ;;  %v8949_v16 = vpop.f32.mrb[86].mxu0  ;;  %v6210_v4 = vpop.eup %6209 }
 0xb0e   : > { %v8951_v26 = vpop.f32.mrb[87].mxu0  ;;  %v3461_v33 = vmul.f32 %v6210_v4, %v8938_v47 }
 0xb0f   : > { %v1872_v5 = vpack.c.bf16 %v1863_v37, %v1862_v13  ;;  %v3284_v37 = vpop.xlane.xlu1 %3283 }
 0xb11   : > { %1880 = vst.msk [vmem:[#allocation5 + $0x30] sm:$0xff] %vm1463_vm0, %v1872_v5 }
 0xb13   : > { %v3296_v6 = vpop.xlane.xlu1 %3295 }
 0xb17   : > { %v3292_v32 = vpop.xlane.xlu1 %3291 }
 0xb1b   : > { %v8954_v7 = vpop.f32.mrb[88].mxu0 }
 0xb1c   : > { %v8956_v57 = vpop.f32.mrb[89].mxu0 }
 0xb1d   : > { %v8958_v17 = vpop.f32.mrb[90].mxu0 }
 0xb1e   : > { %v8960_v50 = vpop.f32.mrb[91].mxu0 }
 0xb2b   : > { %v8962_v30 = vpop.f32.mrb[92].mxu0 }
 0xb2c   : > { %v8964_v27 = vpop.f32.mrb[93].mxu0 }
 0xb2d   : > { %v8966_v10 = vpop.f32.mrb[94].mxu0 }
 0xb2e   : > { %v8968_v54 = vpop.f32.mrb[95].mxu0 }
 0xb36   : > { %v3270_v55 = vpop.xlane.xlu0 %3269 }
 0xb37   : > { %6211 = vrcp.f32 %v3270_v55 }
 0xb38   : > { %6213 = vrcp.f32 %v3268_v34 }
 0xb3a   : > { %v3266_v52 = vpop.xlane.xlu0 %3265 }
 0xb3b   : > { %6215 = vrcp.f32 %v3266_v52 }
 0xb3c   : > { %6217 = vrcp.f32 %v3280_v35 }
 0xb3e   : > { %v3278_v21 = vpop.xlane.xlu0 %3277 }
 0xb3f   : > { %6219 = vrcp.f32 %v3278_v21 }
 0xb40   : > { %6221 = vrcp.f32 %v3276_v46 }
 0xb41   : > { %v6212_v58 = vpop.eup %6211 }
 0xb42   : > { %v3274_v28 = vpop.xlane.xlu0 %3273  ;;  %v3460_v13 = vmul.f32 %v6212_v58, %v8934_v59  ;;  %v6214_v63 = vpop.eup %6213 }
 0xb43   : > { %6223 = vrcp.f32 %v3274_v28  ;;  %v3459_v25 = vmul.f32 %v6214_v63, %v8940_v45 }
 0xb44   : > { %v3475_v5 = vpack.c.bf16 %v3461_v33, %v3460_v13  ;;  %6225 = vrcp.f32 %v3288_v48 }
 0xb45   : > { %v6216_v60 = vpop.eup %6215 }
 0xb46   : > { %3492 = vrot.lane.b32.xlu0 %v3475_v5, %s6750_s18  ;;  %v3286_v39 = vpop.xlane.xlu0 %3285  ;;  %v3458_v53 = vmul.f32 %v6216_v60, %v8936_v49  ;;  %v6218_v20 = vpop.eup %6217 }
 0xb47   : > { %6227 = vrcp.f32 %v3286_v39  ;;  %v3465_v59 = vmul.f32 %v6218_v20, %v8949_v16 }
 0xb48   : > { %v3474_v47 = vpack.c.bf16 %v3459_v25, %v3458_v53  ;;  %6229 = vrcp.f32 %v3284_v37 }
 0xb49   : > { %v6220_v34 = vpop.eup %6219 }
 0xb4a   : > { %3490 = vrot.lane.b32.xlu1 %v3474_v47, %s6750_s18  ;;  %v3282_v35 = vpop.xlane.xlu0 %3281  ;;  %v3464_v55 = vmul.f32 %v6220_v34, %v8943_v19  ;;  %v6222_v45 = vpop.eup %6221  ;;  %v9720_v34 = vld [vmem:[#allocation50_spill] sm:$0xff] }
 0xb4b   : > { %6231 = vrcp.f32 %v3282_v35  ;;  %v3463_v49 = vmul.f32 %v6222_v45, %v8951_v26  ;;  %v9724_v45 = vmov 0  }
 0xb4c   : > { %v3477_v46 = vpack.c.bf16 %v3465_v59, %v3464_v55  ;;  %6233 = vrcp.f32 %v3296_v6 }
 0xb4d   : > { %v6224_v43 = vpop.eup %6223 }
 0xb4e   : > { %v3294_v52 = vpop.xlane.xlu0 %3293  ;;  %v3462_v48 = vmul.f32 %v6224_v43, %v8945_v9  ;;  %v6226_v2 = vpop.eup %6225  ;;  %v5895_v43 = vld [vmem:[#allocation12 + $0x4] ss:$16 sps:$4 sm:$0xff]  }
 0xb4f   : > { %6235 = vrcp.f32 %v3294_v52  ;;  %v3469_v4 = vmul.f32 %v6226_v2, %v8958_v17  ;;  %v5898_v52 = vld [vmem:[#allocation12 + $0xc] ss:$16 sps:$4 sm:$0xff]   ;;  %4042 = vmatprep.subr.bf16.mxu1 %v5895_v43  ;;  %v5899_v2 = vld [vmem:[#allocation12 + $0x20] ss:$16 sps:$4 sm:$0xff]  }
 0xb50   : > { %v3476_v21 = vpack.c.bf16 %v3463_v49, %v3462_v48  ;;  %6237 = vrcp.f32 %v3292_v32  ;;  %v5896_v49 = vld [vmem:[#allocation12 + $0x8] ss:$16 sps:$4 sm:$0xff]   ;;  %v5901_v48 = vld [vmem:[#allocation12 + $0x24] ss:$16 sps:$4 sm:$0xff]   ;;  %v5904_v32 = vld [vmem:[#allocation12 + $0x2c] ss:$16 sps:$4 sm:$0xff]   ;;  %4155 = vmatprep.subr.bf16.mxu0 %v5898_v52 }
 0xb51   : > { %v6228_v16 = vpop.eup %6227  ;;  %v6413_v52 = vld [vmem:[%s7100_s23 + $0x40] sm:$0xff] }
 0xb52   : > { %3494 = vrot.lane.b32.xlu1 %v3476_v21, %s6750_s18  ;;  %v3290_v19 = vpop.xlane.xlu0 %3289  ;;  %v3468_v58 = vmul.f32 %v6228_v16, %v8954_v7  ;;  %v6230_v33 = vpop.eup %6229  ;;  %v5902_v21 = vld [vmem:[#allocation12 + $0x28] ss:$16 sps:$4 sm:$0xff]   ;;  %v5907_v16 = vld [vmem:[#allocation12 + $0x44] ss:$16 sps:$4 sm:$0xff]  }
 0xb53   : > { %6239 = vrcp.f32 %v3290_v19  ;;  %v3467_v13 = vmul.f32 %v6230_v33, %v8960_v50  ;;  %v9721_v50 = vld [vmem:[#allocation55_spill] sm:$0xff] }
 0xb54   : > { %v3479_v28 = vpack.c.bf16 %v3469_v4, %v3468_v58  ;;  %v5910_v4 = vld [vmem:[#allocation12 + $0x4c] ss:$16 sps:$4 sm:$0xff]   ;;  %v5905_v19 = vld [vmem:[#allocation12 + $0x40] ss:$16 sps:$4 sm:$0xff]   ;;  %v5908_v58 = vld [vmem:[#allocation12 + $0x48] ss:$16 sps:$4 sm:$0xff]  }
 0xb55   : > { %v6232_v26 = vpop.eup %6231 }
 0xb56   : > { %v3466_v9 = vmul.f32 %v6232_v26, %v8956_v57  ;;  %v6234_v63 = vpop.eup %6233  ;;  %v6405_v26 = vld [vmem:[%s7100_s23] sm:$0xff] }
 0xb57   : > { %v3473_v60 = vmul.f32 %v6234_v63, %v8966_v10 }
 0xb58   : > { %v3478_v37 = vpack.c.bf16 %v3467_v13, %v3466_v9 }
 0xb59   : > { %v6236_v5 = vpop.eup %6235 }
 0xb5a   : > { %v3472_v17 = vmul.f32 %v6236_v5, %v8962_v30  ;;  %v6238_v25 = vpop.eup %6237 }
 0xb5b   : > { %v3471_v7 = vmul.f32 %v6238_v25, %v8968_v54 }
 0xb5c   : > { %v3481_v39 = vpack.c.bf16 %v3473_v60, %v3472_v17  ;;  %v6407_v60 = vld [vmem:[%s7100_s23 + $0x8] sm:$0xff] }
 0xb5d   : > { %v6240_v53 = vpop.eup %6239 }
 0xb5e   : > { %v3470_v20 = vmul.f32 %v6240_v53, %v8964_v27  ;;  %v6408_v53 = vld [vmem:[%s7100_s23 + $0x18] sm:$0xff] }
 0xb60   : > { %v3480_v47 = vpack.c.bf16 %v3471_v7, %v3470_v20 }
 0xb65   : > { %1719 = vadd.xlane.f32.xlu0 %v9720_v34  ;;  %v5913_v34 = vld [vmem:[#allocation12 + $0x64] ss:$16 sps:$4 sm:$0xff]  }
 0xb76   : > { %1717 = vadd.xlane.f32.xlu1 %v9721_v50  ;;  %v5916_v50 = vld [vmem:[#allocation12 + $0x6c] ss:$16 sps:$4 sm:$0xff]  }
 0xb7b   : > { %3496 = vrot.lane.b32.xlu0 %v3477_v46, %s6750_s18  ;;  %v5893_v46 = vld [vmem:[#allocation12] ss:$16 sps:$4 sm:$0xff]  }
 0xb7c   : > { %4043 = vmatpush1.bf16.msra.mxu1 %v5893_v46 }
 0xb7d   : > { %4044 = vmatprep.subr.bf16.mxu1 %v5901_v48 }
 0xb7f   : > { %2951 = vrot.lane.b32.xlu0 %v2931_v38, %s6752_s22 }
 0xb80   : > { %4045 = vmatpush1.bf16.msra.mxu1 %v5899_v2 }
 0xb81   : > { %4046 = vmatprep.subr.bf16.mxu1 %v5907_v16 }
 0xb83   : > { %3498 = vrot.lane.b32.xlu0 %v3478_v37, %s6750_s18  ;;  %v6406_v37 = vld [vmem:[%s7100_s23 + $0x10] sm:$0xff] }
 0xb84   : > { %4047 = vmatpush1.bf16.msra.mxu1 %v5905_v19 }
 0xb85   : > { %4048 = vmatprep.subr.bf16.mxu1 %v5913_v34 }
 0xb87   : > { %2404 = vrot.lane.b32.xlu1 %v2384_v41, %s6753_s12  ;;  %2408 = vrot.lane.b32.xlu0 %v2386_v24, %s6753_s12 }
 0xb8b   : > { %2406 = vrot.lane.b32.xlu1 %v2385_v23, %s6753_s12  ;;  %2955 = vrot.lane.b32.xlu0 %v2933_v56, %s6752_s22  ;;  %v9723_v56 = vld [vmem:[#allocation68_spill] sm:$0xff] }
 0xb8f   : > { %2953 = vrot.lane.b32.xlu1 %v2932_v29, %s6752_s22  ;;  %3502 = vrot.lane.b32.xlu0 %v3480_v47, %s6750_s18 }
 0xb93   : > { %3500 = vrot.lane.b32.xlu1 %v3479_v28, %s6750_s18 }
 0xb97   : > { %2410 = vrot.lane.b32.xlu1 %v2387_v31, %s6753_s12  ;;  %v9722_v31 = vld [vmem:[#allocation70_spill] sm:$0xff] }
 0xb9b   : > { %2957 = vrot.lane.b32.xlu1 %v2934_v1, %s6752_s22 }
 0xb9f   : > { %3504 = vrot.lane.b32.xlu1 %v3481_v39, %s6750_s18  ;;  %s6754_s18 = smov [#allocation20]  }
 0xba0   : > { %s6651_s22 = sshll.u32 %s6754_s18, 4  ;;  %s6652_s22 = int_to_ptr.vmem [resolvable:$false] %s6651_s22 }
 0xba1   : > { %s6653_s12 = scalar_lea.vmem %s6652_s22, 4096  ;;  %p6654_p13 = scmp.lt.s32.totalorder %s9365_s10, %s6652_s22 }
 0xba2   : > { %p6655_p8 = scmp.lt.s32.totalorder %s6653_s12, %s6647_s30 }
 0xba4   : > { %p6656_p6 = por %p6655_p8, %p6654_p13 }
 0xba6   : > { %p6657_p9 = pnand %p6656_p6, %p6650_p12 }
 0xbb8   : > { %v3493_v8 = vpop.permute.xlu0 %3492 }
 0xbb9   : > { %3516 = vst.msk [vmem:[#allocation5 + $0x8] sm:$0xff] %vm3514_vm4, %v3493_v8  ;;  %v5911_v8 = vld [vmem:[#allocation12 + $0x60] ss:$16 sps:$4 sm:$0xff]  }
 0xbba   : > { %4049 = vmatpush1.bf16.msra.mxu1 %v5911_v8 }
 0xbbc   : > { %v3491_v61 = vpop.permute.xlu1 %3490 }
 0xbbd   : > { %3515 = vst.msk [vmem:[#allocation5] sm:$0xff] %vm3514_vm4, %v3491_v61  ;;  %v5914_v61 = vld [vmem:[#allocation12 + $0x68] ss:$16 sps:$4 sm:$0xff]  }
 0xbc0   : > { %v3524_v41 = vld [vmem:[#allocation5 + $0x8] sm:$0xff] }
 0xbc4   : > { %v3495_v3 = vpop.permute.xlu1 %3494  ;;  %v3523_v62 = vld [vmem:[#allocation5] sm:$0xff] }
 0xbc5   : > { %3517 = vst.msk [vmem:[#allocation5 + $0x10] sm:$0xff] %vm3514_vm4, %v3495_v3  ;;  %5655 = vmatprep.mubr.bf16.mxu0 %v3523_v62  ;;  %v5919_v3 = vld [vmem:[#allocation12 + $0x84] ss:$16 sps:$4 sm:$0xff]   ;;  %v5922_v62 = vld [vmem:[#allocation12 + $0x8c] ss:$16 sps:$4 sm:$0xff]  }
 0xbc6   : > { %5656 = vmatmul.mubr.bf16.vlgmr.msra.gmra.mrb[96].mxu0 %v3524_v41  ;;  %v5917_v41 = vld [vmem:[#allocation12 + $0x80] ss:$16 sps:$4 sm:$0xff]   ;;  %4050 = vmatprep.subr.bf16.mxu1 %v5919_v3  ;;  %v6420_v3 = vld [vmem:[%s7100_s23 + $0x78] sm:$0xff] }
 0xbc7   : > { %4156 = vmatpush1.bf16.msra.mxu0 %v5896_v49  ;;  %4051 = vmatpush1.bf16.msra.mxu1 %v5917_v41 }
 0xbc8   : > { %4157 = vmatprep.subr.bf16.mxu0 %v5904_v32 }
 0xbcb   : > { %4158 = vmatpush1.bf16.msra.mxu0 %v5902_v21  ;;  %v6414_v21 = vld [vmem:[%s7100_s23 + $0x50] sm:$0xff] }
 0xbcc   : > { %v3525_v51 = vld [vmem:[#allocation5 + $0x10] sm:$0xff]  ;;  %4159 = vmatprep.subr.bf16.mxu0 %v5910_v4  ;;  %v6415_v4 = vld [vmem:[%s7100_s23 + $0x48] sm:$0xff] }
 0xbcd   : > { %5659 = vmatprep.mubr.bf16.mxu0 %v3525_v51  ;;  %v5920_v51 = vld [vmem:[#allocation12 + $0x88] ss:$16 sps:$4 sm:$0xff]  }
 0xbcf   : > { %4160 = vmatpush1.bf16.msra.mxu0 %v5908_v58 }
 0xbd0   : > { %4161 = vmatprep.subr.bf16.mxu0 %v5916_v50  ;;  %v6419_v50 = vld [vmem:[%s7100_s23 + $0x68] sm:$0xff] }
 0xbd3   : > { %4162 = vmatpush1.bf16.msra.mxu0 %v5914_v61 }
 0xbd4   : > { %4163 = vmatprep.subr.bf16.mxu0 %v5922_v62 }
 0xbd7   : > { %4164 = vmatpush1.bf16.msra.mxu0 %v5920_v51 }
 0xbf2   : > { %v1720_v23 = vpop.xlane.xlu0 %1719 }
 0xbf3   : > { %6241 = vrcp.f32 %v1720_v23  ;;  %v5925_v23 = vld [vmem:[#allocation12 + $0xa4] ss:$16 sps:$4 sm:$0xff]  }
 0xbf4   : > { %4052 = vmatprep.subr.bf16.mxu1 %v5925_v23 }
 0xbf6   : > { %v3497_v40 = vpop.permute.xlu0 %3496 }
 0xbf7   : > { %3518 = vst.msk [vmem:[#allocation5 + $0x18] sm:$0xff] %vm3514_vm4, %v3497_v40  ;;  %v5928_v40 = vld [vmem:[#allocation12 + $0xac] ss:$16 sps:$4 sm:$0xff]  }
 0xbf8   : > { %4165 = vmatprep.subr.bf16.mxu0 %v5928_v40 }
 0xbfa   : > { %v2952_v18 = vpop.permute.xlu0 %2951 }
 0xbfd   : > { %v6242_v24 = vpop.eup %6241 }
 0xbfe   : > { %v3499_v11 = vpop.permute.xlu0 %3498  ;;  %v3526_v14 = vld [vmem:[#allocation5 + $0x18] sm:$0xff]  ;;  %v1865_v22 = vmul.f32 %v6242_v24, %v9722_v31 }
 0xbff   : > { %5660 = vmatmul.mubr.bf16.gmra.mrb[100].mxu0 %v3526_v14  ;;  %v5931_v14 = vld [vmem:[#allocation12 + $0xc4] ss:$16 sps:$4 sm:$0xff]   ;;  %v5940_v24 = vld [vmem:[#allocation12 + $0xec] ss:$16 sps:$4 sm:$0xff]  }
 0xc02   : > { %v2409_v38 = vpop.permute.xlu0 %2408 }
 0xc03   : > { %2427 = vst.msk [vmem:[#allocation5 + $0x30] sm:$0xff] %vm2420_vm2, %v2409_v38  ;;  %v1718_v44 = vpop.xlane.xlu1 %1717  ;;  %v5934_v38 = vld [vmem:[#allocation12 + $0xcc] ss:$16 sps:$4 sm:$0xff]  }
 0xc04   : > { %6243 = vrcp.f32 %v1718_v44  ;;  %v5929_v44 = vld [vmem:[#allocation12 + $0xc0] ss:$16 sps:$4 sm:$0xff]  }
 0xc06   : > { %v2956_v12 = vpop.permute.xlu0 %2955 }
 0xc07   : > { %2974 = vst.msk [vmem:[#allocation5 + $0x30] sm:$0xff] %vm2967_vm3, %v2956_v12  ;;  %v2405_v29 = vpop.permute.xlu1 %2404  ;;  %v5932_v12 = vld [vmem:[#allocation12 + $0xc8] ss:$16 sps:$4 sm:$0xff]  }
 0xc08   : > { %2425 = vst.msk [vmem:[#allocation5 + $0x20] sm:$0xff] %vm2420_vm2, %v2405_v29  ;;  %v5935_v29 = vld [vmem:[#allocation12 + $0xe0] ss:$16 sps:$4 sm:$0xff]  }
 0xc09   : > { %2972 = vst.msk [vmem:[#allocation5 + $0x20] sm:$0xff] %vm2967_vm3, %v2952_v18  ;;  %v5923_v18 = vld [vmem:[#allocation12 + $0xa0] ss:$16 sps:$4 sm:$0xff]  }
 0xc0a   : > { %3519 = vst.msk [vmem:[#allocation5 + $0x20] sm:$0xff] %vm3514_vm4, %v3499_v11  ;;  %v3503_v0 = vpop.permute.xlu0 %3502  ;;  %v5926_v11 = vld [vmem:[#allocation12 + $0xa8] ss:$16 sps:$4 sm:$0xff]   ;;  %4053 = vmatpush1.bf16.msra.mxu1 %v5923_v18 }
 0xc0b   : > { %3521 = vst.msk [vmem:[#allocation5 + $0x30] sm:$0xff] %vm3514_vm4, %v3503_v0  ;;  %v2407_v42 = vpop.permute.xlu1 %2406  ;;  %4166 = vmatpush1.bf16.msra.mxu0 %v5926_v11  ;;  %4054 = vmatprep.subr.bf16.mxu1 %v5931_v14  ;;  %v5937_v0 = vld [vmem:[#allocation12 + $0xe4] ss:$16 sps:$4 sm:$0xff]  }
 0xc0c   : > { %2426 = vst.msk [vmem:[#allocation5 + $0x28] sm:$0xff] %vm2420_vm2, %v2407_v42  ;;  %4167 = vmatprep.subr.bf16.mxu0 %v5934_v38  ;;  %v5938_v42 = vld [vmem:[#allocation12 + $0xe8] ss:$16 sps:$4 sm:$0xff]  }
 0xc0e   : > { %v6244_v36 = vpop.eup %6243  ;;  %4055 = vmatpush1.bf16.msra.mxu1 %v5929_v44 }
 0xc0f   : > { %v1864_v15 = vmul.f32 %v6244_v36, %v9723_v56  ;;  %v2954_v1 = vpop.permute.xlu1 %2953  ;;  %4168 = vmatpush1.bf16.msra.mxu0 %v5932_v12  ;;  %4056 = vmatprep.subr.bf16.mxu1 %v5937_v0 }
 0xc10   : > { %2973 = vst.msk [vmem:[#allocation5 + $0x28] sm:$0xff] %vm2967_vm3, %v2954_v1  ;;  %4169 = vmatprep.subr.bf16.mxu0 %v5940_v24 }
 0xc11   : > { %v3527_v57 = vld [vmem:[#allocation5 + $0x20] sm:$0xff]  ;;  %v1873_v30 = vpack.c.bf16 %v1865_v22, %v1864_v15 }
 0xc12   : > { %5663 = vmatprep.mubr.bf16.mxu0 %v3527_v57  ;;  %v3529_v59 = vld [vmem:[#allocation5 + $0x30] sm:$0xff]  ;;  %4057 = vmatpush1.bf16.msra.mxu1 %v5935_v29  ;;  %v6409_v22 = vld [vmem:[%s7100_s23 + $0x20] sm:$0xff] }
 0xc13   : > { %v3501_v27 = vpop.permute.xlu1 %3500  ;;  %1881 = vst.msk [vmem:[#allocation5 + $0x38] sm:$0xff] %vm1463_vm0, %v1873_v30  ;;  %4170 = vmatpush1.bf16.msra.mxu0 %v5938_v42  ;;  %v6410_v57 = vld [vmem:[%s7100_s23 + $0x30] sm:$0xff] }
 0xc14   : > { %3520 = vst.msk [vmem:[#allocation5 + $0x28] sm:$0xff] %vm3514_vm4, %v3501_v27  ;;  %v6411_v27 = vld [vmem:[%s7100_s23 + $0x28] sm:$0xff] }
 0xc17   : > { %v2411_v10 = vpop.permute.xlu1 %2410 }
 0xc18   : > { %2428 = vst.msk [vmem:[#allocation5 + $0x38] sm:$0xff] %vm2420_vm2, %v2411_v10 }
 0xc1b   : > { %v2958_v54 = vpop.permute.xlu1 %2957  ;;  %v3528_v6 = vld [vmem:[#allocation5 + $0x28] sm:$0xff] }
 0xc1c   : > { %2975 = vst.msk [vmem:[#allocation5 + $0x38] sm:$0xff] %vm2967_vm3, %v2958_v54  ;;  %5664 = vmatmul.mubr.bf16.gmra.mrb[104].mxu0 %v3528_v6  ;;  %v6412_v6 = vld [vmem:[%s7100_s23 + $0x38] sm:$0xff] }
 0xc1d   : > { %5667 = vmatprep.mubr.bf16.mxu0 %v3529_v59 }
 0xc1f   : > { %v3505_v35 = vpop.permute.xlu1 %3504 }
 0xc20   : > { %3522 = vst.msk [vmem:[#allocation5 + $0x38] sm:$0xff] %vm3514_vm4, %v3505_v35 }
 0xc27   : > { %v3530_v55 = vld [vmem:[#allocation5 + $0x38] sm:$0xff] }
 0xc28   : > { %5668 = vmatmul.mubr.bf16.gmra.mrb[108].mxu0 %v3530_v55 }
 0xc29   : > { %4187 = vmatprep.mubr.bf16.mxu0 %v9724_v45 }
 0xc99   : > { %v5657_v33 = vpop.f32.mrb[96].mxu0 }
 0xc9a   : > { %v3629_v28 = vpop.f32.mrb[97].mxu0  ;;  %v9052_v5 = vadd.f32 %v6406_v37, %v5657_v33  ;;  %v6416_v33 = vld [vmem:[%s7100_s23 + $0x58] sm:$0xff] }
 0xc9b   : > { %v9049_v13 = vadd.f32 %v6405_v26, %v3629_v28  ;;  %v5658_v9 = vpop.f32.mrb[98].mxu0 }
 0xc9c   : > { %v3632_v63 = vpop.f32.mrb[99].mxu0  ;;  %v9062_v7 = vadd.f32 %v6408_v53, %v5658_v9  ;;  %v3710_v20 = vmul.f32 %v9052_v5, %v9052_v5 }
 0xc9d   : > { %v9055_v17 = vadd.f32 %v6407_v60, %v3632_v63  ;;  %v3708_v25 = vmul.f32 %v9049_v13, %v9049_v13 }
 0xc9e   : > { %v3711_v47 = vmul.f32 %v9062_v7, %v9062_v7 }
 0xc9f   : > { %3724 = vadd.xlane.f32.xlu0 %v3708_v25  ;;  %v3709_v39 = vmul.f32 %v9055_v17, %v9055_v17  ;;  %v6417_v25 = vld [vmem:[%s7100_s23 + $0x60] sm:$0xff] }
 0xca1   : > { %3726 = vadd.xlane.f32.xlu1 %v3709_v39 }
 0xca3   : > { %3728 = vadd.xlane.f32.xlu0 %v3710_v20 }
 0xca7   : > { %3730 = vadd.xlane.f32.xlu0 %v3711_v47  ;;  %v6418_v47 = vld [vmem:[%s7100_s23 + $0x70] sm:$0xff] }
 0xcd2   : > { %v5661_v36 = vpop.f32.mrb[100].mxu0 }
 0xcd3   : > { %v3645_v31 = vpop.f32.mrb[101].mxu0  ;;  %v9072_v30 = vadd.f32 %v6410_v57, %v5661_v36 }
 0xcd4   : > { %v9069_v56 = vadd.f32 %v6409_v22, %v3645_v31  ;;  %v5662_v15 = vpop.f32.mrb[102].mxu0  ;;  %v9131_v31 = vld [vmem:[%s9726_s6] ss:$0 sm:$0xff] }
 0xcd5   : > { %v3648_v1 = vpop.f32.mrb[103].mxu0  ;;  %v9080_v59 = vadd.f32 %v6412_v6, %v5662_v15  ;;  %v3714_v55 = vmul.f32 %v9072_v30, %v9072_v30  ;;  %v3778_v15 = vmul.f32 %v9131_v31, %v9049_v13 }
 0xcd6   : > { %v9075_v10 = vadd.f32 %v6411_v27, %v3648_v1  ;;  %v3712_v54 = vmul.f32 %v9069_v56, %v9069_v56  ;;  %v3779_v1 = vmul.f32 %v9131_v31, %v9055_v17 }
 0xcd7   : > { %v3715_v46 = vmul.f32 %v9080_v59, %v9080_v59 }
 0xcd8   : > { %3732 = vadd.xlane.f32.xlu0 %v3712_v54  ;;  %v3713_v35 = vmul.f32 %v9075_v10, %v9075_v10 }
 0xcda   : > { %3734 = vadd.xlane.f32.xlu1 %v3713_v35 }
 0xcdc   : > { %3736 = vadd.xlane.f32.xlu0 %v3714_v55  ;;  %v3781_v55 = vmul.f32 %v9131_v31, %v9062_v7 }
 0xcde   : > { %3738 = vadd.xlane.f32.xlu1 %v3715_v46 }
 0xcef   : > { %v5665_v43 = vpop.f32.mrb[104].mxu0 }
 0xcf0   : > { %v3661_v49 = vpop.f32.mrb[105].mxu0  ;;  %v9092_v16 = vadd.f32 %v6414_v21, %v5665_v43  ;;  %v3780_v43 = vmul.f32 %v9131_v31, %v9052_v5 }
 0xcf1   : > { %v9089_v48 = vadd.f32 %v6413_v52, %v3661_v49  ;;  %v5666_v32 = vpop.f32.mrb[106].mxu0 }
 0xcf2   : > { %v3664_v2 = vpop.f32.mrb[107].mxu0  ;;  %v9100_v28 = vadd.f32 %v6416_v33, %v5666_v32  ;;  %v3718_v9 = vmul.f32 %v9092_v16, %v9092_v16 }
 0xcf3   : > { %v9095_v19 = vadd.f32 %v6415_v4, %v3664_v2  ;;  %v3716_v58 = vmul.f32 %v9089_v48, %v9089_v48 }
 0xcf4   : > { %v3719_v63 = vmul.f32 %v9100_v28, %v9100_v28 }
 0xcf5   : > { %3740 = vadd.xlane.f32.xlu0 %v3716_v58  ;;  %v3717_v26 = vmul.f32 %v9095_v19, %v9095_v19 }
 0xcf7   : > { %3742 = vadd.xlane.f32.xlu1 %v3717_v26 }
 0xcf9   : > { %3744 = vadd.xlane.f32.xlu0 %v3718_v9 }
 0xcfb   : > { %3746 = vadd.xlane.f32.xlu1 %v3719_v63  ;;  %v5669_v37 = vpop.f32.mrb[108].mxu0 }
 0xcfc   : > { %v3677_v60 = vpop.f32.mrb[109].mxu0  ;;  %v9112_v34 = vadd.f32 %v6418_v47, %v5669_v37  ;;  %v3782_v47 = vmul.f32 %v9131_v31, %v9069_v56 }
 0xcfd   : > { %v9109_v39 = vadd.f32 %v6417_v25, %v3677_v60  ;;  %v5670_v53 = vpop.f32.mrb[110].mxu0 }
 0xcfe   : > { %v3680_v20 = vpop.f32.mrb[111].mxu0  ;;  %v9120_v62 = vadd.f32 %v6420_v3, %v5670_v53  ;;  %v3722_v51 = vmul.f32 %v9112_v34, %v9112_v34 }
 0xcff   : > { %v9115_v8 = vadd.f32 %v6419_v50, %v3680_v20  ;;  %v3720_v61 = vmul.f32 %v9109_v39, %v9109_v39  ;;  %v3783_v50 = vmul.f32 %v9131_v31, %v9075_v10 }
 0xd00   : > { %9725 = vst [vmem:[#allocation44_spill] sm:$0xff] %v9120_v62  ;;  %v3723_v23 = vmul.f32 %v9120_v62, %v9120_v62 }
 0xd01   : > { %3748 = vadd.xlane.f32.xlu0 %v3720_v61  ;;  %v3721_v41 = vmul.f32 %v9115_v8, %v9115_v8 }
 0xd03   : > { %3750 = vadd.xlane.f32.xlu1 %v3721_v41 }
 0xd05   : > { %3752 = vadd.xlane.f32.xlu0 %v3722_v51 }
 0xd07   : > { %3754 = vadd.xlane.f32.xlu1 %v3723_v23 }
 0xd2c   : > { %v3725_v40 = vpop.xlane.xlu0 %3724 }
 0xd2d   : > { %v3756_v18 = vmul.f32 0.0078125, %v3725_v40  ;;  %v3785_v40 = vmul.f32 %v9131_v31, %v9080_v59 }
 0xd2e   : > { %v3727_v11 = vpop.xlane.xlu1 %3726 }
 0xd2f   : > { %v3794_v14 = vadd.f32 1e-05, %v3756_v18  ;;  %v3757_v38 = vmul.f32 0.0078125, %v3727_v11  ;;  %v3784_v11 = vmul.f32 %v9131_v31, %v9072_v30 }
 0xd30   : > { %v3729_v44 = vpop.xlane.xlu0 %3728 }
 0xd31   : > { %6245 = vrsqrt.f32 %v3794_v14  ;;  %v3795_v12 = vadd.f32 1e-05, %v3757_v38  ;;  %v3758_v29 = vmul.f32 0.0078125, %v3729_v44 }
 0xd33   : > { %6247 = vrsqrt.f32 %v3795_v12  ;;  %v3796_v0 = vadd.f32 1e-05, %v3758_v29 }
 0xd34   : > { %v3731_v42 = vpop.xlane.xlu0 %3730 }
 0xd35   : > { %v3759_v24 = vmul.f32 0.0078125, %v3731_v42  ;;  %6249 = vrsqrt.f32 %v3796_v0 }
 0xd37   : > { %v3797_v36 = vadd.f32 1e-05, %v3759_v24 }
 0xd39   : > { %6251 = vrsqrt.f32 %v3797_v36 }
 0xd3b   : > { %v6246_v22 = vpop.eup %6245 }
 0xd3c   : > { %v3826_v27 = vmul.f32 %v6246_v22, %v3778_v15 }
 0xd3d   : > { %v6248_v57 = vpop.eup %6247 }
 0xd3e   : > { %v3827_v54 = vmul.f32 %v6248_v57, %v3779_v1 }
 0xd3f   : > { %v6250_v35 = vpop.eup %6249 }
 0xd40   : > { %v3842_v6 = vpack.c.bf16 %v3827_v54, %v3826_v27  ;;  %v3828_v52 = vmul.f32 %v6250_v35, %v3780_v43 }
 0xd42   : > { %4075 = vmatmul.mubr.bf16.vlgmr.msra.gmra.mrb[80].mxu1 %v3842_v6  ;;  %4188 = vmatmul.mubr.bf16.vlgmr.msra.gmra.mrb[112].mxu0 %v3842_v6 }
 0xd43   : > { %v6252_v46 = vpop.eup %6251  ;;  %4084 = vmatprep.mubr.bf16.mxu1 %v9724_v45  ;;  %4197 = vmatprep.mubr.bf16.mxu0 %v9724_v45 }
 0xd44   : > { %v3829_v49 = vmul.f32 %v6252_v46, %v3781_v55 }
 0xd46   : > { %v3843_v32 = vpack.c.bf16 %v3829_v49, %v3828_v52  ;;  %v3786_v49 = vmul.f32 %v9131_v31, %v9089_v48  ;;  %v3787_v52 = vmul.f32 %v9131_v31, %v9095_v19 }
 0xd4a   : > { %4085 = vmatmul.mubr.bf16.gmra.mrb[84].mxu1 %v3843_v32  ;;  %4198 = vmatmul.mubr.bf16.gmra.mrb[116].mxu0 %v3843_v32 }
 0xd4b   : > { %4094 = vmatprep.mubr.bf16.mxu1 %v9724_v45  ;;  %4207 = vmatprep.mubr.bf16.mxu0 %v9724_v45 }
 0xd65   : > { %v3733_v2 = vpop.xlane.xlu0 %3732 }
 0xd66   : > { %v3760_v21 = vmul.f32 0.0078125, %v3733_v2 }
 0xd67   : > { %v3735_v4 = vpop.xlane.xlu1 %3734 }
 0xd68   : > { %v3798_v58 = vadd.f32 1e-05, %v3760_v21  ;;  %v3761_v33 = vmul.f32 0.0078125, %v3735_v4 }
 0xd69   : > { %v3737_v26 = vpop.xlane.xlu0 %3736 }
 0xd6a   : > { %6253 = vrsqrt.f32 %v3798_v58  ;;  %v3799_v9 = vadd.f32 1e-05, %v3761_v33  ;;  %v3762_v63 = vmul.f32 0.0078125, %v3737_v26 }
 0xd6b   : > { %v3739_v37 = vpop.xlane.xlu1 %3738 }
 0xd6c   : > { %6255 = vrsqrt.f32 %v3799_v9  ;;  %v3763_v60 = vmul.f32 0.0078125, %v3739_v37  ;;  %v3800_v25 = vadd.f32 1e-05, %v3762_v63 }
 0xd6e   : > { %v3801_v53 = vadd.f32 1e-05, %v3763_v60 }
 0xd70   : > { %6257 = vrsqrt.f32 %v3801_v53 }
 0xd71   : > { %6259 = vrsqrt.f32 %v3800_v25  ;;  %v3789_v25 = vmul.f32 %v9131_v31, %v9100_v28 }
 0xd74   : > { %v6254_v20 = vpop.eup %6253 }
 0xd75   : > { %v3830_v3 = vmul.f32 %v6254_v20, %v3782_v47  ;;  %v3788_v47 = vmul.f32 %v9131_v31, %v9092_v16 }
 0xd76   : > { %v6256_v61 = vpop.eup %6255 }
 0xd77   : > { %v3831_v41 = vmul.f32 %v6256_v61, %v3783_v50  ;;  %v5941_v61 = vld [vmem:[#allocation14 + $0x40] sm:$0xff]  }
 0xd78   : > { %5287 = vmatprep.subr.bf16.mxu0 %v5941_v61  ;;  %5671 = vmatprep.subr.bf16.mxu1 %v5941_v61 }
 0xd79   : > { %v3844_v51 = vpack.c.bf16 %v3831_v41, %v3830_v3  ;;  %v5942_v41 = vld [vmem:[#allocation14] sm:$0xff]  }
 0xd7a   : > { %v6258_v23 = vpop.eup %6257  ;;  %5288 = vmatpush3.bf16.msra.mxu0 %v5942_v41  ;;  %5679 = vmatpush3.bf16.msra.mxu1 %v5942_v41 }
 0xd7b   : > { %4095 = vmatmul.mubr.bf16.gmra.mrb[88].mxu1 %v3844_v51  ;;  %4208 = vmatmul.mubr.bf16.gmra.mrb[120].mxu0 %v3844_v51  ;;  %v6260_v18 = vpop.eup %6259  ;;  %v3833_v14 = vmul.f32 %v6258_v23, %v3785_v40  ;;  %v5943_v40 = vld [vmem:[#allocation14 + $0x48] sm:$0xff]  }
 0xd7c   : > { %4104 = vmatprep.mubr.bf16.mxu1 %v9724_v45  ;;  %4217 = vmatprep.mubr.bf16.mxu0 %v9724_v45  ;;  %v3832_v38 = vmul.f32 %v6260_v18, %v3784_v11  ;;  %v5944_v11 = vld [vmem:[#allocation14 + $0x8] sm:$0xff]  }
 0xd7d   : > { %5289 = vmatprep.subr.bf16.mxu0 %v5943_v40  ;;  %5672 = vmatprep.subr.bf16.mxu1 %v5943_v40 }
 0xd7e   : > { %v3845_v44 = vpack.c.bf16 %v3833_v14, %v3832_v38  ;;  %v3791_v14 = vmul.f32 %v9131_v31, %v9115_v8  ;;  %5290 = vmatpush3.bf16.msra.mxu0 %v5944_v11  ;;  %5680 = vmatpush3.bf16.msra.mxu1 %v5944_v11 }
 0xd82   : > { %v3741_v12 = vpop.xlane.xlu0 %3740 }
 0xd83   : > { %v3764_v29 = vmul.f32 0.0078125, %v3741_v12  ;;  %4105 = vmatmul.mubr.bf16.gmra.mrb[92].mxu1 %v3845_v44  ;;  %4218 = vmatmul.mubr.bf16.gmra.mrb[124].mxu0 %v3845_v44  ;;  %v3790_v44 = vmul.f32 %v9131_v31, %v9109_v39 }
 0xd84   : > { %v3743_v0 = vpop.xlane.xlu1 %3742  ;;  %4114 = vmatprep.mubr.bf16.mxu1 %v9724_v45  ;;  %4227 = vmatprep.mubr.bf16.mxu0 %v9724_v45 }
 0xd85   : > { %v3802_v42 = vadd.f32 1e-05, %v3764_v29  ;;  %v3765_v24 = vmul.f32 0.0078125, %v3743_v0  ;;  %v5945_v29 = vld [vmem:[#allocation14 + $0x50] sm:$0xff]  }
 0xd86   : > { %v3745_v36 = vpop.xlane.xlu0 %3744  ;;  %v5946_v0 = vld [vmem:[#allocation14 + $0x10] sm:$0xff]   ;;  %5291 = vmatprep.subr.bf16.mxu0 %v5945_v29  ;;  %5673 = vmatprep.subr.bf16.mxu1 %v5945_v29 }
 0xd87   : > { %6261 = vrsqrt.f32 %v3802_v42  ;;  %v3803_v22 = vadd.f32 1e-05, %v3765_v24  ;;  %v3766_v15 = vmul.f32 0.0078125, %v3745_v36  ;;  %v5947_v36 = vld [vmem:[#allocation14 + $0x58] sm:$0xff]   ;;  %5292 = vmatpush3.bf16.msra.mxu0 %v5946_v0  ;;  %5681 = vmatpush3.bf16.msra.mxu1 %v5946_v0 }
 0xd88   : > { %v3747_v1 = vpop.xlane.xlu1 %3746  ;;  %5293 = vmatprep.subr.bf16.mxu0 %v5947_v36  ;;  %5674 = vmatprep.subr.bf16.mxu1 %v5947_v36 }
 0xd89   : > { %6263 = vrsqrt.f32 %v3803_v22  ;;  %v3767_v57 = vmul.f32 0.0078125, %v3747_v1  ;;  %v3804_v27 = vadd.f32 1e-05, %v3766_v15  ;;  %v5948_v15 = vld [vmem:[#allocation14 + $0x18] sm:$0xff]   ;;  %v3793_v1 = vmul.f32 %v9131_v31, %v9120_v62 }
 0xd8b   : > { %v3805_v54 = vadd.f32 1e-05, %v3767_v57  ;;  %5294 = vmatpush3.bf16.msra.mxu0 %v5948_v15  ;;  %5682 = vmatpush3.bf16.msra.mxu1 %v5948_v15 }
 0xd8d   : > { %6265 = vrsqrt.f32 %v3805_v54 }
 0xd8e   : > { %v3749_v6 = vpop.xlane.xlu0 %3748  ;;  %6267 = vrsqrt.f32 %v3804_v27  ;;  %v3792_v27 = vmul.f32 %v9131_v31, %v9112_v34  ;;  %v5954_v31 = vld [vmem:[#allocation14 + $0x30] sm:$0xff]  }
 0xd8f   : > { %v3768_v35 = vmul.f32 0.0078125, %v3749_v6  ;;  %v5949_v6 = vld [vmem:[#allocation14 + $0x60] sm:$0xff]  }
 0xd90   : > { %v3751_v55 = vpop.xlane.xlu1 %3750  ;;  %5295 = vmatprep.subr.bf16.mxu0 %v5949_v6  ;;  %5675 = vmatprep.subr.bf16.mxu1 %v5949_v6 }
 0xd91   : > { %v6262_v46 = vpop.eup %6261  ;;  %v3769_v43 = vmul.f32 0.0078125, %v3751_v55  ;;  %v3806_v2 = vadd.f32 1e-05, %v3768_v35  ;;  %v5950_v35 = vld [vmem:[#allocation14 + $0x20] sm:$0xff]  }
 0xd92   : > { %v3753_v4 = vpop.xlane.xlu0 %3752  ;;  %v3834_v33 = vmul.f32 %v6262_v46, %v3786_v49  ;;  %5296 = vmatpush3.bf16.msra.mxu0 %v5950_v35  ;;  %v5952_v49 = vld [vmem:[#allocation14 + $0x28] sm:$0xff]   ;;  %5683 = vmatpush3.bf16.msra.mxu1 %v5950_v35 }
 0xd93   : > { %v6264_v32 = vpop.eup %6263  ;;  %v3807_v21 = vadd.f32 1e-05, %v3769_v43  ;;  %v3770_v60 = vmul.f32 0.0078125, %v3753_v4  ;;  %v5951_v43 = vld [vmem:[#allocation14 + $0x68] sm:$0xff]  }
 0xd94   : > { %v3755_v58 = vpop.xlane.xlu1 %3754  ;;  %v3835_v26 = vmul.f32 %v6264_v32, %v3787_v52  ;;  %5297 = vmatprep.subr.bf16.mxu0 %v5951_v43  ;;  %5676 = vmatprep.subr.bf16.mxu1 %v5951_v43  ;;  %v5955_v52 = vld [vmem:[#allocation14 + $0x78] sm:$0xff]  }
 0xd95   : > { %6269 = vrsqrt.f32 %v3807_v21  ;;  %v3771_v9 = vmul.f32 0.0078125, %v3755_v58  ;;  %v3808_v3 = vadd.f32 1e-05, %v3770_v60  ;;  %v5956_v32 = vld [vmem:[#allocation14 + $0x38] sm:$0xff]  }
 0xd96   : > { %v3846_v63 = vpack.c.bf16 %v3835_v26, %v3834_v33  ;;  %6271 = vrsqrt.f32 %v3806_v2  ;;  %5298 = vmatpush3.bf16.msra.mxu0 %v5952_v49  ;;  %5684 = vmatpush3.bf16.msra.mxu1 %v5952_v49 }
 0xd97   : > { %v6266_v37 = vpop.eup %6265  ;;  %v3809_v20 = vadd.f32 1e-05, %v3771_v9 }
 0xd98   : > { %4115 = vmatmul.mubr.bf16.gmra.mrb[96].mxu1 %v3846_v63  ;;  %4228 = vmatmul.mubr.bf16.gmra.mrb[128].mxu0 %v3846_v63  ;;  %v6268_v53 = vpop.eup %6267  ;;  %v3837_v50 = vmul.f32 %v6266_v37, %v3789_v25 }
 0xd99   : > { %4124 = vmatprep.mubr.bf16.mxu1 %v9724_v45  ;;  %4237 = vmatprep.mubr.bf16.mxu0 %v9724_v45  ;;  %v3836_v51 = vmul.f32 %v6268_v53, %v3788_v47  ;;  %6273 = vrsqrt.f32 %v3809_v20 }
 0xd9a   : > { %6275 = vrsqrt.f32 %v3808_v3 }
 0xd9b   : > { %v3847_v23 = vpack.c.bf16 %v3837_v50, %v3836_v51 }
 0xd9f   : > { %v6270_v18 = vpop.eup %6269 }
 0xda0   : > { %4125 = vmatmul.mubr.bf16.gmra.mrb[100].mxu1 %v3847_v23  ;;  %4238 = vmatmul.mubr.bf16.gmra.mrb[132].mxu0 %v3847_v23  ;;  %v6272_v38 = vpop.eup %6271  ;;  %v3839_v12 = vmul.f32 %v6270_v18, %v3791_v14 }
 0xda1   : > { %4134 = vmatprep.mubr.bf16.mxu1 %v9724_v45  ;;  %4247 = vmatprep.mubr.bf16.mxu0 %v9724_v45  ;;  %v3838_v42 = vmul.f32 %v6272_v38, %v3790_v44 }
 0xda3   : > { %v3848_v24 = vpack.c.bf16 %v3839_v12, %v3838_v42  ;;  %v6274_v22 = vpop.eup %6273 }
 0xda4   : > { %v6276_v57 = vpop.eup %6275  ;;  %v3841_v54 = vmul.f32 %v6274_v22, %v3793_v1 }
 0xda5   : > { %v3840_v55 = vmul.f32 %v6276_v57, %v3792_v27 }
 0xda7   : > { %v3849_v46 = vpack.c.bf16 %v3841_v54, %v3840_v55 }
 0xda8   : > { %4135 = vmatmul.mubr.bf16.gmra.mrb[104].mxu1 %v3848_v24  ;;  %4248 = vmatmul.mubr.bf16.gmra.mrb[136].mxu0 %v3848_v24 }
 0xda9   : > { %4144 = vmatprep.mubr.bf16.mxu1 %v9724_v45  ;;  %4257 = vmatprep.mubr.bf16.mxu0 %v9724_v45  ;;  %v5953_v45 = vld [vmem:[#allocation14 + $0x70] sm:$0xff]  }
 0xdaa   : > { %5299 = vmatprep.subr.bf16.mxu0 %v5953_v45  ;;  %5677 = vmatprep.subr.bf16.mxu1 %v5953_v45 }
 0xdab   : > { %5300 = vmatpush3.bf16.msra.mxu0 %v5954_v31  ;;  %5685 = vmatpush3.bf16.msra.mxu1 %v5954_v31 }
 0xdac   : > { %5301 = vmatprep.subr.bf16.mxu0 %v5955_v52  ;;  %5678 = vmatprep.subr.bf16.mxu1 %v5955_v52 }
 0xdaf   : > { %5302 = vmatpush3.bf16.msra.mxu0 %v5956_v32  ;;  %5686 = vmatpush3.bf16.msra.mxu1 %v5956_v32 }
 0xdb0   : > { %4145 = vmatmul.mubr.bf16.gmra.mrb[108].mxu1 %v3849_v46  ;;  %4258 = vmatmul.mubr.bf16.gmra.mrb[140].mxu0 %v3849_v46 }
 0xe15   : > { %v4076_v2 = vpop.f32.mrb[80].mxu1  ;;  %v4189_v21 = vpop.f32.mrb[112].mxu0 }
 0xe16   : > { %v5072_v4 = vmul.f32 -1.442695, %v4076_v2  ;;  %v4078_v58 = vpop.f32.mrb[81].mxu1  ;;  %v4191_v33 = vpop.f32.mrb[113].mxu0 }
 0xe17   : > { %v5073_v26 = vmul.f32 -1.442695, %v4078_v58  ;;  %v4080_v9 = vpop.f32.mrb[82].mxu1  ;;  %v4193_v63 = vpop.f32.mrb[114].mxu0 }
 0xe18   : > { %6277 = vpow2.f32 %v5072_v4  ;;  %v5074_v37 = vmul.f32 -1.442695, %v4080_v9  ;;  %v4082_v60 = vpop.f32.mrb[83].mxu1  ;;  %v4195_v25 = vpop.f32.mrb[115].mxu0 }
 0xe19   : > { %6279 = vpow2.f32 %v5073_v26  ;;  %v5075_v53 = vmul.f32 -1.442695, %v4082_v60 }
 0xe1a   : > { %6281 = vpow2.f32 %v5074_v37 }
 0xe1b   : > { %6283 = vpow2.f32 %v5075_v53 }
 0xe1d   : > { %v4086_v20 = vpop.f32.mrb[84].mxu1  ;;  %v4199_v47 = vpop.f32.mrb[116].mxu0 }
 0xe1e   : > { %v5076_v50 = vmul.f32 -1.442695, %v4086_v20  ;;  %v4088_v61 = vpop.f32.mrb[85].mxu1  ;;  %v4201_v3 = vpop.f32.mrb[117].mxu0 }
 0xe1f   : > { %v5077_v41 = vmul.f32 -1.442695, %v4088_v61  ;;  %v4090_v51 = vpop.f32.mrb[86].mxu1  ;;  %v4203_v23 = vpop.f32.mrb[118].mxu0 }
 0xe20   : > { %6285 = vpow2.f32 %v5076_v50  ;;  %v5078_v40 = vmul.f32 -1.442695, %v4090_v51  ;;  %v4092_v18 = vpop.f32.mrb[87].mxu1  ;;  %v4205_v11 = vpop.f32.mrb[119].mxu0 }
 0xe21   : > { %6287 = vpow2.f32 %v5077_v41  ;;  %v5079_v14 = vmul.f32 -1.442695, %v4092_v18 }
 0xe22   : > { %v6278_v38 = vpop.eup %6277  ;;  %6289 = vpow2.f32 %v5078_v40 }
 0xe23   : > { %v6280_v44 = vpop.eup %6279  ;;  %v4364_v12 = vadd.f32 1.0, %v6278_v38  ;;  %6291 = vpow2.f32 %v5079_v14 }
 0xe24   : > { %v6282_v29 = vpop.eup %6281  ;;  %v4365_v0 = vadd.f32 1.0, %v6280_v44 }
 0xe25   : > { %v6284_v42 = vpop.eup %6283  ;;  %6293 = vrcp.f32 %v4364_v12  ;;  %v4366_v24 = vadd.f32 1.0, %v6282_v29 }
 0xe26   : > { %6295 = vrcp.f32 %v4365_v0  ;;  %v4367_v36 = vadd.f32 1.0, %v6284_v42 }
 0xe27   : > { %6297 = vrcp.f32 %v4366_v24 }
 0xe28   : > { %6299 = vrcp.f32 %v4367_v36 }
 0xe2a   : > { %v6286_v22 = vpop.eup %6285 }
 0xe2b   : > { %v6288_v15 = vpop.eup %6287  ;;  %v4368_v1 = vadd.f32 1.0, %v6286_v22 }
 0xe2c   : > { %v6290_v57 = vpop.eup %6289  ;;  %v4369_v27 = vadd.f32 1.0, %v6288_v15 }
 0xe2d   : > { %v6292_v54 = vpop.eup %6291  ;;  %6301 = vrcp.f32 %v4368_v1  ;;  %v4370_v6 = vadd.f32 1.0, %v6290_v57 }
 0xe2e   : > { %6303 = vrcp.f32 %v4369_v27  ;;  %v4371_v35 = vadd.f32 1.0, %v6292_v54 }
 0xe2f   : > { %v6294_v55 = vpop.eup %6293  ;;  %6305 = vrcp.f32 %v4370_v6 }
 0xe30   : > { %v6296_v46 = vpop.eup %6295  ;;  %v4460_v43 = vmul.f32 %v6294_v55, %v4076_v2  ;;  %6307 = vrcp.f32 %v4371_v35 }
 0xe31   : > { %v6298_v49 = vpop.eup %6297  ;;  %v4461_v45 = vmul.f32 %v6296_v46, %v4078_v58 }
 0xe32   : > { %v6300_v31 = vpop.eup %6299  ;;  %v4492_v52 = vmul.f32 %v4460_v43, %v4189_v21  ;;  %v4462_v32 = vmul.f32 %v6298_v49, %v4080_v9 }
 0xe33   : > { %v4493_v4 = vmul.f32 %v4461_v45, %v4191_v33  ;;  %v4463_v26 = vmul.f32 %v6300_v31, %v4082_v60 }
 0xe34   : > { %v4494_v37 = vmul.f32 %v4462_v32, %v4193_v63 }
 0xe35   : > { %v4495_v53 = vmul.f32 %v4463_v26, %v4195_v25 }
 0xe36   : > { %v4524_v50 = vpack.c.bf16 %v4494_v37, %v4492_v52 }
 0xe37   : > { %v6302_v41 = vpop.eup %6301  ;;  %v4525_v40 = vpack.c.bf16 %v4495_v53, %v4493_v4 }
 0xe38   : > { %v6304_v14 = vpop.eup %6303  ;;  %v4464_v38 = vmul.f32 %v6302_v41, %v4086_v20 }
 0xe39   : > { %v6306_v44 = vpop.eup %6305  ;;  %v4465_v12 = vmul.f32 %v6304_v14, %v4088_v61  ;;  %4700 = vmatprep.mubr.bf16.mxu0 %v4525_v40 }
 0xe3a   : > { %v6308_v29 = vpop.eup %6307  ;;  %v4496_v2 = vmul.f32 %v4464_v38, %v4199_v47  ;;  %v4466_v0 = vmul.f32 %v6306_v44, %v4090_v51  ;;  %4701 = vmatmul.mubr.bf16.vlgmr.msra.gmra.mrb[144].mxu0 %v4524_v50 }
 0xe3b   : > { %v4497_v58 = vmul.f32 %v4465_v12, %v4201_v3  ;;  %v4467_v42 = vmul.f32 %v6308_v29, %v4092_v18 }
 0xe3c   : > { %v4498_v21 = vmul.f32 %v4466_v0, %v4203_v23 }
 0xe3d   : > { %v4499_v9 = vmul.f32 %v4467_v42, %v4205_v11 }
 0xe3e   : > { %v4526_v33 = vpack.c.bf16 %v4498_v21, %v4496_v2 }
 0xe3f   : > { %v4527_v60 = vpack.c.bf16 %v4499_v9, %v4497_v58 }
 0xe41   : > { %4708 = vmatprep.mubr.bf16.mxu0 %v4527_v60 }
 0xe42   : > { %4709 = vmatmul.mubr.bf16.gmra.mrb[148].mxu0 %v4526_v33 }
 0xe4e   : > { %v4096_v63 = vpop.f32.mrb[88].mxu1  ;;  %v4209_v25 = vpop.f32.mrb[120].mxu0 }
 0xe4f   : > { %v5080_v24 = vmul.f32 -1.442695, %v4096_v63  ;;  %v4098_v36 = vpop.f32.mrb[89].mxu1  ;;  %v4211_v20 = vpop.f32.mrb[121].mxu0 }
 0xe50   : > { %v5081_v22 = vmul.f32 -1.442695, %v4098_v36  ;;  %v4100_v61 = vpop.f32.mrb[90].mxu1  ;;  %v9179_v15 = vpop.f32.mrb[122].mxu0 }
 0xe51   : > { %6309 = vpow2.f32 %v5080_v24  ;;  %v5082_v47 = vmul.f32 -1.442695, %v4100_v61  ;;  %v4102_v51 = vpop.f32.mrb[91].mxu1  ;;  %v9181_v3 = vpop.f32.mrb[123].mxu0 }
 0xe52   : > { %6311 = vpow2.f32 %v5081_v22  ;;  %v5083_v23 = vmul.f32 -1.442695, %v4102_v51 }
 0xe53   : > { %6313 = vpow2.f32 %v5082_v47 }
 0xe54   : > { %6315 = vpow2.f32 %v5083_v23 }
 0xe56   : > { %v9183_v18 = vpop.f32.mrb[92].mxu1  ;;  %v9185_v11 = vpop.f32.mrb[124].mxu0 }
 0xe57   : > { %v5084_v1 = vmul.f32 -1.442695, %v9183_v18  ;;  %v9188_v57 = vpop.f32.mrb[93].mxu1  ;;  %v9190_v27 = vpop.f32.mrb[125].mxu0 }
 0xe58   : > { %v5085_v54 = vmul.f32 -1.442695, %v9188_v57  ;;  %v9193_v6 = vpop.f32.mrb[94].mxu1  ;;  %v9195_v35 = vpop.f32.mrb[126].mxu0 }
 0xe59   : > { %6317 = vpow2.f32 %v5084_v1  ;;  %v5086_v55 = vmul.f32 -1.442695, %v9193_v6  ;;  %v9198_v46 = vpop.f32.mrb[95].mxu1  ;;  %v9200_v43 = vpop.f32.mrb[127].mxu0 }
 0xe5a   : > { %6319 = vpow2.f32 %v5085_v54  ;;  %v5087_v49 = vmul.f32 -1.442695, %v9198_v46 }
 0xe5b   : > { %v6310_v45 = vpop.eup %6309  ;;  %6321 = vpow2.f32 %v5086_v55 }
 0xe5c   : > { %v6312_v31 = vpop.eup %6311  ;;  %v4372_v52 = vadd.f32 1.0, %v6310_v45  ;;  %6323 = vpow2.f32 %v5087_v49 }
 0xe5d   : > { %v6314_v32 = vpop.eup %6313  ;;  %v4373_v4 = vadd.f32 1.0, %v6312_v31 }
 0xe5e   : > { %v6316_v26 = vpop.eup %6315  ;;  %6325 = vrcp.f32 %v4372_v52  ;;  %v4374_v37 = vadd.f32 1.0, %v6314_v32 }
 0xe5f   : > { %6327 = vrcp.f32 %v4373_v4  ;;  %v4375_v53 = vadd.f32 1.0, %v6316_v26 }
 0xe60   : > { %6329 = vrcp.f32 %v4374_v37 }
 0xe61   : > { %6331 = vrcp.f32 %v4375_v53 }
 0xe63   : > { %v6318_v50 = vpop.eup %6317 }
 0xe64   : > { %v6320_v41 = vpop.eup %6319  ;;  %v4376_v40 = vadd.f32 1.0, %v6318_v50 }
 0xe65   : > { %v6322_v14 = vpop.eup %6321  ;;  %v4377_v38 = vadd.f32 1.0, %v6320_v41 }
 0xe66   : > { %v6324_v44 = vpop.eup %6323  ;;  %6333 = vrcp.f32 %v4376_v40  ;;  %v4378_v12 = vadd.f32 1.0, %v6322_v14 }
 0xe67   : > { %6335 = vrcp.f32 %v4377_v38  ;;  %v4379_v29 = vadd.f32 1.0, %v6324_v44 }
 0xe68   : > { %v6326_v2 = vpop.eup %6325  ;;  %6337 = vrcp.f32 %v4378_v12 }
 0xe69   : > { %v6328_v0 = vpop.eup %6327  ;;  %v4468_v58 = vmul.f32 %v6326_v2, %v4096_v63  ;;  %6339 = vrcp.f32 %v4379_v29 }
 0xe6a   : > { %v6330_v42 = vpop.eup %6329  ;;  %v4469_v21 = vmul.f32 %v6328_v0, %v4098_v36 }
 0xe6b   : > { %v6332_v9 = vpop.eup %6331  ;;  %v4500_v33 = vmul.f32 %v4468_v58, %v4209_v25  ;;  %v4470_v60 = vmul.f32 %v6330_v42, %v4100_v61  ;;  %v9203_v24 = vpop.f32.mrb[96].mxu1 }
 0xe6c   : > { %v9205_v22 = vpop.f32.mrb[128].mxu0  ;;  %v4501_v47 = vmul.f32 %v4469_v21, %v4211_v20  ;;  %v4471_v23 = vmul.f32 %v6332_v9, %v4102_v51  ;;  %v5088_v1 = vmul.f32 -1.442695, %v9203_v24  ;;  %v9208_v54 = vpop.f32.mrb[97].mxu1 }
 0xe6d   : > { %v9210_v55 = vpop.f32.mrb[129].mxu0  ;;  %v4502_v63 = vmul.f32 %v4470_v60, %v9179_v15  ;;  %v5089_v49 = vmul.f32 -1.442695, %v9208_v54  ;;  %v9214_v36 = vpop.f32.mrb[98].mxu1 }
 0xe6e   : > { %v9216_v25 = vpop.f32.mrb[130].mxu0  ;;  %v4503_v61 = vmul.f32 %v4471_v23, %v9181_v3  ;;  %6341 = vpow2.f32 %v5088_v1  ;;  %v5090_v20 = vmul.f32 -1.442695, %v9214_v36  ;;  %v9220_v51 = vpop.f32.mrb[99].mxu1 }
 0xe6f   : > { %v9222_v45 = vpop.f32.mrb[131].mxu0  ;;  %v4528_v31 = vpack.c.bf16 %v4502_v63, %v4500_v33  ;;  %6343 = vpow2.f32 %v5089_v49  ;;  %v5091_v52 = vmul.f32 -1.442695, %v9220_v51 }
 0xe70   : > { %v6334_v15 = vpop.eup %6333  ;;  %v4529_v32 = vpack.c.bf16 %v4503_v61, %v4501_v47  ;;  %6345 = vpow2.f32 %v5090_v20 }
 0xe71   : > { %v6336_v4 = vpop.eup %6335  ;;  %v4472_v26 = vmul.f32 %v6334_v15, %v9183_v18  ;;  %6347 = vpow2.f32 %v5091_v52 }
 0xe72   : > { %v6338_v37 = vpop.eup %6337  ;;  %v4473_v3 = vmul.f32 %v6336_v4, %v9188_v57  ;;  %4716 = vmatprep.mubr.bf16.mxu1 %v4529_v32 }
 0xe73   : > { %v6340_v53 = vpop.eup %6339  ;;  %v4504_v50 = vmul.f32 %v4472_v26, %v9185_v11  ;;  %v4474_v41 = vmul.f32 %v6338_v37, %v9193_v6  ;;  %v9229_v40 = vpop.f32.mrb[100].mxu1  ;;  %4717 = vmatmul.mubr.bf16.vlgmr.msra.gmra.mrb[112].mxu1 %v4528_v31 }
 0xe74   : > { %v9231_v14 = vpop.f32.mrb[132].mxu0  ;;  %v4505_v38 = vmul.f32 %v4473_v3, %v9190_v27  ;;  %v4475_v44 = vmul.f32 %v6340_v53, %v9198_v46  ;;  %v5092_v18 = vmul.f32 -1.442695, %v9229_v40  ;;  %v9236_v12 = vpop.f32.mrb[101].mxu1 }
 0xe75   : > { %v9238_v57 = vpop.f32.mrb[133].mxu0  ;;  %v4506_v29 = vmul.f32 %v4474_v41, %v9195_v35  ;;  %v5093_v11 = vmul.f32 -1.442695, %v9236_v12  ;;  %v9242_v6 = vpop.f32.mrb[102].mxu1 }
 0xe76   : > { %v9244_v2 = vpop.f32.mrb[134].mxu0  ;;  %v4507_v0 = vmul.f32 %v4475_v44, %v9200_v43  ;;  %6349 = vpow2.f32 %v5092_v18  ;;  %v5094_v27 = vmul.f32 -1.442695, %v9242_v6  ;;  %v9248_v46 = vpop.f32.mrb[103].mxu1 }
 0xe77   : > { %v9250_v58 = vpop.f32.mrb[135].mxu0  ;;  %v4530_v42 = vpack.c.bf16 %v4506_v29, %v4504_v50  ;;  %6351 = vpow2.f32 %v5093_v11  ;;  %v5095_v21 = vmul.f32 -1.442695, %v9248_v46 }
 0xe78   : > { %v6342_v35 = vpop.eup %6341  ;;  %v4531_v9 = vpack.c.bf16 %v4507_v0, %v4505_v38  ;;  %6353 = vpow2.f32 %v5094_v27 }
 0xe79   : > { %v6344_v33 = vpop.eup %6343  ;;  %v4380_v60 = vadd.f32 1.0, %v6342_v35  ;;  %6355 = vpow2.f32 %v5095_v21 }
 0xe7a   : > { %v6346_v47 = vpop.eup %6345  ;;  %v4381_v23 = vadd.f32 1.0, %v6344_v33  ;;  %4724 = vmatprep.mubr.bf16.mxu1 %v4531_v9 }
 0xe7b   : > { %v6348_v43 = vpop.eup %6347  ;;  %6357 = vrcp.f32 %v4380_v60  ;;  %v4382_v1 = vadd.f32 1.0, %v6346_v47  ;;  %v9253_v63 = vpop.f32.mrb[104].mxu1  ;;  %4725 = vmatmul.mubr.bf16.gmra.mrb[116].mxu1 %v4530_v42 }
 0xe7c   : > { %v9255_v49 = vpop.f32.mrb[136].mxu0  ;;  %6359 = vrcp.f32 %v4381_v23  ;;  %v4383_v61 = vadd.f32 1.0, %v6348_v43  ;;  %v5096_v20 = vmul.f32 -1.442695, %v9253_v63  ;;  %v9258_v31 = vpop.f32.mrb[105].mxu1 }
 0xe7d   : > { %v9260_v52 = vpop.f32.mrb[137].mxu0  ;;  %6361 = vrcp.f32 %v4382_v1  ;;  %v5097_v15 = vmul.f32 -1.442695, %v9258_v31  ;;  %v9263_v32 = vpop.f32.mrb[106].mxu1 }
 0xe7e   : > { %v9265_v4 = vpop.f32.mrb[138].mxu0  ;;  %6363 = vrcp.f32 %v4383_v61  ;;  %v5098_v26 = vmul.f32 -1.442695, %v9263_v32  ;;  %v9268_v37 = vpop.f32.mrb[107].mxu1 }
 0xe7f   : > { %v9270_v3 = vpop.f32.mrb[139].mxu0  ;;  %6365 = vpow2.f32 %v5096_v20  ;;  %v5099_v53 = vmul.f32 -1.442695, %v9268_v37 }
 0xe80   : > { %v6350_v50 = vpop.eup %6349  ;;  %6367 = vpow2.f32 %v5097_v15 }
 0xe81   : > { %v6352_v41 = vpop.eup %6351  ;;  %v4384_v38 = vadd.f32 1.0, %v6350_v50  ;;  %6369 = vpow2.f32 %v5098_v26 }
 0xe82   : > { %v6354_v44 = vpop.eup %6353  ;;  %v4385_v18 = vadd.f32 1.0, %v6352_v41  ;;  %6371 = vpow2.f32 %v5099_v53 }
 0xe83   : > { %v6356_v29 = vpop.eup %6355  ;;  %6373 = vrcp.f32 %v4384_v38  ;;  %v4386_v11 = vadd.f32 1.0, %v6354_v44  ;;  %v9273_v0 = vpop.f32.mrb[108].mxu1 }
 0xe84   : > { %v9275_v27 = vpop.f32.mrb[140].mxu0  ;;  %6375 = vrcp.f32 %v4385_v18  ;;  %v4387_v42 = vadd.f32 1.0, %v6356_v29  ;;  %v5100_v21 = vmul.f32 -1.442695, %v9273_v0  ;;  %v9278_v35 = vpop.f32.mrb[109].mxu1 }
 0xe85   : > { %v9280_v9 = vpop.f32.mrb[141].mxu0  ;;  %v6358_v33 = vpop.eup %6357  ;;  %6377 = vrcp.f32 %v4386_v11  ;;  %v5101_v60 = vmul.f32 -1.442695, %v9278_v35 }
 0xe86   : > { %v9283_v47 = vpop.f32.mrb[110].mxu1  ;;  %v9285_v23 = vpop.f32.mrb[142].mxu0  ;;  %v4476_v1 = vmul.f32 %v6358_v33, %v9203_v24  ;;  %6379 = vrcp.f32 %v4387_v42 }
 0xe87   : > { %v6360_v43 = vpop.eup %6359  ;;  %v5102_v61 = vmul.f32 -1.442695, %v9283_v47  ;;  %v9289_v20 = vpop.f32.mrb[111].mxu1  ;;  %6381 = vpow2.f32 %v5100_v21 }
 0xe88   : > { %v9291_v15 = vpop.f32.mrb[143].mxu0  ;;  %v6362_v26 = vpop.eup %6361  ;;  %v4477_v53 = vmul.f32 %v6360_v43, %v9208_v54  ;;  %v5103_v50 = vmul.f32 -1.442695, %v9289_v20  ;;  %v4508_v38 = vmul.f32 %v4476_v1, %v9205_v22  ;;  %6383 = vpow2.f32 %v5101_v60 }
 0xe89   : > { %v6364_v41 = vpop.eup %6363  ;;  %v4478_v44 = vmul.f32 %v6362_v26, %v9214_v36  ;;  %6385 = vpow2.f32 %v5102_v61 }
 0xe8a   : > { %v6366_v24 = vpop.eup %6365  ;;  %v4509_v18 = vmul.f32 %v4477_v53, %v9210_v55  ;;  %v4479_v29 = vmul.f32 %v6364_v41, %v9220_v51  ;;  %6387 = vpow2.f32 %v5103_v50 }
 0xe8b   : > { %v6368_v11 = vpop.eup %6367  ;;  %v4510_v42 = vmul.f32 %v4478_v44, %v9216_v25  ;;  %v4388_v33 = vadd.f32 1.0, %v6366_v24 }
 0xe8c   : > { %v6370_v54 = vpop.eup %6369  ;;  %v4511_v21 = vmul.f32 %v4479_v29, %v9222_v45  ;;  %v4389_v43 = vadd.f32 1.0, %v6368_v11 }
 0xe8d   : > { %v6372_v62 = vpop.eup %6371  ;;  %v4532_v22 = vpack.c.bf16 %v4510_v42, %v4508_v38  ;;  %6389 = vrcp.f32 %v4388_v33  ;;  %v4390_v36 = vadd.f32 1.0, %v6370_v54 }
 0xe8e   : > { %v6374_v60 = vpop.eup %6373  ;;  %v4533_v1 = vpack.c.bf16 %v4511_v21, %v4509_v18  ;;  %6391 = vrcp.f32 %v4389_v43  ;;  %v4391_v55 = vadd.f32 1.0, %v6372_v62 }
 0xe8f   : > { %v6376_v26 = vpop.eup %6375  ;;  %v4480_v51 = vmul.f32 %v6374_v60, %v9229_v40  ;;  %6393 = vrcp.f32 %v4390_v36 }
 0xe90   : > { %v6378_v61 = vpop.eup %6377  ;;  %v4481_v25 = vmul.f32 %v6376_v26, %v9236_v12  ;;  %6395 = vrcp.f32 %v4391_v55  ;;  %4732 = vmatprep.mubr.bf16.mxu1 %v4533_v1 }
 0xe91   : > { %v6380_v53 = vpop.eup %6379  ;;  %v4512_v45 = vmul.f32 %v4480_v51, %v9231_v14  ;;  %v4482_v50 = vmul.f32 %v6378_v61, %v9242_v6  ;;  %4733 = vmatmul.mubr.bf16.gmra.mrb[120].mxu1 %v4532_v22 }
 0xe92   : > { %v6382_v41 = vpop.eup %6381  ;;  %v4513_v38 = vmul.f32 %v4481_v25, %v9238_v57  ;;  %v4483_v62 = vmul.f32 %v6380_v53, %v9248_v46 }
 0xe93   : > { %v6384_v44 = vpop.eup %6383  ;;  %v4514_v40 = vmul.f32 %v4482_v50, %v9244_v2  ;;  %v4392_v24 = vadd.f32 1.0, %v6382_v41 }
 0xe94   : > { %v6386_v18 = vpop.eup %6385  ;;  %v4515_v12 = vmul.f32 %v4483_v62, %v9250_v58  ;;  %v4393_v29 = vadd.f32 1.0, %v6384_v44 }
 0xe95   : > { %v6388_v11 = vpop.eup %6387  ;;  %v4534_v42 = vpack.c.bf16 %v4514_v40, %v4512_v45  ;;  %6397 = vrcp.f32 %v4392_v24  ;;  %v4394_v14 = vadd.f32 1.0, %v6386_v18 }
 0xe96   : > { %v4535_v33 = vpack.c.bf16 %v4515_v12, %v4513_v38  ;;  %6399 = vrcp.f32 %v4393_v29  ;;  %v4395_v6 = vadd.f32 1.0, %v6388_v11 }
 0xe97   : > { %v6390_v54 = vpop.eup %6389  ;;  %6401 = vrcp.f32 %v4394_v14 }
 0xe98   : > { %v6392_v57 = vpop.eup %6391  ;;  %v4484_v46 = vmul.f32 %v6390_v54, %v9253_v63  ;;  %6403 = vrcp.f32 %v4395_v6  ;;  %4740 = vmatprep.mubr.bf16.mxu1 %v4535_v33 }
 0xe99   : > { %v6394_v2 = vpop.eup %6393  ;;  %v4485_v21 = vmul.f32 %v6392_v57, %v9258_v31  ;;  %4741 = vmatmul.mubr.bf16.gmra.mrb[124].mxu1 %v4534_v42 }
 0xe9a   : > { %v6396_v58 = vpop.eup %6395  ;;  %v4516_v43 = vmul.f32 %v4484_v46, %v9255_v49  ;;  %v4486_v22 = vmul.f32 %v6394_v2, %v9263_v32 }
 0xe9b   : > { %v4517_v36 = vmul.f32 %v4485_v21, %v9260_v52  ;;  %v4487_v60 = vmul.f32 %v6396_v58, %v9268_v37 }
 0xe9c   : > { %v4518_v1 = vmul.f32 %v4486_v22, %v9265_v4 }
 0xe9d   : > { %v4519_v55 = vmul.f32 %v4487_v60, %v9270_v3 }
 0xe9e   : > { %v4536_v63 = vpack.c.bf16 %v4518_v1, %v4516_v43 }
 0xe9f   : > { %v6398_v26 = vpop.eup %6397  ;;  %v4537_v51 = vpack.c.bf16 %v4519_v55, %v4517_v36 }
 0xea0   : > { %v6400_v61 = vpop.eup %6399  ;;  %v4488_v31 = vmul.f32 %v6398_v26, %v9273_v0 }
 0xea1   : > { %v6402_v25 = vpop.eup %6401  ;;  %v4489_v53 = vmul.f32 %v6400_v61, %v9278_v35  ;;  %4748 = vmatprep.mubr.bf16.mxu1 %v4537_v51 }
 0xea2   : > { %v6404_v49 = vpop.eup %6403  ;;  %v4520_v32 = vmul.f32 %v4488_v31, %v9275_v27  ;;  %v4490_v52 = vmul.f32 %v6402_v25, %v9283_v47  ;;  %4749 = vmatmul.mubr.bf16.gmra.mrb[128].mxu1 %v4536_v63 }
 0xea3   : > { %v4521_v4 = vmul.f32 %v4489_v53, %v9280_v9  ;;  %v4491_v37 = vmul.f32 %v6404_v49, %v9289_v20 }
 0xea4   : > { %v4522_v3 = vmul.f32 %v4490_v52, %v9285_v23 }
 0xea5   : > { %v4523_v45 = vmul.f32 %v4491_v37, %v9291_v15 }
 0xea6   : > { %v4538_v0 = vpack.c.bf16 %v4522_v3, %v4520_v32 }
 0xea7   : > { %v4539_v50 = vpack.c.bf16 %v4523_v45, %v4521_v4 }
 0xea9   : > { %4756 = vmatprep.mubr.bf16.mxu1 %v4539_v50 }
 0xeaa   : > { %4757 = vmatmul.mubr.bf16.gmra.mrb[132].mxu1 %v4538_v0 }
 0xf0d   : > { %v5303_v35 = vpop.f32.mrb[144].mxu0 }
 0xf0e   : > { %v5304_v41 = vpop.f32.mrb[145].mxu0 }
 0xf0f   : > { %v5305_v38 = vadd.f32 %v5304_v41, %v5303_v35  ;;  %v5306_v27 = vpop.f32.mrb[146].mxu0 }
 0xf10   : > { %v5307_v62 = vpop.f32.mrb[147].mxu0 }
 0xf11   : > { %v4765_v47 = vadd.f32 %v5305_v38, %v9049_v13  ;;  %v5308_v44 = vadd.f32 %v5307_v62, %v5306_v27 }
 0xf13   : > { %4781 = vst [vmem:[%s9328_s28] sm:$0xff] %v4765_v47  ;;  %v4766_v9 = vadd.f32 %v5308_v44, %v9055_v17 }
 0xf15   : > { %4782 = vst [vmem:[%s9328_s28 + $0x8] sm:$0xff] %v4766_v9  ;;  %v5309_v23 = vpop.f32.mrb[148].mxu0 }
 0xf16   : > { %v5310_v20 = vpop.f32.mrb[149].mxu0 }
 0xf17   : > { %v5311_v15 = vadd.f32 %v5310_v20, %v5309_v23  ;;  %v5312_v40 = vpop.f32.mrb[150].mxu0 }
 0xf18   : > { %v5313_v24 = vpop.f32.mrb[151].mxu0 }
 0xf19   : > { %v4767_v13 = vadd.f32 %v5311_v15, %v9052_v5  ;;  %v5314_v18 = vadd.f32 %v5313_v24, %v5312_v40 }
 0xf1b   : > { %4783 = vst [vmem:[%s9328_s28 + $0x10] sm:$0xff] %v4767_v13  ;;  %v4768_v12 = vadd.f32 %v5314_v18, %v9062_v7 }
 0xf1d   : > { %4784 = vst [vmem:[%s9328_s28 + $0x18] sm:$0xff] %v4768_v12 }
 0xf46   : > { %v5315_v29 = vpop.f32.mrb[112].mxu1 }
 0xf47   : > { %v5316_v11 = vpop.f32.mrb[113].mxu1 }
 0xf48   : > { %v5317_v42 = vadd.f32 %v5316_v11, %v5315_v29  ;;  %v5318_v17 = vpop.f32.mrb[114].mxu1 }
 0xf49   : > { %v5319_v14 = vpop.f32.mrb[115].mxu1 }
 0xf4a   : > { %v4769_v33 = vadd.f32 %v5317_v42, %v9069_v56  ;;  %v5320_v6 = vadd.f32 %v5319_v14, %v5318_v17 }
 0xf4c   : > { %4785 = vst [vmem:[%s9328_s28 + $0x20] sm:$0xff] %v4769_v33  ;;  %v4770_v54 = vadd.f32 %v5320_v6, %v9075_v10 }
 0xf4e   : > { %4786 = vst [vmem:[%s9328_s28 + $0x28] sm:$0xff] %v4770_v54  ;;  %v5321_v5 = vpop.f32.mrb[116].mxu1 }
 0xf4f   : > { %v5322_v57 = vpop.f32.mrb[117].mxu1 }
 0xf50   : > { %v5323_v46 = vadd.f32 %v5322_v57, %v5321_v5  ;;  %v5324_v7 = vpop.f32.mrb[118].mxu1 }
 0xf51   : > { %v5325_v2 = vpop.f32.mrb[119].mxu1 }
 0xf52   : > { %v4771_v21 = vadd.f32 %v5323_v46, %v9072_v30  ;;  %v5326_v58 = vadd.f32 %v5325_v2, %v5324_v7 }
 0xf54   : > { %4787 = vst [vmem:[%s9328_s28 + $0x30] sm:$0xff] %v4771_v21  ;;  %v4772_v43 = vadd.f32 %v5326_v58, %v9080_v59 }
 0xf56   : > { %4788 = vst [vmem:[%s9328_s28 + $0x38] sm:$0xff] %v4772_v43 }
 0xf64   : > { %v5327_v56 = vpop.f32.mrb[120].mxu1 }
 0xf65   : > { %v5328_v22 = vpop.f32.mrb[121].mxu1 }
 0xf66   : > { %v5329_v36 = vadd.f32 %v5328_v22, %v5327_v56  ;;  %v5330_v10 = vpop.f32.mrb[122].mxu1 }
 0xf67   : > { %v5331_v60 = vpop.f32.mrb[123].mxu1 }
 0xf68   : > { %v4773_v1 = vadd.f32 %v5329_v36, %v9089_v48  ;;  %v5332_v55 = vadd.f32 %v5331_v60, %v5330_v10 }
 0xf6a   : > { %4789 = vst [vmem:[%s9328_s28 + $0x40] sm:$0xff] %v4773_v1  ;;  %v4774_v63 = vadd.f32 %v5332_v55, %v9095_v19 }
 0xf6c   : > { %4790 = vst [vmem:[%s9328_s28 + $0x48] sm:$0xff] %v4774_v63  ;;  %v5333_v30 = vpop.f32.mrb[124].mxu1 }
 0xf6d   : > { %v5334_v26 = vpop.f32.mrb[125].mxu1 }
 0xf6e   : > { %v5335_v51 = vadd.f32 %v5334_v26, %v5333_v30  ;;  %v5336_v59 = vpop.f32.mrb[126].mxu1 }
 0xf6f   : > { %v5337_v61 = vpop.f32.mrb[127].mxu1 }
 0xf70   : > { %v4775_v31 = vadd.f32 %v5335_v51, %v9092_v16  ;;  %v5338_v25 = vadd.f32 %v5337_v61, %v5336_v59 }
 0xf72   : > { %4791 = vst [vmem:[%s9328_s28 + $0x50] sm:$0xff] %v4775_v31  ;;  %v4776_v53 = vadd.f32 %v5338_v25, %v9100_v28 }
 0xf74   : > { %4792 = vst [vmem:[%s9328_s28 + $0x58] sm:$0xff] %v4776_v53 }
 0xf75   : > { %v5339_v48 = vpop.f32.mrb[128].mxu1 }
 0xf76   : > { %v5340_v49 = vpop.f32.mrb[129].mxu1 }
 0xf77   : > { %v5341_v19 = vadd.f32 %v5340_v49, %v5339_v48  ;;  %v5342_v32 = vpop.f32.mrb[130].mxu1 }
 0xf78   : > { %v5343_v52 = vpop.f32.mrb[131].mxu1 }
 0xf79   : > { %v4777_v4 = vadd.f32 %v5341_v19, %v9109_v39  ;;  %v5344_v37 = vadd.f32 %v5343_v52, %v5342_v32  ;;  %v9728_v39 = vld [vmem:[#allocation44_spill] sm:$0xff] }
 0xf7b   : > { %4793 = vst [vmem:[%s9328_s28 + $0x60] sm:$0xff] %v4777_v4  ;;  %v4778_v16 = vadd.f32 %v5344_v37, %v9115_v8 }
 0xf7d   : > { %4794 = vst [vmem:[%s9328_s28 + $0x68] sm:$0xff] %v4778_v16  ;;  %v5345_v3 = vpop.f32.mrb[132].mxu1 }
 0xf7e   : > { %v5346_v28 = vpop.f32.mrb[133].mxu1 }
 0xf7f   : > { %v5347_v45 = vadd.f32 %v5346_v28, %v5345_v3  ;;  %v5348_v0 = vpop.f32.mrb[134].mxu1 }
 0xf80   : > { %v5349_v50 = vpop.f32.mrb[135].mxu1 }
 0xf81   : > { %v4779_v35 = vadd.f32 %v5347_v45, %v9112_v34  ;;  %v5350_v41 = vadd.f32 %v5349_v50, %v5348_v0 }
 0xf83   : > { %4795 = vst [vmem:[%s9328_s28 + $0x70] sm:$0xff] %v4779_v35  ;;  %v4780_v8 = vadd.f32 %v5350_v41, %v9728_v39 }
 0xf85   : > { %4796 = vst [vmem:[%s9328_s28 + $0x78] sm:$0xff] %v4780_v8 }
 0xf86   : > { %6660 = shalt.err (!%p6657_p9)
}
 0xf87   : > { %s6661_s25 = scalar_lea.hbm %s9363_s24, 2048  ;;  %s6665_s28 = scalar_lea.hbm %s9727_s20, 4096 }
 0xf88   : > { %p6662_p4 = scmp.ne.s32.totalorder %s9363_s24, %s6661_s25  ;;  %p6666_p5 = scmp.lt.u32.totalorder %s9363_s24, %s9727_s20 }
 0xf89   : > { %p6667_p2 = scmp.lt.u32.totalorder %s6665_s28, %s6661_s25  ;;  %p6669_p10 = scmp.lt.u32.totalorder %s6661_s25, %s9363_s24 }
 0xf8a   : > { %p6663_p3 = pnand %p6662_p4, %p9729_p1 }
 0xf8b   : > { %p6668_p7 = por %p6667_p2, %p6666_p5 }
 0xf8c   : > { %p6664_p0 = pneg %p6663_p3 }
 0xf8d   : > { %p6670_p11 = por %p6669_p10, %p6668_p7 }
 0xf8f   : > { %p6671_p12 = pnand %p6670_p11, %p6664_p0 }
 0xf91   : > { %6674 = shalt.err (!%p6671_p12)
}
 0xf92   : > { %s6755_s1 = smov 128   ;;  %s6756_s30 = smov 8  }
 0xf93   : > { %5749 = dma.vmem_to_hbm [thread:$0]  (%p9729_p1), %s9365_s10, 2048, %s9363_s24, %s4798_s19, %s6755_s1, %s6755_s1, %s6756_s30  }
 0xf94 PF: > { %s4826_s18 = sand.u32 1, %s6717_s13   ;;  %p9730_p13 = scmp.ne.s32.totalorder %s9526_s26, 0 }
 0xf95   : > { %p9731_p8 = scmp.ge.s32.totalorder %s6729_s16, 2  ;;  %s4827_s22 = scalar_lea.sflag [#allocation8], %s4826_s18 }
 0xf97   : > { %p5778_p6 = pnand %p9731_p8, %p9730_p13 }
 0xf99   : > { %6712 = dma.done.wait (!%p5778_p6), %s4827_s22, 2048  }
 0xf9a   : > { %6714 = vsyncadd (!%p5778_p6), %s4827_s22, 4294965248  ;;  %p27_p9 = scmp.ge.s32.totalorder %s7018_s11, 4   ;;  %s9732_s13 = smov %s6721_s14 }
 0xf9b   : > { %s9733_s14 = smov %s6725_s15  ;;  %s9734_s15 = smov %s7030_s21 }
 0xf9c   : > { %s9735_s16 = smov %s7018_s11  ;;  %29 = sbr.rel (!%p27_p9) target bundleno = 14 (0xe), region = 133 }
 0xfa3   :  { %4832 = vsyncpa [#allocation7], 1 }
 0xfa4   :  { %4834 = vsyncpa [#allocation7 + $0x1], 1 }
 0xfa5   :  { %4835 = vsyncpa [#allocation10], 1 }
 0xfa6   :  { %4836 = vsyncpa [#allocation13], 1 }
 0xfa7   :  { %4837 = vsyncpa [#allocation16], 1 }
 0xfa8   :  { %4838 = vsyncpa [#allocation19], 1 }
 0xfa9   :  { %4839 = vsyncpa [#allocation8], 1 }
 0xfaa   :  { %4841 = vsyncpa [#allocation8 + $0x1], 1 }

</bundles_post_ra>
